<compile_context>
chip_gen: v6e
topology: v6e:2x2x1
jax: 0.10.0
libtpu: 0.0.40
codegen_flags: <defaults>
</compile_context>

<pallas_src>
import functools

import jax
import jax.numpy as jnp
from jax.experimental import pallas as pl
from jax.experimental.pallas import tpu as pltpu

EPS = 1e-5
LANE = 128


def _round_up(x, m):
    return (x + m - 1) // m * m


def _pick_row_tile(total):
    # Prefer >=2 tiles per image (pipelining / megacore) with >=128 rows/tile.
    for c in (512, 256, 128):
        if total % c == 0 and total // c >= 2:
            return c
    for c in (512, 256, 128, 64, 32, 16, 8):
        if total % c == 0:
            return c
    return total


def _pick_h_tile(h):
    for c in (64, 32, 16, 8, 4, 2):
        if h % c == 0 and h // c >= 2:
            return c
    return h


# --------------------------------------------------------------------------
# Kernels
# --------------------------------------------------------------------------
def _stage1_kernel(x_ref, w_ref, y_ref, s_ref):
    # One MXU matmul produces BOTH branches: conv_1_1 (3x3, taps collapsed
    # into K via im2col) on lanes [0:Cpo) and conv_1_2 (1x1, weight embedded
    # at the centre-tap rows) on lanes [Cpo:2Cpo).
    y = jnp.dot(x_ref[0], w_ref[...], preferred_element_type=jnp.float32)
    y_ref[0] = y.astype(y_ref.dtype)
    ssum = jnp.sum(y, axis=0, keepdims=True)
    ssq = jnp.sum(y * y, axis=0, keepdims=True)
    s_ref[0, 0] = jnp.concatenate([ssum, ssq], axis=0)        # single store


def _stage2_kernel(y_ref, ab_ref, w3_ref, w1_ref, o_ref, s_ref, pad_ref,
                   *, H, W, Cr, Cpo):
    # Folded BN affine + ReLU of stage 1 (both branches at once).
    y = y_ref[0].astype(jnp.float32)                           # (H*W, 2*Cpo)
    a = ab_ref[0:1, :]
    b = ab_ref[1:2, :]
    z = jnp.maximum(y * a + b, 0.0)

    # ---- branch 1: 3x3 SAME conv on REAL channels only ---------------------
    z3 = z[:, :Cr].reshape(H, W, Cr)
    zero_row = jnp.zeros((1, W + 2, Cr), jnp.float32)
    zero_col = jnp.zeros((H + 2, 1, Cr), jnp.float32)
    pad_ref[0:1, :, :] = zero_row                # only the 1-px border strips
    pad_ref[H + 1:H + 2, :, :] = zero_row
    pad_ref[:, 0:1, :] = zero_col
    pad_ref[:, W + 1:W + 2, :] = zero_col
    pad_ref[1:H + 1, 1:W + 1, :] = z3

    acc3 = None
    for t in range(9):
        dy, dx = divmod(t, 3)
        tap = pad_ref[dy:dy + H, dx:dx + W, :].reshape(H * W, Cr)
        part = jnp.dot(tap, w3_ref[t], preferred_element_type=jnp.float32)
        acc3 = part if acc3 is None else acc3 + part

    # ---- branch 2: 1x1 conv on REAL channels --------------------------------
    acc1 = jnp.dot(z[:, Cpo:Cpo + Cr], w1_ref[...],
                   preferred_element_type=jnp.float32)

    o_ref[0, :, :Cpo] = acc3.astype(o_ref.dtype)
    o_ref[0, :, Cpo:] = acc1.astype(o_ref.dtype)

    s3 = jnp.concatenate([jnp.sum(acc3, axis=0, keepdims=True),
                          jnp.sum(acc3 * acc3, axis=0, keepdims=True)], axis=0)
    s1 = jnp.concatenate([jnp.sum(acc1, axis=0, keepdims=True),
                          jnp.sum(acc1 * acc1, axis=0, keepdims=True)], axis=0)
    s_ref[0] = jnp.concatenate([s3, s1], axis=-1)              # (2, 2*Cpo)


def _final_pool_kernel(y_ref, ab_ref, o_ref, *, TH, Wh, Cpo):
    # Blocks arrive as (1, TH, W//2, 4*Cpo): [pix-even br1 | pix-even br2 |
    # pix-odd br1 | pix-odd br2] on the lane axis, so the 2x2 pool needs only
    # 128-aligned lane slices (W) and a leading-dim split (H).
    v = y_ref[0].astype(jnp.float32)                           # (TH, Wh, 4*Cpo)
    a = ab_ref[0:1, :].reshape(1, 1, 4 * Cpo)
    b = ab_ref[1:2, :].reshape(1, 1, 4 * Cpo)
    s = jnp.maximum(v * a + b, 0.0)
    p_even = s[:, :, 0:Cpo] + s[:, :, Cpo:2 * Cpo]             # branch1+branch2
    p_odd = s[:, :, 2 * Cpo:3 * Cpo] + s[:, :, 3 * Cpo:4 * Cpo]
    sw = jnp.maximum(p_even, p_odd)                            # pool along W
    sr = sw.reshape(TH // 2, 2, Wh, Cpo)
    o_ref[0] = jnp.maximum(sr[:, 0], sr[:, 1])                 # pool along H


def _final_kernel(y_ref, ab_ref, o_ref, *, Cpo):
    # downsample=False path: folded BN + ReLU + add, no pooling.
    y = y_ref[0].astype(jnp.float32)
    a = ab_ref[0:1, :]
    b = ab_ref[1:2, :]
    s = jnp.maximum(y * a + b, 0.0)
    o_ref[0] = s[:, :Cpo] + s[:, Cpo:]


# --------------------------------------------------------------------------
# Glue: BN statistic reduction + affine fold  (O(C) work in XLA)
# --------------------------------------------------------------------------
def _bn_fold(stats, gamma, beta, count):
    # stats[..., 0, :] = per-tile channel sums, stats[..., 1, :] = sums of sq.
    C = stats.shape[-1]
    s = stats[..., 0, :].reshape(-1, C).sum(axis=0)
    ss = stats[..., 1, :].reshape(-1, C).sum(axis=0)
    mean = s / count
    var = jnp.maximum(ss / count - mean * mean, 0.0)
    a = gamma * jax.lax.rsqrt(var + EPS)
    b = beta - mean * a
    return jnp.stack([a, b], axis=0)                           # (2, C) packed


# --------------------------------------------------------------------------
# Forward
# --------------------------------------------------------------------------
def down_block_forward(x_nchw, p, downsample=True, act_dtype=jnp.float32):
    x = jnp.transpose(x_nchw, (0, 2, 3, 1)).astype(jnp.float32)      # NHWC
    N, H, W, Cin = x.shape
    Cout = p["w12"].shape[-1]
    Cr = Cout
    Cpo = _round_up(Cout, LANE)
    HW = H * W
    M = N * HW
    if downsample:
        assert H % 2 == 0 and W % 2 == 0

    # ---- one-time XLA layout glue ------------------------------------------
    # im2col of x at REAL channel width; for 9*Cin <= 128 this is no more HBM
    # bytes than a channel-padded input and makes stage 1 a single matmul.
    xp = jnp.pad(x, ((0, 0), (1, 1), (1, 1), (0, 0)))
    cols = [xp[:, dy:dy + H, dx:dx + W, :] for dy in range(3) for dx in range(3)]
    x_im = jnp.concatenate(cols, axis=-1).reshape(N, HW, 9 * Cin)
    K1 = 9 * Cin

    def padc(v):
        return jnp.pad(v, [(0, 0)] * (v.ndim - 1) + [(0, Cpo - Cout)])

    # Combined stage-1 weight: cols [0:Cpo) = conv_1_1 (3x3), cols [Cpo:2Cpo)
    # = conv_1_2 (1x1) embedded at the centre-tap rows (free centre-tap reuse).
    w11_rs = p["w11"].reshape(K1, Cout)
    w12_emb = jnp.zeros((K1, Cout), jnp.float32
                        ).at[4 * Cin:5 * Cin, :].set(p["w12"])
    wc1 = jnp.concatenate([padc(w11_rs), padc(w12_emb)], axis=1)     # (K1, 2Cpo)

    # Stage-2 weights at real input-channel width.
    w21 = padc(p["w21"].reshape(9, Cout, Cout))                      # (9, Cr, Cpo)
    w22 = padc(p["w22"])                                             # (Cr, Cpo)

    gc1 = jnp.concatenate([padc(p["g11"]), padc(p["g12"])])
    bc1 = jnp.concatenate([padc(p["bt11"]), padc(p["bt12"])])
    gc2 = jnp.concatenate([padc(p["g21"]), padc(p["g22"])])
    bc2 = jnp.concatenate([padc(p["bt21"]), padc(p["bt22"])])

    parallel2 = pltpu.CompilerParams(
        dimension_semantics=("parallel", "parallel"))

    # ---- stage 1: one matmul per row tile, both branches + BN stats ---------
    TM = _pick_row_tile(HW)
    T1 = HW // TM
    y1c, st1 = pl.pallas_call(
        _stage1_kernel,
        grid=(N, T1),
        in_specs=[
            pl.BlockSpec((1, TM, K1), lambda n, t: (n, t, 0)),
            pl.BlockSpec((K1, 2 * Cpo), lambda n, t: (0, 0)),
        ],
        out_specs=[
            pl.BlockSpec((1, TM, 2 * Cpo), lambda n, t: (n, t, 0)),
            pl.BlockSpec((1, 1, 2, 2 * Cpo), lambda n, t: (n, t, 0, 0)),
        ],
        out_shape=[
            jax.ShapeDtypeStruct((N, HW, 2 * Cpo), act_dtype),
            jax.ShapeDtypeStruct((N, T1, 2, 2 * Cpo), jnp.float32),
        ],
        compiler_params=parallel2,
    )(x_im, wc1)

    ab1 = _bn_fold(st1, gc1, bc1, M)                                 # (2, 2Cpo)

    # ---- stage 2: folded BN + ReLU + conv_2_1 / conv_2_2 + stats ------------
    k2 = functools.partial(_stage2_kernel, H=H, W=W, Cr=Cr, Cpo=Cpo)
    y2c, st2 = pl.pallas_call(
        k2,
        grid=(N,),
        in_specs=[
            pl.BlockSpec((1, HW, 2 * Cpo), lambda n: (n, 0, 0)),
            pl.BlockSpec((2, 2 * Cpo), lambda n: (0, 0)),
            pl.BlockSpec((9, Cr, Cpo), lambda n: (0, 0, 0)),
            pl.BlockSpec((Cr, Cpo), lambda n: (0, 0)),
        ],
        out_specs=[
            pl.BlockSpec((1, HW, 2 * Cpo), lambda n: (n, 0, 0)),
            pl.BlockSpec((1, 2, 2 * Cpo), lambda n: (n, 0, 0)),
        ],
        out_shape=[
            jax.ShapeDtypeStruct((N, HW, 2 * Cpo), act_dtype),
            jax.ShapeDtypeStruct((N, 2, 2 * Cpo), jnp.float32),
        ],
        scratch_shapes=[pltpu.VMEM((H + 2, W + 2, Cr), jnp.float32)],
        compiler_params=pltpu.CompilerParams(
            dimension_semantics=("parallel",)),
    )(y1c, ab1, w21, w22)

    ab2 = _bn_fold(st2, gc2, bc2, M)                                 # (2, 2Cpo)

    # ---- final: folded BN + ReLU both branches, add, (fused 2x2 max-pool) ---
    if downsample:
        Hh, Wh = H // 2, W // 2
        TH = _pick_h_tile(H)
        # Free contiguous reshape packs W-adjacent pixel pairs on lanes.
        y2v = y2c.reshape(N, H, Wh, 4 * Cpo)
        ab2d = jnp.concatenate([ab2, ab2], axis=1)                   # (2, 4Cpo)
        kf = functools.partial(_final_pool_kernel, TH=TH, Wh=Wh, Cpo=Cpo)
        out = pl.pallas_call(
            kf,
            grid=(N, H // TH),
            in_specs=[
                pl.BlockSpec((1, TH, Wh, 4 * Cpo), lambda n, t: (n, t, 0, 0)),
                pl.BlockSpec((2, 4 * Cpo), lambda n, t: (0, 0)),
            ],
            out_specs=pl.BlockSpec((1, TH // 2, Wh, Cpo),
                                   lambda n, t: (n, t, 0, 0)),
            out_shape=jax.ShapeDtypeStruct((N, Hh, Wh, Cpo), jnp.float32),
            compiler_params=parallel2,
        )(y2v, ab2d)
        out = out[..., :Cout]
    else:
        TMf = _pick_row_tile(HW)
        kf = functools.partial(_final_kernel, Cpo=Cpo)
        out = pl.pallas_call(
            kf,
            grid=(N, HW // TMf),
            in_specs=[
                pl.BlockSpec((1, TMf, 2 * Cpo), lambda n, t: (n, t, 0)),
                pl.BlockSpec((2, 2 * Cpo), lambda n, t: (0, 0)),
            ],
            out_specs=pl.BlockSpec((1, TMf, Cpo), lambda n, t: (n, t, 0)),
            out_shape=jax.ShapeDtypeStruct((N, HW, Cpo), jnp.float32),
            compiler_params=parallel2,
        )(y2c, ab2)
        out = out.reshape(N, H, W, Cpo)[..., :Cout]

    # TODO(synk): when chaining into another NHWC Pallas block, skip this slice
    # and transpose (keep activations NHWC + channel-padded between blocks).
    return jnp.transpose(out, (0, 3, 1, 2))                          # NCHW


# --------------------------------------------------------------------------
# Pure-JAX reference (matches the PyTorch module in training mode)
# --------------------------------------------------------------------------
def _ref_bn_relu(x, g, bt):
    mean = x.mean(axis=(0, 1, 2), keepdims=True)
    var = ((x - mean) ** 2).mean(axis=(0, 1, 2), keepdims=True)
    y = (x - mean) * jax.lax.rsqrt(var + EPS)
    return jnp.maximum(y * g.reshape(1, 1, 1, -1) + bt.reshape(1, 1, 1, -1), 0.0)


def _ref_conv(x, w, b):
    y = jax.lax.conv_general_dilated(
        x, w, (1, 1), "SAME", dimension_numbers=("NHWC", "HWIO", "NHWC"))
    return y + b.reshape(1, 1, 1, -1)


def down_block_ref(x_nchw, p, downsample=True):
    x = jnp.transpose(x_nchw, (0, 2, 3, 1)).astype(jnp.float32)
    Cin, Cout = p["w12"].shape
    a = _ref_bn_relu(_ref_conv(x, p["w11"], p["b11"]), p["g11"], p["bt11"])
    a = _ref_bn_relu(_ref_conv(a, p["w21"], p["b21"]), p["g21"], p["bt21"])
    b = _ref_bn_relu(_ref_conv(x, p["w12"].reshape(1, 1, Cin, Cout), p["b12"]),
                     p["g12"], p["bt12"])
    b = _ref_bn_relu(_ref_conv(b, p["w22"].reshape(1, 1, Cout, Cout), p["b22"]),
                     p["g22"], p["bt22"])
    s = a + b
    if downsample:
        s = jnp.maximum(jnp.maximum(s[:, ::2, ::2, :], s[:, ::2, 1::2, :]),
                        jnp.maximum(s[:, 1::2, ::2, :], s[:, 1::2, 1::2, :]))
    return jnp.transpose(s, (0, 3, 1, 2))


# --------------------------------------------------------------------------
# Deterministic parameter init + driver
# --------------------------------------------------------------------------
def init_params(key, cin, cout):
    ks = jax.random.split(key, 12)

    def w(k, shape, scale):
        return jax.random.normal(k, shape, jnp.float32) * scale

    p = {
        "w11": w(ks[0], (3, 3, cin, cout), 0.2),  "b11": w(ks[1], (cout,), 0.1),
        "w21": w(ks[2], (3, 3, cout, cout), 0.2), "b21": w(ks[3], (cout,), 0.1),
        "w12": w(ks[4], (cin, cout), 0.2),        "b12": w(ks[5], (cout,), 0.1),
        "w22": w(ks[6], (cout, cout), 0.2),       "b22": w(ks[7], (cout,), 0.1),
    }
    for idx, name in zip(range(8, 12), ("11", "21", "12", "22")):
        p["g" + name] = 1.0 + 0.1 * jax.random.normal(ks[idx], (cout,), jnp.float32)
        p["bt" + name] = 0.05 * jax.random.normal(
            jax.random.fold_in(ks[idx], 1), (cout,), jnp.float32)
    return p


if __name__ == "__main__":
    key = jax.random.PRNGKey(0)
    kx, kp = jax.random.split(key)
    N, Cin, H, W = 2, 4, 16, 16
    Cout = 8
    x = jax.random.normal(kx, (N, Cin, H, W), jnp.float32)   # NCHW, like PyTorch
    params = init_params(kp, Cin, Cout)

    # downsample=True, exact-f32 path
    fwd = jax.jit(functools.partial(down_block_forward, downsample=True))
    out = jax.block_until_ready(fwd(x, params))
    ref = jax.block_until_ready(down_block_ref(x, params, downsample=True))
    assert out.shape == (N, Cout, H // 2, W // 2), out.shape
    err = float(jnp.max(jnp.abs(out - ref)))
    assert jnp.allclose(out, ref, atol=1e-3, rtol=1e-3), err

    # downsample=False path
    fwd_nd = jax.jit(functools.partial(down_block_forward, downsample=False))
    out_nd = jax.block_until_ready(fwd_nd(x, params))
    ref_nd = jax.block_until_ready(down_block_ref(x, params, downsample=False))
    assert out_nd.shape == (N, Cout, H, W), out_nd.shape
    err_nd = float(jnp.max(jnp.abs(out_nd - ref_nd)))
    assert jnp.allclose(out_nd, ref_nd, atol=1e-3, rtol=1e-3), err_nd

    # bf16 inter-stage activations (review item; f32 accumulation + f32 stats)
    fwd_bf = jax.jit(functools.partial(down_block_forward, downsample=True,
                                       act_dtype=jnp.bfloat16))
    out_bf = jax.block_until_ready(fwd_bf(x, params))
    err_bf = float(jnp.max(jnp.abs(out_bf - ref)))
    assert jnp.allclose(out_bf, ref, atol=5e-2, rtol=5e-2), err_bf

    print("KERNEL_OK")
</pallas_src>

<mosaic_0001>
module attributes {stable_mosaic.version = 11 : i64} {
  func.func @_stage1_kernel(%arg0: i32, %arg1: i32, %arg2: memref<1x128x36xf32, #tpu.memory_space<vmem>>, %arg3: memref<36x256xf32, #tpu.memory_space<vmem>>, %arg4: memref<1x128x256xf32, #tpu.memory_space<vmem>>, %arg5: memref<1x1x2x256xf32, #tpu.memory_space<vmem>>) attributes {dimension_semantics = [#tpu.dimension_semantics<parallel>, #tpu.dimension_semantics<parallel>], iteration_bounds = array<i64: 2, 2>, scalar_prefetch = 0 : i64, scratch_operands = 0 : i64, tpu.core_type = #tpu.core_type<tc>, window_params = [{transform_indices = @transform_0, window_bounds = array<i64: 1, 128, 36>}, {pipeline_mode = #tpu.pipeline_mode<synchronous>, transform_indices = @transform_1, window_bounds = array<i64: 36, 256>}, {transform_indices = @transform_2, window_bounds = array<i64: 1, 128, 256>}, {transform_indices = @transform_3, window_bounds = array<i64: 1, 1, 2, 256>}]} {
    %c0 = arith.constant 0 : index
    %c0_0 = arith.constant 0 : index
    %c0_1 = arith.constant 0 : index
    %0 = vector.load %arg2[%c0, %c0_0, %c0_1] : memref<1x128x36xf32, #tpu.memory_space<vmem>>, vector<1x128x36xf32>
    %1 = vector.shape_cast %0 : vector<1x128x36xf32> to vector<128x36xf32>
    %c0_2 = arith.constant 0 : index
    %c0_3 = arith.constant 0 : index
    %2 = vector.load %arg3[%c0_2, %c0_3] : memref<36x256xf32, #tpu.memory_space<vmem>>, vector<36x256xf32>
    %cst = arith.constant dense<0.000000e+00> : vector<128x256xf32>
    %3 = tpu.matmul %1, %2, %cst {dimension_numbers = #tpu.dot_dimension_numbers<[1], [0], [0], [1], [0, 0, 1, 1], [], []>} : vector<128x36xf32>, vector<36x256xf32>, vector<128x256xf32> -> vector<128x256xf32>
    %c0_4 = arith.constant 0 : index
    %c0_5 = arith.constant 0 : index
    %c0_6 = arith.constant 0 : index
    %4 = vector.load %arg4[%c0_4, %c0_5, %c0_6] : memref<1x128x256xf32, #tpu.memory_space<vmem>>, vector<1x128x256xf32>
    %5 = vector.shape_cast %4 : vector<1x128x256xf32> to vector<128x256xf32>
    %6 = vector.shape_cast %3 : vector<128x256xf32> to vector<1x128x256xf32>
    tpu.vector_store %arg4[%c0_4, %c0_5, %c0_6], %6 {strides = array<i32>} : memref<1x128x256xf32, #tpu.memory_space<vmem>>, vector<1x128x256xf32>,
    %cst_7 = arith.constant dense<0.000000e+00> : vector<256xf32>
    %7 = vector.multi_reduction <add>, %3, %cst_7 [0] : vector<128x256xf32> to vector<256xf32>
    %8 = vector.shape_cast %7 : vector<256xf32> to vector<1x256xf32>
    %9 = arith.mulf %3, %3 : vector<128x256xf32>
    %cst_8 = arith.constant dense<0.000000e+00> : vector<256xf32>
    %10 = vector.multi_reduction <add>, %9, %cst_8 [0] : vector<128x256xf32> to vector<256xf32>
    %11 = vector.shape_cast %10 : vector<256xf32> to vector<1x256xf32>
    %12 = tpu.concatenate %8, %11 in 0 : vector<1x256xf32>, vector<1x256xf32> -> vector<2x256xf32>
    %c0_9 = arith.constant 0 : index
    %c0_10 = arith.constant 0 : index
    %c0_11 = arith.constant 0 : index
    %c0_12 = arith.constant 0 : index
    %13 = vector.load %arg5[%c0_9, %c0_10, %c0_11, %c0_12] : memref<1x1x2x256xf32, #tpu.memory_space<vmem>>, vector<1x1x2x256xf32>
    %14 = vector.shape_cast %13 : vector<1x1x2x256xf32> to vector<2x256xf32>
    %15 = vector.shape_cast %12 : vector<2x256xf32> to vector<1x1x2x256xf32>
    tpu.vector_store %arg5[%c0_9, %c0_10, %c0_11, %c0_12], %15 {strides = array<i32>} : memref<1x1x2x256xf32, #tpu.memory_space<vmem>>, vector<1x1x2x256xf32>,
    return
  }
  func.func @transform_0(%arg0: i32, %arg1: i32) -> (i32, i32, i32) {
    %c0_i32 = arith.constant 0 : i32
    %c0_i32_0 = arith.constant 0 : i32
    return %arg0, %arg1, %c0_i32 : i32, i32, i32
  }
  func.func @transform_1(%arg0: i32, %arg1: i32) -> (i32, i32) {
    %c0_i32 = arith.constant 0 : i32
    %c0_i32_0 = arith.constant 0 : i32
    %c0_i32_1 = arith.constant 0 : i32
    return %c0_i32, %c0_i32_0 : i32, i32
  }
  func.func @transform_2(%arg0: i32, %arg1: i32) -> (i32, i32, i32) {
    %c0_i32 = arith.constant 0 : i32
    %c0_i32_0 = arith.constant 0 : i32
    return %arg0, %arg1, %c0_i32 : i32, i32, i32
  }
  func.func @transform_3(%arg0: i32, %arg1: i32) -> (i32, i32, i32, i32) {
    %c0_i32 = arith.constant 0 : i32
    %c0_i32_0 = arith.constant 0 : i32
    %c0_i32_1 = arith.constant 0 : i32
    return %arg0, %arg1, %c0_i32, %c0_i32_0 : i32, i32, i32, i32
  }
}

module attributes {stable_mosaic.version = 11 : i64} {
  func.func @_stage2_kernel(%arg0: i32, %arg1: memref<1x256x256xf32, #tpu.memory_space<vmem>>, %arg2: memref<2x256xf32, #tpu.memory_space<vmem>>, %arg3: memref<9x8x128xf32, #tpu.memory_space<vmem>>, %arg4: memref<8x128xf32, #tpu.memory_space<vmem>>, %arg5: memref<1x256x256xf32, #tpu.memory_space<vmem>>, %arg6: memref<1x2x256xf32, #tpu.memory_space<vmem>>, %arg7: memref<18x18x8xf32, #tpu.memory_space<vmem>>) attributes {dimension_semantics = [#tpu.dimension_semantics<parallel>], iteration_bounds = array<i64: 2>, scalar_prefetch = 0 : i64, scratch_operands = 1 : i64, tpu.core_type = #tpu.core_type<tc>, window_params = [{transform_indices = @transform_0, window_bounds = array<i64: 1, 256, 256>}, {pipeline_mode = #tpu.pipeline_mode<synchronous>, transform_indices = @transform_1, window_bounds = array<i64: 2, 256>}, {pipeline_mode = #tpu.pipeline_mode<synchronous>, transform_indices = @transform_2, window_bounds = array<i64: 9, 8, 128>}, {pipeline_mode = #tpu.pipeline_mode<synchronous>, transform_indices = @transform_3, window_bounds = array<i64: 8, 128>}, {transform_indices = @transform_4, window_bounds = array<i64: 1, 256, 256>}, {transform_indices = @transform_5, window_bounds = array<i64: 1, 2, 256>}]} {
    %c0 = arith.constant 0 : index
    %c0_0 = arith.constant 0 : index
    %c0_1 = arith.constant 0 : index
    %0 = vector.load %arg1[%c0, %c0_0, %c0_1] : memref<1x256x256xf32, #tpu.memory_space<vmem>>, vector<1x256x256xf32>
    %1 = vector.shape_cast %0 : vector<1x256x256xf32> to vector<256x256xf32>
    %c0_2 = arith.constant 0 : index
    %c0_3 = arith.constant 0 : index
    %2 = vector.load %arg2[%c0_2, %c0_3] : memref<2x256xf32, #tpu.memory_space<vmem>>, vector<1x256xf32>
    %c1 = arith.constant 1 : index
    %c0_4 = arith.constant 0 : index
    %3 = vector.load %arg2[%c1, %c0_4] : memref<2x256xf32, #tpu.memory_space<vmem>>, vector<1x256xf32>
    %4 = vector.broadcast %2 : vector<1x256xf32> to vector<256x256xf32>
    %5 = arith.mulf %1, %4 : vector<256x256xf32>
    %6 = vector.broadcast %3 : vector<1x256xf32> to vector<256x256xf32>
    %7 = arith.addf %5, %6 : vector<256x256xf32>
    %cst = arith.constant 0.000000e+00 : f32
    %8 = vector.broadcast %cst : f32 to vector<256x256xf32>
    %9 = arith.maximumf %7, %8 : vector<256x256xf32>
    %10 = vector.extract_strided_slice %9 {offsets = [0, 0], sizes = [256, 8], strides = [1, 1]} : vector<256x256xf32> to vector<256x8xf32>
    %11 = vector.shape_cast %10 : vector<256x8xf32> to vector<16x16x8xf32>
    %cst_5 = arith.constant 0.000000e+00 : f32
    %12 = vector.broadcast %cst_5 : f32 to vector<1x18x8xf32>
    %cst_6 = arith.constant 0.000000e+00 : f32
    %13 = vector.broadcast %cst_6 : f32 to vector<18x1x8xf32>
    %c0_7 = arith.constant 0 : index
    %c0_8 = arith.constant 0 : index
    %c0_9 = arith.constant 0 : index
    %14 = vector.load %arg7[%c0_7, %c0_8, %c0_9] : memref<18x18x8xf32, #tpu.memory_space<vmem>>, vector<1x18x8xf32>
    tpu.vector_store %arg7[%c0_7, %c0_8, %c0_9], %12 {strides = array<i32>} : memref<18x18x8xf32, #tpu.memory_space<vmem>>, vector<1x18x8xf32>,
    %c17 = arith.constant 17 : index
    %c0_10 = arith.constant 0 : index
    %c0_11 = arith.constant 0 : index
    %15 = vector.load %arg7[%c17, %c0_10, %c0_11] : memref<18x18x8xf32, #tpu.memory_space<vmem>>, vector<1x18x8xf32>
    tpu.vector_store %arg7[%c17, %c0_10, %c0_11], %12 {strides = array<i32>} : memref<18x18x8xf32, #tpu.memory_space<vmem>>, vector<1x18x8xf32>,
    %c0_12 = arith.constant 0 : index
    %c0_13 = arith.constant 0 : index
    %c0_14 = arith.constant 0 : index
    %16 = vector.load %arg7[%c0_12, %c0_13, %c0_14] : memref<18x18x8xf32, #tpu.memory_space<vmem>>, vector<18x1x8xf32>
    tpu.vector_store %arg7[%c0_12, %c0_13, %c0_14], %13 {strides = array<i32>} : memref<18x18x8xf32, #tpu.memory_space<vmem>>, vector<18x1x8xf32>,
    %c0_15 = arith.constant 0 : index
    %c17_16 = arith.constant 17 : index
    %c0_17 = arith.constant 0 : index
    %17 = vector.load %arg7[%c0_15, %c17_16, %c0_17] : memref<18x18x8xf32, #tpu.memory_space<vmem>>, vector<18x1x8xf32>
    tpu.vector_store %arg7[%c0_15, %c17_16, %c0_17], %13 {strides = array<i32>} : memref<18x18x8xf32, #tpu.memory_space<vmem>>, vector<18x1x8xf32>,
    %c1_18 = arith.constant 1 : index
    %c1_19 = arith.constant 1 : index
    %c0_20 = arith.constant 0 : index
    %18 = vector.load %arg7[%c1_18, %c1_19, %c0_20] : memref<18x18x8xf32, #tpu.memory_space<vmem>>, vector<16x16x8xf32>
    tpu.vector_store %arg7[%c1_18, %c1_19, %c0_20], %11 {strides = array<i32>} : memref<18x18x8xf32, #tpu.memory_space<vmem>>, vector<16x16x8xf32>,
    %c0_21 = arith.constant 0 : index
    %c0_22 = arith.constant 0 : index
    %c0_23 = arith.constant 0 : index
    %19 = vector.load %arg7[%c0_21, %c0_22, %c0_23] : memref<18x18x8xf32, #tpu.memory_space<vmem>>, vector<16x16x8xf32>
    %20 = vector.shape_cast %19 : vector<16x16x8xf32> to vector<256x8xf32>
    %c0_24 = arith.constant 0 : index
    %c0_25 = arith.constant 0 : index
    %c0_26 = arith.constant 0 : index
    %21 = vector.load %arg3[%c0_24, %c0_25, %c0_26] : memref<9x8x128xf32, #tpu.memory_space<vmem>>, vector<1x8x128xf32>
    %22 = vector.shape_cast %21 : vector<1x8x128xf32> to vector<8x128xf32>
    %cst_27 = arith.constant dense<0.000000e+00> : vector<256x128xf32>
    %23 = tpu.matmul %20, %22, %cst_27 {dimension_numbers = #tpu.dot_dimension_numbers<[1], [0], [0], [1], [0, 0, 1, 1], [], []>} : vector<256x8xf32>, vector<8x128xf32>, vector<256x128xf32> -> vector<256x128xf32>
    %c0_28 = arith.constant 0 : index
    %c1_29 = arith.constant 1 : index
    %c0_30 = arith.constant 0 : index
    %24 = vector.load %arg7[%c0_28, %c1_29, %c0_30] : memref<18x18x8xf32, #tpu.memory_space<vmem>>, vector<16x16x8xf32>
    %25 = vector.shape_cast %24 : vector<16x16x8xf32> to vector<256x8xf32>
    %c1_31 = arith.constant 1 : index
    %c0_32 = arith.constant 0 : index
    %c0_33 = arith.constant 0 : index
    %26 = vector.load %arg3[%c1_31, %c0_32, %c0_33] : memref<9x8x128xf32, #tpu.memory_space<vmem>>, vector<1x8x128xf32>
    %27 = vector.shape_cast %26 : vector<1x8x128xf32> to vector<8x128xf32>
    %cst_34 = arith.constant dense<0.000000e+00> : vector<256x128xf32>
    %28 = tpu.matmul %25, %27, %cst_34 {dimension_numbers = #tpu.dot_dimension_numbers<[1], [0], [0], [1], [0, 0, 1, 1], [], []>} : vector<256x8xf32>, vector<8x128xf32>, vector<256x128xf32> -> vector<256x128xf32>
    %29 = arith.addf %23, %28 : vector<256x128xf32>
    %c0_35 = arith.constant 0 : index
    %c2 = arith.constant 2 : index
    %c0_36 = arith.constant 0 : index
    %30 = vector.load %arg7[%c0_35, %c2, %c0_36] : memref<18x18x8xf32, #tpu.memory_space<vmem>>, vector<16x16x8xf32>
    %31 = vector.shape_cast %30 : vector<16x16x8xf32> to vector<256x8xf32>
    %c2_37 = arith.constant 2 : index
    %c0_38 = arith.constant 0 : index
    %c0_39 = arith.constant 0 : index
    %32 = vector.load %arg3[%c2_37, %c0_38, %c0_39] : memref<9x8x128xf32, #tpu.memory_space<vmem>>, vector<1x8x128xf32>
    %33 = vector.shape_cast %32 : vector<1x8x128xf32> to vector<8x128xf32>
    %cst_40 = arith.constant dense<0.000000e+00> : vector<256x128xf32>
    %34 = tpu.matmul %31, %33, %cst_40 {dimension_numbers = #tpu.dot_dimension_numbers<[1], [0], [0], [1], [0, 0, 1, 1], [], []>} : vector<256x8xf32>, vector<8x128xf32>, vector<256x128xf32> -> vector<256x128xf32>
    %35 = arith.addf %29, %34 : vector<256x128xf32>
    %c1_41 = arith.constant 1 : index
    %c0_42 = arith.constant 0 : index
    %c0_43 = arith.constant 0 : index
    %36 = vector.load %arg7[%c1_41, %c0_42, %c0_43] : memref<18x18x8xf32, #tpu.memory_space<vmem>>, vector<16x16x8xf32>
    %37 = vector.shape_cast %36 : vector<16x16x8xf32> to vector<256x8xf32>
    %c3 = arith.constant 3 : index
    %c0_44 = arith.constant 0 : index
    %c0_45 = arith.constant 0 : index
    %38 = vector.load %arg3[%c3, %c0_44, %c0_45] : memref<9x8x128xf32, #tpu.memory_space<vmem>>, vector<1x8x128xf32>
    %39 = vector.shape_cast %38 : vector<1x8x128xf32> to vector<8x128xf32>
    %cst_46 = arith.constant dense<0.000000e+00> : vector<256x128xf32>
    %40 = tpu.matmul %37, %39, %cst_46 {dimension_numbers = #tpu.dot_dimension_numbers<[1], [0], [0], [1], [0, 0, 1, 1], [], []>} : vector<256x8xf32>, vector<8x128xf32>, vector<256x128xf32> -> vector<256x128xf32>
    %41 = arith.addf %35, %40 : vector<256x128xf32>
    %c1_47 = arith.constant 1 : index
    %c1_48 = arith.constant 1 : index
    %c0_49 = arith.constant 0 : index
    %42 = vector.load %arg7[%c1_47, %c1_48, %c0_49] : memref<18x18x8xf32, #tpu.memory_space<vmem>>, vector<16x16x8xf32>
    %43 = vector.shape_cast %42 : vector<16x16x8xf32> to vector<256x8xf32>
    %c4 = arith.constant 4 : index
    %c0_50 = arith.constant 0 : index
    %c0_51 = arith.constant 0 : index
    %44 = vector.load %arg3[%c4, %c0_50, %c0_51] : memref<9x8x128xf32, #tpu.memory_space<vmem>>, vector<1x8x128xf32>
    %45 = vector.shape_cast %44 : vector<1x8x128xf32> to vector<8x128xf32>
    %cst_52 = arith.constant dense<0.000000e+00> : vector<256x128xf32>
    %46 = tpu.matmul %43, %45, %cst_52 {dimension_numbers = #tpu.dot_dimension_numbers<[1], [0], [0], [1], [0, 0, 1, 1], [], []>} : vector<256x8xf32>, vector<8x128xf32>, vector<256x128xf32> -> vector<256x128xf32>
    %47 = arith.addf %41, %46 : vector<256x128xf32>
    %c1_53 = arith.constant 1 : index
    %c2_54 = arith.constant 2 : index
    %c0_55 = arith.constant 0 : index
    %48 = vector.load %arg7[%c1_53, %c2_54, %c0_55] : memref<18x18x8xf32, #tpu.memory_space<vmem>>, vector<16x16x8xf32>
    %49 = vector.shape_cast %48 : vector<16x16x8xf32> to vector<256x8xf32>
    %c5 = arith.constant 5 : index
    %c0_56 = arith.constant 0 : index
    %c0_57 = arith.constant 0 : index
    %50 = vector.load %arg3[%c5, %c0_56, %c0_57] : memref<9x8x128xf32, #tpu.memory_space<vmem>>, vector<1x8x128xf32>
    %51 = vector.shape_cast %50 : vector<1x8x128xf32> to vector<8x128xf32>
    %cst_58 = arith.constant dense<0.000000e+00> : vector<256x128xf32>
    %52 = tpu.matmul %49, %51, %cst_58 {dimension_numbers = #tpu.dot_dimension_numbers<[1], [0], [0], [1], [0, 0, 1, 1], [], []>} : vector<256x8xf32>, vector<8x128xf32>, vector<256x128xf32> -> vector<256x128xf32>
    %53 = arith.addf %47, %52 : vector<256x128xf32>
    %c2_59 = arith.constant 2 : index
    %c0_60 = arith.constant 0 : index
    %c0_61 = arith.constant 0 : index
    %54 = vector.load %arg7[%c2_59, %c0_60, %c0_61] : memref<18x18x8xf32, #tpu.memory_space<vmem>>, vector<16x16x8xf32>
    %55 = vector.shape_cast %54 : vector<16x16x8xf32> to vector<256x8xf32>
    %c6 = arith.constant 6 : index
    %c0_62 = arith.constant 0 : index
    %c0_63 = arith.constant 0 : index
    %56 = vector.load %arg3[%c6, %c0_62, %c0_63] : memref<9x8x128xf32, #tpu.memory_space<vmem>>, vector<1x8x128xf32>
    %57 = vector.shape_cast %56 : vector<1x8x128xf32> to vector<8x128xf32>
    %cst_64 = arith.constant dense<0.000000e+00> : vector<256x128xf32>
    %58 = tpu.matmul %55, %57, %cst_64 {dimension_numbers = #tpu.dot_dimension_numbers<[1], [0], [0], [1], [0, 0, 1, 1], [], []>} : vector<256x8xf32>, vector<8x128xf32>, vector<256x128xf32> -> vector<256x128xf32>
    %59 = arith.addf %53, %58 : vector<256x128xf32>
    %c2_65 = arith.constant 2 : index
    %c1_66 = arith.constant 1 : index
    %c0_67 = arith.constant 0 : index
    %60 = vector.load %arg7[%c2_65, %c1_66, %c0_67] : memref<18x18x8xf32, #tpu.memory_space<vmem>>, vector<16x16x8xf32>
    %61 = vector.shape_cast %60 : vector<16x16x8xf32> to vector<256x8xf32>
    %c7 = arith.constant 7 : index
    %c0_68 = arith.constant 0 : index
    %c0_69 = arith.constant 0 : index
    %62 = vector.load %arg3[%c7, %c0_68, %c0_69] : memref<9x8x128xf32, #tpu.memory_space<vmem>>, vector<1x8x128xf32>
    %63 = vector.shape_cast %62 : vector<1x8x128xf32> to vector<8x128xf32>
    %cst_70 = arith.constant dense<0.000000e+00> : vector<256x128xf32>
    %64 = tpu.matmul %61, %63, %cst_70 {dimension_numbers = #tpu.dot_dimension_numbers<[1], [0], [0], [1], [0, 0, 1, 1], [], []>} : vector<256x8xf32>, vector<8x128xf32>, vector<256x128xf32> -> vector<256x128xf32>
    %65 = arith.addf %59, %64 : vector<256x128xf32>
    %c2_71 = arith.constant 2 : index
    %c2_72 = arith.constant 2 : index
    %c0_73 = arith.constant 0 : index
    %66 = vector.load %arg7[%c2_71, %c2_72, %c0_73] : memref<18x18x8xf32, #tpu.memory_space<vmem>>, vector<16x16x8xf32>
    %67 = vector.shape_cast %66 : vector<16x16x8xf32> to vector<256x8xf32>
    %c8 = arith.constant 8 : index
    %c0_74 = arith.constant 0 : index
    %c0_75 = arith.constant 0 : index
    %68 = vector.load %arg3[%c8, %c0_74, %c0_75] : memref<9x8x128xf32, #tpu.memory_space<vmem>>, vector<1x8x128xf32>
    %69 = vector.shape_cast %68 : vector<1x8x128xf32> to vector<8x128xf32>
    %cst_76 = arith.constant dense<0.000000e+00> : vector<256x128xf32>
    %70 = tpu.matmul %67, %69, %cst_76 {dimension_numbers = #tpu.dot_dimension_numbers<[1], [0], [0], [1], [0, 0, 1, 1], [], []>} : vector<256x8xf32>, vector<8x128xf32>, vector<256x128xf32> -> vector<256x128xf32>
    %71 = arith.addf %65, %70 : vector<256x128xf32>
    %72 = vector.extract_strided_slice %9 {offsets = [0, 128], sizes = [256, 8], strides = [1, 1]} : vector<256x256xf32> to vector<256x8xf32>
    %c0_77 = arith.constant 0 : index
    %c0_78 = arith.constant 0 : index
    %73 = vector.load %arg4[%c0_77, %c0_78] : memref<8x128xf32, #tpu.memory_space<vmem>>, vector<8x128xf32>
    %cst_79 = arith.constant dense<0.000000e+00> : vector<256x128xf32>
    %74 = tpu.matmul %72, %73, %cst_79 {dimension_numbers = #tpu.dot_dimension_numbers<[1], [0], [0], [1], [0, 0, 1, 1], [], []>} : vector<256x8xf32>, vector<8x128xf32>, vector<256x128xf32> -> vector<256x128xf32>
    %c0_80 = arith.constant 0 : index
    %c0_81 = arith.constant 0 : index
    %c0_82 = arith.constant 0 : index
    %75 = vector.load %arg5[%c0_80, %c0_81, %c0_82] : memref<1x256x256xf32, #tpu.memory_space<vmem>>, vector<1x256x128xf32>
    %76 = vector.shape_cast %75 : vector<1x256x128xf32> to vector<256x128xf32>
    %77 = vector.shape_cast %71 : vector<256x128xf32> to vector<1x256x128xf32>
    tpu.vector_store %arg5[%c0_80, %c0_81, %c0_82], %77 {strides = array<i32>} : memref<1x256x256xf32, #tpu.memory_space<vmem>>, vector<1x256x128xf32>,
    %c0_83 = arith.constant 0 : index
    %c0_84 = arith.constant 0 : index
    %c128 = arith.constant 128 : index
    %78 = vector.load %arg5[%c0_83, %c0_84, %c128] : memref<1x256x256xf32, #tpu.memory_space<vmem>>, vector<1x256x128xf32>
    %79 = vector.shape_cast %78 : vector<1x256x128xf32> to vector<256x128xf32>
    %80 = vector.shape_cast %74 : vector<256x128xf32> to vector<1x256x128xf32>
    tpu.vector_store %arg5[%c0_83, %c0_84, %c128], %80 {strides = array<i32>} : memref<1x256x256xf32, #tpu.memory_space<vmem>>, vector<1x256x128xf32>,
    %cst_85 = arith.constant dense<0.000000e+00> : vector<128xf32>
    %81 = vector.multi_reduction <add>, %71, %cst_85 [0] : vector<256x128xf32> to vector<128xf32>
    %82 = vector.shape_cast %81 : vector<128xf32> to vector<1x128xf32>
    %83 = arith.mulf %71, %71 : vector<256x128xf32>
    %cst_86 = arith.constant dense<0.000000e+00> : vector<128xf32>
    %84 = vector.multi_reduction <add>, %83, %cst_86 [0] : vector<256x128xf32> to vector<128xf32>
    %85 = vector.shape_cast %84 : vector<128xf32> to vector<1x128xf32>
    %86 = tpu.concatenate %82, %85 in 0 : vector<1x128xf32>, vector<1x128xf32> -> vector<2x128xf32>
    %cst_87 = arith.constant dense<0.000000e+00> : vector<128xf32>
    %87 = vector.multi_reduction <add>, %74, %cst_87 [0] : vector<256x128xf32> to vector<128xf32>
    %88 = vector.shape_cast %87 : vector<128xf32> to vector<1x128xf32>
    %89 = arith.mulf %74, %74 : vector<256x128xf32>
    %cst_88 = arith.constant dense<0.000000e+00> : vector<128xf32>
    %90 = vector.multi_reduction <add>, %89, %cst_88 [0] : vector<256x128xf32> to vector<128xf32>
    %91 = vector.shape_cast %90 : vector<128xf32> to vector<1x128xf32>
    %92 = tpu.concatenate %88, %91 in 0 : vector<1x128xf32>, vector<1x128xf32> -> vector<2x128xf32>
    %93 = tpu.concatenate %86, %92 in 1 : vector<2x128xf32>, vector<2x128xf32> -> vector<2x256xf32>
    %c0_89 = arith.constant 0 : index
    %c0_90 = arith.constant 0 : index
    %c0_91 = arith.constant 0 : index
    %94 = vector.load %arg6[%c0_89, %c0_90, %c0_91] : memref<1x2x256xf32, #tpu.memory_space<vmem>>, vector<1x2x256xf32>
    %95 = vector.shape_cast %94 : vector<1x2x256xf32> to vector<2x256xf32>
    %96 = vector.shape_cast %93 : vector<2x256xf32> to vector<1x2x256xf32>
    tpu.vector_store %arg6[%c0_89, %c0_90, %c0_91], %96 {strides = array<i32>} : memref<1x2x256xf32, #tpu.memory_space<vmem>>, vector<1x2x256xf32>,
    return
  }
  func.func @transform_0(%arg0: i32) -> (i32, i32, i32) {
    %c0_i32 = arith.constant 0 : i32
    %c0_i32_0 = arith.constant 0 : i32
    %c0_i32_1 = arith.constant 0 : i32
    return %arg0, %c0_i32, %c0_i32_0 : i32, i32, i32
  }
  func.func @transform_1(%arg0: i32) -> (i32, i32) {
    %c0_i32 = arith.constant 0 : i32
    %c0_i32_0 = arith.constant 0 : i32
    %c0_i32_1 = arith.constant 0 : i32
    return %c0_i32, %c0_i32_0 : i32, i32
  }
  func.func @transform_2(%arg0: i32) -> (i32, i32, i32) {
    %c0_i32 = arith.constant 0 : i32
    %c0_i32_0 = arith.constant 0 : i32
    %c0_i32_1 = arith.constant 0 : i32
    %c0_i32_2 = arith.constant 0 : i32
    return %c0_i32, %c0_i32_0, %c0_i32_1 : i32, i32, i32
  }
  func.func @transform_3(%arg0: i32) -> (i32, i32) {
    %c0_i32 = arith.constant 0 : i32
    %c0_i32_0 = arith.constant 0 : i32
    %c0_i32_1 = arith.constant 0 : i32
    return %c0_i32, %c0_i32_0 : i32, i32
  }
  func.func @transform_4(%arg0: i32) -> (i32, i32, i32) {
    %c0_i32 = arith.constant 0 : i32
    %c0_i32_0 = arith.constant 0 : i32
    %c0_i32_1 = arith.constant 0 : i32
    return %arg0, %c0_i32, %c0_i32_0 : i32, i32, i32
  }
  func.func @transform_5(%arg0: i32) -> (i32, i32, i32) {
    %c0_i32 = arith.constant 0 : i32
    %c0_i32_0 = arith.constant 0 : i32
    %c0_i32_1 = arith.constant 0 : i32
    return %arg0, %c0_i32, %c0_i32_0 : i32, i32, i32
  }
}

module attributes {stable_mosaic.version = 11 : i64} {
  func.func @_final_pool_kernel(%arg0: i32, %arg1: i32, %arg2: memref<1x8x8x512xf32, #tpu.memory_space<vmem>>, %arg3: memref<2x512xf32, #tpu.memory_space<vmem>>, %arg4: memref<1x4x8x128xf32, #tpu.memory_space<vmem>>) attributes {dimension_semantics = [#tpu.dimension_semantics<parallel>, #tpu.dimension_semantics<parallel>], iteration_bounds = array<i64: 2, 2>, scalar_prefetch = 0 : i64, scratch_operands = 0 : i64, tpu.core_type = #tpu.core_type<tc>, window_params = [{transform_indices = @transform_0, window_bounds = array<i64: 1, 8, 8, 512>}, {pipeline_mode = #tpu.pipeline_mode<synchronous>, transform_indices = @transform_1, window_bounds = array<i64: 2, 512>}, {transform_indices = @transform_2, window_bounds = array<i64: 1, 4, 8, 128>}]} {
    %c0 = arith.constant 0 : index
    %c0_0 = arith.constant 0 : index
    %c0_1 = arith.constant 0 : index
    %c0_2 = arith.constant 0 : index
    %0 = vector.load %arg2[%c0, %c0_0, %c0_1, %c0_2] : memref<1x8x8x512xf32, #tpu.memory_space<vmem>>, vector<1x8x8x512xf32>
    %1 = vector.shape_cast %0 : vector<1x8x8x512xf32> to vector<8x8x512xf32>
    %c0_3 = arith.constant 0 : index
    %c0_4 = arith.constant 0 : index
    %2 = vector.load %arg3[%c0_3, %c0_4] : memref<2x512xf32, #tpu.memory_space<vmem>>, vector<1x512xf32>
    %3 = vector.shape_cast %2 : vector<1x512xf32> to vector<1x1x512xf32>
    %c1 = arith.constant 1 : index
    %c0_5 = arith.constant 0 : index
    %4 = vector.load %arg3[%c1, %c0_5] : memref<2x512xf32, #tpu.memory_space<vmem>>, vector<1x512xf32>
    %5 = vector.shape_cast %4 : vector<1x512xf32> to vector<1x1x512xf32>
    %6 = vector.broadcast %3 : vector<1x1x512xf32> to vector<8x8x512xf32>
    %7 = arith.mulf %1, %6 : vector<8x8x512xf32>
    %8 = vector.broadcast %5 : vector<1x1x512xf32> to vector<8x8x512xf32>
    %9 = arith.addf %7, %8 : vector<8x8x512xf32>
    %cst = arith.constant 0.000000e+00 : f32
    %10 = vector.broadcast %cst : f32 to vector<8x8x512xf32>
    %11 = arith.maximumf %9, %10 : vector<8x8x512xf32>
    %12 = vector.extract_strided_slice %11 {offsets = [0, 0, 0], sizes = [8, 8, 128], strides = [1, 1, 1]} : vector<8x8x512xf32> to vector<8x8x128xf32>
    %13 = vector.extract_strided_slice %11 {offsets = [0, 0, 128], sizes = [8, 8, 128], strides = [1, 1, 1]} : vector<8x8x512xf32> to vector<8x8x128xf32>
    %14 = arith.addf %12, %13 : vector<8x8x128xf32>
    %15 = vector.extract_strided_slice %11 {offsets = [0, 0, 256], sizes = [8, 8, 128], strides = [1, 1, 1]} : vector<8x8x512xf32> to vector<8x8x128xf32>
    %16 = vector.extract_strided_slice %11 {offsets = [0, 0, 384], sizes = [8, 8, 128], strides = [1, 1, 1]} : vector<8x8x512xf32> to vector<8x8x128xf32>
    %17 = arith.addf %15, %16 : vector<8x8x128xf32>
    %18 = arith.maximumf %14, %17 : vector<8x8x128xf32>
    %19 = vector.shape_cast %18 : vector<8x8x128xf32> to vector<4x2x8x128xf32>
    %20 = vector.extract_strided_slice %19 {offsets = [0, 0, 0, 0], sizes = [4, 1, 8, 128], strides = [1, 1, 1, 1]} : vector<4x2x8x128xf32> to vector<4x1x8x128xf32>
    %21 = vector.shape_cast %20 : vector<4x1x8x128xf32> to vector<4x8x128xf32>
    %22 = vector.extract_strided_slice %19 {offsets = [0, 1, 0, 0], sizes = [4, 1, 8, 128], strides = [1, 1, 1, 1]} : vector<4x2x8x128xf32> to vector<4x1x8x128xf32>
    %23 = vector.shape_cast %22 : vector<4x1x8x128xf32> to vector<4x8x128xf32>
    %24 = arith.maximumf %21, %23 : vector<4x8x128xf32>
    %c0_6 = arith.constant 0 : index
    %c0_7 = arith.constant 0 : index
    %c0_8 = arith.constant 0 : index
    %c0_9 = arith.constant 0 : index
    %25 = vector.load %arg4[%c0_6, %c0_7, %c0_8, %c0_9] : memref<1x4x8x128xf32, #tpu.memory_space<vmem>>, vector<1x4x8x128xf32>
    %26 = vector.shape_cast %25 : vector<1x4x8x128xf32> to vector<4x8x128xf32>
    %27 = vector.shape_cast %24 : vector<4x8x128xf32> to vector<1x4x8x128xf32>
    tpu.vector_store %arg4[%c0_6, %c0_7, %c0_8, %c0_9], %27 {strides = array<i32>} : memref<1x4x8x128xf32, #tpu.memory_space<vmem>>, vector<1x4x8x128xf32>,
    return
  }
  func.func @transform_0(%arg0: i32, %arg1: i32) -> (i32, i32, i32, i32) {
    %c0_i32 = arith.constant 0 : i32
    %c0_i32_0 = arith.constant 0 : i32
    %c0_i32_1 = arith.constant 0 : i32
    return %arg0, %arg1, %c0_i32, %c0_i32_0 : i32, i32, i32, i32
  }
  func.func @transform_1(%arg0: i32, %arg1: i32) -> (i32, i32) {
    %c0_i32 = arith.constant 0 : i32
    %c0_i32_0 = arith.constant 0 : i32
    %c0_i32_1 = arith.constant 0 : i32
    return %c0_i32, %c0_i32_0 : i32, i32
  }
  func.func @transform_2(%arg0: i32, %arg1: i32) -> (i32, i32, i32, i32) {
    %c0_i32 = arith.constant 0 : i32
    %c0_i32_0 = arith.constant 0 : i32
    %c0_i32_1 = arith.constant 0 : i32
    return %arg0, %arg1, %c0_i32, %c0_i32_0 : i32, i32, i32, i32
  }
}

</mosaic_0001>

<bundles_post_ra>
// kernel: down_block_forward.3
= control target key start
LH: loop header
LB: loop body
LE: loop exit
PB: predicated region body
PF: predicated region fallthrough
CT: control target
= control target key end

     0   :  { %s938_s12 = smov 0   ;;  %s940_s13 = smov 0   ;;  %s1206_s0 = inlined_call_operand.vmem [shape: f32[2,256,36], index: 0, kind: input, shape index: {}]   ;;  %s1207_s1 = inlined_call_operand.vmem [shape: f32[36,256], index: 1, kind: input, shape index: {}]   ;;  %s1208_s2 = inlined_call_operand.vmem [shape: f32[2,256,256], index: 2, kind: output, shape index: {0}]   ;;  %s1209_s3 = inlined_call_operand.vmem [shape: f32[2,2,2,256], index: 3, kind: output, shape index: {1}]  }
   0x1   :  { %s942_s14 = smov 0   ;;  %s944_s15 = smov 0  }
   0x2   :  { %s946_s16 = smov 0  }
   0x3 LB: > { %s23_s17 = sadd.s32 1, %s907_s14  ;;  %s26_s18 = sadd.s32 1, %s911_s15  ;;  %s915_s16 = sphi %s946_s16, %s14_s16   ;;  %s911_s15 = sphi %s944_s15, %s1213_s15   ;;  %s907_s14 = sphi %s942_s14, %s1212_s14   ;;  %s903_s13 = sphi %s940_s13, %s1211_s13   ;;  %s899_s12 = sphi %s938_s12, %s1210_s12  }
   0x4   : > { %p24_p0 = scmp.ge.s32.totalorder %s23_s17, 2  ;;  %p794_p1 = scmp.ge.s32.totalorder %s915_s16, 1 }
   0x5   : > { %p163_p2 = scmp.lt.s32.totalorder %s915_s16, 5 }
   0x6   : > { %s1215_s17 = smov (%p24_p0, %s23_s17), 0  ;;  %s1217_s18 = smov (!%p24_p0, %s26_s18), %s911_s15 }
   0x7   : > { %p164_p3 = pnand %p794_p1, %p163_p2  ;;  %p28_p4 = scmp.ge.s32.totalorder %s1217_s18, 2 }
   0x8   : > { %s795_s27 = sshll.u32 (!%p164_p3), %s899_s12, 4  ;;  %p206_p5 = scmp.lt.s32.totalorder (!%p164_p3), %s903_s13, 1 }
   0x9   : > { %s1219_s18 = smov (%p28_p4, %s1217_s18), 0  ;;  %167 = sbr.rel (%p164_p3) target bundleno = 284 (0x11c), region = 28 }
   0xa   : > { %p208_p6 = scmp.lt.s32.totalorder (!%p164_p3), %s795_s27, 31  ;;  %p228_p7 = scmp.lt.s32.totalorder (!%p164_p3), %s899_s12, 1 }
   0xe   : > { %v260_v0 = vld [vmem:[%s1207_s1 + $0x48] sm:$0xf]  ;;  %vm310_vm0 = vcmask 1043456   ;;  %v259_v1 = vld [vmem:[%s1207_s1 + $0x40] sm:$0xf]  ;;  %v258_v2 = vld [vmem:[%s1207_s1 + $0x38] sm:$0xff] }
   0xf   : > { %805 = vmatprep.subr.msk.mxu0 %vm310_vm0, %v260_v0  ;;  %v257_v3 = vld [vmem:[%s1207_s1 + $0x30] sm:$0xff]  ;;  %826 = vmatprep.subr.msk.mxu1 %vm310_vm0, %v260_v0  ;;  %v256_v4 = vld [vmem:[%s1207_s1 + $0x28] sm:$0xff]  ;;  %v917_v5 = vmov 0.0   ;;  %v255_v6 = vld [vmem:[%s1207_s1 + $0x20] sm:$0xff]  ;;  %s1221_s13 = smov (!%p206_p5, %s903_s13), 1  ;;  %s1223_s27 = smov (!%p208_p6, %s795_s27), 31 }
  0x10   : > { %806 = vmatpush1.msk.msra.mxu0 %vm310_vm0, %v259_v1  ;;  %381 = vmatprep.mubr.f32.mxu0 %v917_v5  ;;  %v254_v7 = vld [vmem:[%s1207_s1 + $0x18] sm:$0xff]  ;;  %v253_v8 = vld [vmem:[%s1207_s1 + $0x10] sm:$0xff]  ;;  %s796_s9 = sshll.u32 %s1221_s13, 5  ;;  %v252_v9 = vld [vmem:[%s1207_s1 + $0x8] sm:$0xff]  ;;  %vm261_vm1 = vcmask 293888   ;;  %s799_s26 = sshll.u32 %s1223_s27, 1 }
  0x11   : > { %341 = vmatprep.subr.mxu0 %v258_v2  ;;  %831 = vmatpush1.msk.msra.mxu1 %vm310_vm0, %v259_v1  ;;  %s211_s19 = sadd.s32 %s796_s9, %s1223_s27  ;;  %v251_v10 = vld [vmem:[%s1207_s1] sm:$0xff]  ;;  %s800_s28 = sshll.u32 %s1221_s13, 6  ;;  %vm626_vm2 = vcmask 1040384  }
  0x12   : > { %342 = vmatpush1.msra.mxu0 %v257_v3  ;;  %827 = vmatprep.subr.mxu1 %v258_v2  ;;  %s797_s22 = sshll.u32 %s211_s19, 3  ;;  %s222_s29 = sadd.s32 %s800_s28, %s799_s26 }
  0x13   : > { %343 = vmatprep.subr.mxu0 %v256_v4  ;;  %832 = vmatpush1.msra.mxu1 %v257_v3  ;;  %s1019_s25 = scalar_lea.vmem %s1206_s0, %s797_s22  ;;  %s801_s30 = sshll.u32 %s222_s29, 3 }
  0x14   : > { %344 = vmatpush1.msra.mxu0 %v255_v6  ;;  %828 = vmatprep.subr.mxu1 %v256_v4  ;;  %v235_v11 = vld [vmem:[%s1019_s25] sm:$0xff]  ;;  %v236_v13 = vld [vmem:[%s1019_s25 + $0x8] sm:$0xff]  ;;  %v237_v15 = vld [vmem:[%s1019_s25 + $0x10] sm:$0xff]  ;;  %s1073_s6 = scalar_lea.vmem %s1208_s2, %s801_s30  ;;  %s1225_s12 = smov (!%p228_p7, %s899_s12), 1 }
  0x15   : > { %345 = vmatprep.subr.mxu0 %v254_v7  ;;  %833 = vmatpush1.msra.mxu1 %v255_v6  ;;  %v243_v12 = vld [vmem:[%s1019_s25 + $0x40] sm:$0xff]  ;;  %v244_v14 = vld [vmem:[%s1019_s25 + $0x48] sm:$0xff]  ;;  %v245_v16 = vld [vmem:[%s1019_s25 + $0x50] sm:$0xff]  ;;  %s802_s27 = sshll.u32 %s1225_s12, 1  ;;  %s803_s7 = sshll.u32 %s1221_s13, 2 }
  0x16   : > { %346 = vmatpush1.msra.mxu0 %v253_v8  ;;  %829 = vmatprep.subr.mxu1 %v254_v7  ;;  %v238_v17 = vld [vmem:[%s1019_s25 + $0x18] sm:$0xff]  ;;  %v239_v19 = vld [vmem:[%s1019_s25 + $0x20] sm:$0xff]  ;;  %v240_v21 = vld [vmem:[%s1019_s25 + $0x28] sm:$0xff]  ;;  %s232_s8 = sadd.s32 %s803_s7, %s802_s27 }
  0x17   : > { %347 = vmatprep.subr.mxu0 %v252_v9  ;;  %834 = vmatpush1.msra.mxu1 %v253_v8  ;;  %v246_v18 = vld [vmem:[%s1019_s25 + $0x58] sm:$0xff]  ;;  %v247_v20 = vld [vmem:[%s1019_s25 + $0x60] sm:$0xff]  ;;  %v248_v22 = vld [vmem:[%s1019_s25 + $0x68] sm:$0xff]  ;;  %s804_s9 = sshll.u32 %s232_s8, 1 }
  0x18   : > { %348 = vmatpush1.msra.mxu0 %v251_v10  ;;  %830 = vmatprep.subr.mxu1 %v252_v9  ;;  %v241_v23 = vld [vmem:[%s1019_s25 + $0x30] sm:$0xff]  ;;  %v242_v25 = vld [vmem:[%s1019_s25 + $0x38] sm:$0xff]  ;;  %s234_s12 = scalar_lea.vmem %s1209_s3, %s804_s9 }
  0x19   : > { %807 = vmatmul.mubr.msk.f32.vlgmr.msra.gmra.mxu0 %vm261_vm1, %v235_v11  ;;  %835 = vmatpush1.msra.mxu1 %v251_v10  ;;  %v249_v24 = vld [vmem:[%s1019_s25 + $0x70] sm:$0xff]  ;;  %v250_v26 = vld [vmem:[%s1019_s25 + $0x78] sm:$0xff] }
  0x1a   : > { %387 = vmatprep.mubr.f32.mxu0 %v917_v5  ;;  %429 = vmatprep.mubr.f32.mxu1 %v917_v5 }
  0x1b   : > { %815 = vmatmul.mubr.msk.f32.vlgmr.msra.gmra.mxu1 %vm261_vm1, %v243_v12 }
  0x1c   : > { %435 = vmatprep.mubr.f32.mxu1 %v917_v5 }
  0x1d   : > { %808 = vmatmul.mubr.msk.f32.gmra.mxu0 %vm261_vm1, %v236_v13 }
  0x1e   : > { %393 = vmatprep.mubr.f32.mxu0 %v917_v5 }
  0x1f   : > { %816 = vmatmul.mubr.msk.f32.gmra.mxu1 %vm261_vm1, %v244_v14 }
  0x20   : > { %441 = vmatprep.mubr.f32.mxu1 %v917_v5 }
  0x21   : > { %809 = vmatmul.mubr.msk.f32.gmra.mxu0 %vm261_vm1, %v237_v15 }
  0x22   : > { %399 = vmatprep.mubr.f32.mxu0 %v917_v5 }
  0x23   : > { %817 = vmatmul.mubr.msk.f32.gmra.mxu1 %vm261_vm1, %v245_v16 }
  0x24   : > { %447 = vmatprep.mubr.f32.mxu1 %v917_v5 }
  0x25   : > { %810 = vmatmul.mubr.msk.f32.gmra.mxu0 %vm261_vm1, %v238_v17 }
  0x26   : > { %405 = vmatprep.mubr.f32.mxu0 %v917_v5 }
  0x27   : > { %818 = vmatmul.mubr.msk.f32.gmra.mxu1 %vm261_vm1, %v246_v18 }
  0x28   : > { %453 = vmatprep.mubr.f32.mxu1 %v917_v5 }
  0x29   : > { %811 = vmatmul.mubr.msk.f32.gmra.mxu0 %vm261_vm1, %v239_v19 }
  0x2a   : > { %411 = vmatprep.mubr.f32.mxu0 %v917_v5 }
  0x2b   : > { %819 = vmatmul.mubr.msk.f32.gmra.mxu1 %vm261_vm1, %v247_v20 }
  0x2c   : > { %459 = vmatprep.mubr.f32.mxu1 %v917_v5 }
  0x2d   : > { %812 = vmatmul.mubr.msk.f32.gmra.mxu0 %vm261_vm1, %v240_v21 }
  0x2e   : > { %417 = vmatprep.mubr.f32.mxu0 %v917_v5 }
  0x2f   : > { %820 = vmatmul.mubr.msk.f32.gmra.mxu1 %vm261_vm1, %v248_v22 }
  0x30   : > { %465 = vmatprep.mubr.f32.mxu1 %v917_v5 }
  0x31   : > { %813 = vmatmul.mubr.msk.f32.gmra.mxu0 %vm261_vm1, %v241_v23 }
  0x32   : > { %423 = vmatprep.mubr.f32.mxu0 %v917_v5 }
  0x33   : > { %821 = vmatmul.mubr.msk.f32.gmra.mxu1 %vm261_vm1, %v249_v24 }
  0x34   : > { %471 = vmatprep.mubr.f32.mxu1 %v917_v5 }
  0x35   : > { %814 = vmatmul.mubr.msk.f32.gmra.mxu0 %vm261_vm1, %v242_v25 }
  0x37   : > { %822 = vmatmul.mubr.msk.f32.gmra.mxu1 %vm261_vm1, %v250_v26 }
  0xd9   : > { %v383_v27 = vpop.f32.mrf.mxu0 }
  0xda   : > { %478 = vst [vmem:[%s1073_s6] sm:$0xff] %v383_v27  ;;  %v552_v46 = vmul.f32 %v383_v27, %v383_v27 }
  0xdb   : > { %v385_v28 = vpop.f32.mrf.mxu0  ;;  %v1076_v29 = vpop.f32.mrf.mxu1 }
  0xdc   : > { %479 = vst [vmem:[%s1073_s6 + $0x8] sm:$0xff] %v385_v28  ;;  %494 = vst [vmem:[%s1073_s6 + $0x80] sm:$0xff] %v1076_v29  ;;  %v553_v49 = vmul.f32 %v385_v28, %v385_v28 }
  0xdd   : > { %v389_v30 = vpop.f32.mrf.mxu0  ;;  %v1081_v31 = vpop.f32.mrf.mxu1 }
  0xde   : > { %480 = vst [vmem:[%s1073_s6 + $0x10] sm:$0xff] %v389_v30  ;;  %495 = vst [vmem:[%s1073_s6 + $0x88] sm:$0xff] %v1081_v31  ;;  %v554_v42 = vmul.f32 %v389_v30, %v389_v30  ;;  %v510_v47 = vadd.f32 %v389_v30, %v383_v27 }
  0xdf   : > { %v391_v32 = vpop.f32.mrf.mxu0  ;;  %v1086_v33 = vpop.f32.mrf.mxu1 }
  0xe0   : > { %481 = vst [vmem:[%s1073_s6 + $0x18] sm:$0xff] %v391_v32  ;;  %496 = vst [vmem:[%s1073_s6 + $0x90] sm:$0xff] %v1086_v33  ;;  %v555_v43 = vmul.f32 %v391_v32, %v391_v32  ;;  %v584_v53 = vadd.f32 %v554_v42, %v552_v46  ;;  %v531_v54 = vadd.f32 %v391_v32, %v385_v28 }
  0xe1   : > { %v395_v34 = vpop.f32.mrf.mxu0  ;;  %v1091_v35 = vpop.f32.mrf.mxu1 }
  0xe2   : > { %482 = vst [vmem:[%s1073_s6 + $0x20] sm:$0xff] %v395_v34  ;;  %497 = vst [vmem:[%s1073_s6 + $0x98] sm:$0xff] %v1091_v35  ;;  %v556_v48 = vmul.f32 %v395_v34, %v395_v34  ;;  %v511_v55 = vadd.f32 %v510_v47, %v395_v34  ;;  %v605_v57 = vadd.f32 %v555_v43, %v553_v49 }
  0xe3   : > { %v397_v36 = vpop.f32.mrf.mxu0  ;;  %v1096_v37 = vpop.f32.mrf.mxu1  ;;  %v568_v34 = vmul.f32 %v1076_v29, %v1076_v29  ;;  %v569_v47 = vmul.f32 %v1081_v31, %v1081_v31 }
  0xe4   : > { %483 = vst [vmem:[%s1073_s6 + $0x28] sm:$0xff] %v397_v36  ;;  %498 = vst [vmem:[%s1073_s6 + $0xa0] sm:$0xff] %v1096_v37  ;;  %v557_v50 = vmul.f32 %v397_v36, %v397_v36  ;;  %v585_v61 = vadd.f32 %v584_v53, %v556_v48  ;;  %v532_v62 = vadd.f32 %v531_v54, %v397_v36 }
  0xe5   : > { %v401_v38 = vpop.f32.mrf.mxu0  ;;  %v1101_v39 = vpop.f32.mrf.mxu1  ;;  %v570_v48 = vmul.f32 %v1086_v33, %v1086_v33 }
  0xe6   : > { %484 = vst [vmem:[%s1073_s6 + $0x30] sm:$0xff] %v401_v38  ;;  %499 = vst [vmem:[%s1073_s6 + $0xa8] sm:$0xff] %v1101_v39  ;;  %v558_v56 = vmul.f32 %v401_v38, %v401_v38  ;;  %v512_v63 = vadd.f32 %v511_v55, %v401_v38  ;;  %v606_v1 = vadd.f32 %v605_v57, %v557_v50 }
  0xe7   : > { %v403_v40 = vpop.f32.mrf.mxu0  ;;  %v1106_v41 = vpop.f32.mrf.mxu1  ;;  %v572_v55 = vmul.f32 %v1096_v37, %v1096_v37 }
  0xe8   : > { %485 = vst [vmem:[%s1073_s6 + $0x38] sm:$0xff] %v403_v40  ;;  %500 = vst [vmem:[%s1073_s6 + $0xb0] sm:$0xff] %v1106_v41  ;;  %v559_v58 = vmul.f32 %v403_v40, %v403_v40  ;;  %v586_v5 = vadd.f32 %v585_v61, %v558_v56  ;;  %v533_v6 = vadd.f32 %v532_v62, %v403_v40 }
  0xe9   : > { %v407_v44 = vpop.f32.mrf.mxu0  ;;  %v1111_v45 = vpop.f32.mrf.mxu1 }
  0xea   : > { %486 = vst [vmem:[%s1073_s6 + $0x40] sm:$0xff] %v407_v44  ;;  %501 = vst [vmem:[%s1073_s6 + $0xb8] sm:$0xff] %v1111_v45  ;;  %v560_v0 = vmul.f32 %v407_v44, %v407_v44  ;;  %v513_v7 = vadd.f32 %v512_v63, %v407_v44  ;;  %v607_v9 = vadd.f32 %v606_v1, %v559_v58 }
  0xeb   : > { %v409_v51 = vpop.f32.mrf.mxu0  ;;  %v1116_v52 = vpop.f32.mrf.mxu1  ;;  %v575_v1 = vmul.f32 %v1111_v45, %v1111_v45 }
  0xec   : > { %487 = vst [vmem:[%s1073_s6 + $0x48] sm:$0xff] %v409_v51  ;;  %502 = vst [vmem:[%s1073_s6 + $0xc0] sm:$0xff] %v1116_v52  ;;  %v561_v2 = vmul.f32 %v409_v51, %v409_v51  ;;  %v587_v13 = vadd.f32 %v586_v5, %v560_v0  ;;  %v534_v14 = vadd.f32 %v533_v6, %v409_v51 }
  0xed   : > { %v413_v59 = vpop.f32.mrf.mxu0  ;;  %v1121_v60 = vpop.f32.mrf.mxu1 }
  0xee   : > { %488 = vst [vmem:[%s1073_s6 + $0x50] sm:$0xff] %v413_v59  ;;  %503 = vst [vmem:[%s1073_s6 + $0xc8] sm:$0xff] %v1121_v60  ;;  %v562_v8 = vmul.f32 %v413_v59, %v413_v59  ;;  %v514_v15 = vadd.f32 %v513_v7, %v413_v59  ;;  %v608_v17 = vadd.f32 %v607_v9, %v561_v2 }
  0xef   : > { %v415_v3 = vpop.f32.mrf.mxu0  ;;  %v1126_v4 = vpop.f32.mrf.mxu1  ;;  %v577_v6 = vmul.f32 %v1121_v60, %v1121_v60 }
  0xf0   : > { %489 = vst [vmem:[%s1073_s6 + $0x58] sm:$0xff] %v415_v3  ;;  %504 = vst [vmem:[%s1073_s6 + $0xd0] sm:$0xff] %v1126_v4  ;;  %v563_v10 = vmul.f32 %v415_v3, %v415_v3  ;;  %v588_v20 = vadd.f32 %v587_v13, %v562_v8  ;;  %v535_v21 = vadd.f32 %v534_v14, %v415_v3 }
  0xf1   : > { %v419_v11 = vpop.f32.mrf.mxu0  ;;  %v1131_v12 = vpop.f32.mrf.mxu1 }
  0xf2   : > { %490 = vst [vmem:[%s1073_s6 + $0x60] sm:$0xff] %v419_v11  ;;  %v564_v16 = vmul.f32 %v419_v11, %v419_v11  ;;  %505 = vst [vmem:[%s1073_s6 + $0xd8] sm:$0xff] %v1131_v12  ;;  %v515_v22 = vadd.f32 %v514_v15, %v419_v11  ;;  %v609_v24 = vadd.f32 %v608_v17, %v563_v10 }
  0xf3   : > { %v421_v18 = vpop.f32.mrf.mxu0  ;;  %v1136_v19 = vpop.f32.mrf.mxu1 }
  0xf4   : > { %491 = vst [vmem:[%s1073_s6 + $0x68] sm:$0xff] %v421_v18  ;;  %v565_v23 = vmul.f32 %v421_v18, %v421_v18  ;;  %506 = vst [vmem:[%s1073_s6 + $0xe0] sm:$0xff] %v1136_v19  ;;  %v589_v27 = vadd.f32 %v588_v20, %v564_v16  ;;  %v536_v28 = vadd.f32 %v535_v21, %v421_v18 }
  0xf5   : > { %v425_v25 = vpop.f32.mrf.mxu0  ;;  %v469_v26 = vpop.f32.mrf.mxu1 }
  0xf6   : > { %492 = vst [vmem:[%s1073_s6 + $0x70] sm:$0xff] %v425_v25  ;;  %v516_v30 = vadd.f32 %v515_v22, %v425_v25  ;;  %v566_v32 = vmul.f32 %v425_v25, %v425_v25  ;;  %507 = vst [vmem:[%s1073_s6 + $0xe8] sm:$0xff] %v469_v26  ;;  %v610_v36 = vadd.f32 %v609_v24, %v565_v23 }
  0xf7   : > { %v427_v38 = vpop.f32.mrf.mxu0  ;;  %v473_v40 = vpop.f32.mrf.mxu1  ;;  %v581_v16 = vmul.f32 %v469_v26, %v469_v26 }
  0xf8   : > { %v517_v42 = vadd.f32 %v516_v30, %v1076_v29  ;;  %v590_v43 = vadd.f32 %v589_v27, %v566_v32  ;;  %493 = vst [vmem:[%s1073_s6 + $0x78] sm:$0xff] %v427_v38  ;;  %v537_v44 = vadd.f32 %v536_v28, %v427_v38  ;;  %v567_v46 = vmul.f32 %v427_v38, %v427_v38 }
  0xf9   : > { %508 = vst [vmem:[%s1073_s6 + $0xf0] sm:$0xff] %v473_v40  ;;  %v475_v49 = vpop.f32.mrf.mxu1  ;;  %v571_v29 = vmul.f32 %v1091_v35, %v1091_v35  ;;  %v582_v10 = vmul.f32 %v473_v40, %v473_v40 }
  0xfa   : > { %v518_v50 = vadd.f32 %v517_v42, %v1086_v33  ;;  %v591_v51 = vadd.f32 %v590_v43, %v568_v34  ;;  %v538_v53 = vadd.f32 %v537_v44, %v1081_v31  ;;  %v611_v54 = vadd.f32 %v610_v36, %v567_v46  ;;  %509 = vst [vmem:[%s1073_s6 + $0xf8] sm:$0xff] %v475_v49 }
  0xfb   : > { %v573_v33 = vmul.f32 %v1101_v39, %v1101_v39  ;;  %v574_v31 = vmul.f32 %v1106_v41, %v1106_v41 }
  0xfc   : > { %v592_v56 = vadd.f32 %v591_v51, %v570_v48  ;;  %v539_v57 = vadd.f32 %v538_v53, %v1091_v35  ;;  %v612_v58 = vadd.f32 %v611_v54, %v569_v47  ;;  %v519_v59 = vadd.f32 %v518_v50, %v1096_v37 }
  0xfd   : > { %v576_v35 = vmul.f32 %v1116_v52, %v1116_v52 }
  0xfe   : > { %v613_v61 = vadd.f32 %v612_v58, %v571_v29  ;;  %v520_v62 = vadd.f32 %v519_v59, %v1106_v41  ;;  %v593_v63 = vadd.f32 %v592_v56, %v572_v55  ;;  %v540_v0 = vadd.f32 %v539_v57, %v1101_v39 }
  0xff   : > { %v578_v41 = vmul.f32 %v1126_v4, %v1126_v4 }
 0x100   : > { %v521_v37 = vadd.f32 %v520_v62, %v1116_v52  ;;  %v594_v2 = vadd.f32 %v593_v63, %v574_v31  ;;  %v541_v3 = vadd.f32 %v540_v0, %v1111_v45  ;;  %v614_v5 = vadd.f32 %v613_v61, %v573_v33 }
 0x101   : > { %v579_v52 = vmul.f32 %v1131_v12, %v1131_v12  ;;  %v580_v45 = vmul.f32 %v1136_v19, %v1136_v19 }
 0x102   : > { %v595_v7 = vadd.f32 %v594_v2, %v576_v35  ;;  %v542_v39 = vadd.f32 %v541_v3, %v1121_v60  ;;  %v615_v8 = vadd.f32 %v614_v5, %v575_v1  ;;  %v522_v9 = vadd.f32 %v521_v37, %v1126_v4 }
 0x103   : > { %v583_v4 = vmul.f32 %v475_v49, %v475_v49 }
 0x104   : > { %v616_v11 = vadd.f32 %v615_v8, %v577_v6  ;;  %v596_v13 = vadd.f32 %v595_v7, %v578_v41  ;;  %v543_v14 = vadd.f32 %v542_v39, %v1131_v12  ;;  %v523_v15 = vadd.f32 %v522_v9, %v1136_v19 }
 0x106   : > { %v617_v17 = vadd.f32 %v616_v11, %v579_v52  ;;  %v597_v60 = vadd.f32 %v596_v13, %v580_v45  ;;  %v544_v18 = vadd.f32 %v543_v14, %v469_v26  ;;  %v524_v20 = vadd.f32 %v523_v15, %v473_v40 }
 0x108   : > { %v618_v21 = vadd.f32 %v617_v17, %v581_v16  ;;  %v525_v22 = vrot.slane %v524_v20, 4  ;;  %v598_v23 = vadd.f32 %v597_v60, %v582_v10  ;;  %v545_v24 = vadd.f32 %v544_v18, %v475_v49 }
 0x10a   : > { %v526_v25 = vadd.f32 %v525_v22, %v524_v20  ;;  %v599_v27 = vrot.slane %v598_v23, 4  ;;  %v546_v28 = vrot.slane %v545_v24, 4  ;;  %v619_v30 = vadd.f32 %v618_v21, %v583_v4 }
 0x10c   : > { %v527_v12 = vrot.slane %v526_v25, 2  ;;  %v600_v19 = vadd.f32 %v599_v27, %v598_v23  ;;  %v547_v32 = vadd.f32 %v546_v28, %v545_v24  ;;  %v620_v34 = vrot.slane %v619_v30, 4 }
 0x10e   : > { %v528_v36 = vadd.f32 %v527_v12, %v526_v25  ;;  %v601_v38 = vrot.slane %v600_v19, 2  ;;  %v548_v26 = vrot.slane %v547_v32, 2  ;;  %v621_v40 = vadd.f32 %v620_v34, %v619_v30 }
 0x110   : > { %v602_v42 = vadd.f32 %v601_v38, %v600_v19  ;;  %v549_v43 = vadd.f32 %v548_v26, %v547_v32  ;;  %v622_v44 = vrot.slane %v621_v40, 2  ;;  %v529_v46 = vrot.slane %v528_v36, 1 }
 0x112   : > { %v603_v47 = vrot.slane %v602_v42, 1  ;;  %v550_v48 = vrot.slane %v549_v43, 1  ;;  %v623_v49 = vadd.f32 %v622_v44, %v621_v40  ;;  %v530_v53 = vadd.f32 %v529_v46, %v528_v36 }
 0x114   : > { %v604_v50 = vadd.f32 %v603_v47, %v602_v42  ;;  %v624_v51 = vrot.slane %v623_v49, 1  ;;  %v551_v54 = vadd.f32 %v550_v48, %v549_v43 }
 0x116   : > { %v625_v29 = vadd.f32 %v624_v51, %v623_v49  ;;  %v627_v55 = vsel %vm626_vm2, %v530_v53, %v604_v50 }
 0x118   : > { %v628_v56 = vsel %vm626_vm2, %v551_v54, %v625_v29 }
 0x119   : > { %v631_v57 = vcombine.low %v627_v55, %v628_v56 }
 0x11b   : > { %823 = vst.sshfl [vmem:[%s234_s12] sm:$0x33 pattern:$0x76325410] %v631_v57 }
 0x11c PF: > { %s14_s16 = sadd.s32 1, %s915_s16   ;;  %s1210_s12 = smov %s907_s14 }
 0x11d   : > { %p11_p8 = scmp.ge.s32.totalorder %s14_s16, 6   ;;  %s1211_s13 = smov %s911_s15 }
 0x11e   : > { %s1212_s14 = smov %s1215_s17  ;;  %s1213_s15 = smov %s1219_s18 }
 0x11f   :  { %13 = sbr.rel (!%p11_p8) target bundleno = 3 (0x3), region = 70 }

// kernel: down_block_forward.5
= control target key start
LH: loop header
LB: loop body
LE: loop exit
PB: predicated region body
PF: predicated region fallthrough
CT: control target
= control target key end

     0   :  { %s594_s9 = smov 0   ;;  %s596_s10 = smov 0   ;;  %s788_s0 = inlined_call_operand.vmem [shape: f32[2,16,8,512], index: 0, kind: input, shape index: {}]   ;;  %s789_s1 = inlined_call_operand.vmem [shape: f32[2,512], index: 1, kind: input, shape index: {}]   ;;  %s790_s2 = inlined_call_operand.vmem [shape: f32[2,8,8,128], index: 2, kind: output, shape index: {}]  }
   0x1   :  { %s598_s11 = smov 0   ;;  %s600_s12 = smov 0  }
   0x2   :  { %s602_s13 = smov 0  }
   0x3 LB: > { %s21_s14 = sadd.s32 1, %s569_s11  ;;  %s24_s15 = sadd.s32 1, %s573_s12  ;;  %s577_s13 = sphi %s602_s13, %s12_s13   ;;  %s573_s12 = sphi %s600_s12, %s795_s12   ;;  %s569_s11 = sphi %s598_s11, %s794_s11   ;;  %s565_s10 = sphi %s596_s10, %s793_s10   ;;  %s561_s9 = sphi %s594_s9, %s792_s9  }
   0x4   : > { %p22_p0 = scmp.ge.s32.totalorder %s21_s14, 2  ;;  %p488_p1 = scmp.ge.s32.totalorder %s577_s13, 1 }
   0x5   : > { %p134_p2 = scmp.lt.s32.totalorder %s577_s13, 5 }
   0x6   : > { %s797_s14 = smov (%p22_p0, %s21_s14), 0  ;;  %s799_s15 = smov (!%p22_p0, %s24_s15), %s573_s12 }
   0x7   : > { %p135_p3 = pnand %p488_p1, %p134_p2  ;;  %p26_p4 = scmp.ge.s32.totalorder %s799_s15, 2 }
   0x8   : > { %s489_s16 = sshll.u32 (!%p135_p3), %s561_s9, 3  ;;  %p166_p5 = scmp.lt.s32.totalorder (!%p135_p3), %s565_s10, 1 }
   0x9   : > { %s801_s15 = smov (%p26_p4, %s799_s15), 0  ;;  %138 = sbr.rel (%p135_p3) target bundleno = 60 (0x3c), region = 28 }
   0xa   : > { %p168_p6 = scmp.lt.s32.totalorder (!%p135_p3), %s489_s16, 15  ;;  %s493_s20 = sshll.u32 (!%p135_p3), %s561_s9, 2 }
   0xb   : > { %p643_p7 = scmp.lt.s32.totalorder (!%p135_p3), %s493_s20, 7 }
   0xe   : > { %v222_v0 = vlaneseq  ;;  %s803_s10 = smov (!%p166_p5, %s565_s10), 1  ;;  %s805_s16 = smov (!%p168_p6, %s489_s16), 15  ;;  %v218_v2 = vld [vmem:[%s789_s1] ss:$2 sm:$0xf] }
   0xf   : > { %s491_s19 = sshll.u32 %s803_s10, 6  ;;  %s490_s21 = sshll.u32 %s805_s16, 2  ;;  %v496_v7 = vld [vmem:[%s789_s1 + $0x1] ss:$2 sm:$0xf] }
  0x10   : > { %v223_v1 = vshrl.u32 %v222_v0, 7  ;;  %s172_s24 = sadd.s32 %s491_s19, %s490_s21  ;;  %s807_s20 = smov (!%p643_p7, %s493_s20), 7 }
  0x11   : > { %s492_s25 = sshll.u32 %s172_s24, 3  ;;  %s494_s30 = sshll.u32 %s803_s10, 3 }
  0x12   : > { %v224_v3 = vsub.s32 0, %v223_v1  ;;  %v228_v4 = vsub.s32 1, %v223_v1  ;;  %v232_v5 = vsub.s32 2, %v223_v1  ;;  %v236_v6 = vsub.s32 3, %v223_v1  ;;  %s652_s29 = scalar_lea.vmem %s788_s0, %s492_s25  ;;  %s693_s3 = sadd.s32 %s494_s30, %s807_s20 }
  0x13   : > { %v186_v14 = vld [vmem:[%s652_s29] sm:$0xff]  ;;  %v187_v15 = vld [vmem:[%s652_s29 + $0x8] sm:$0xff]  ;;  %v188_v16 = vld [vmem:[%s652_s29 + $0x10] sm:$0xff]  ;;  %s495_s4 = sshll.u32 %s693_s3, 3 }
  0x14   : > { %v637_v8 = vrot.slane %v218_v2, %v224_v3  ;;  %v639_v9 = vrot.slane %v218_v2, %v228_v4  ;;  %v641_v10 = vrot.slane %v218_v2, %v232_v5  ;;  %v647_v11 = vrot.slane %v218_v2, %v236_v6  ;;  %v189_v19 = vld [vmem:[%s652_s29 + $0x18] sm:$0xff]  ;;  %v190_v20 = vld [vmem:[%s652_s29 + $0x20] sm:$0xff]  ;;  %v191_v21 = vld [vmem:[%s652_s29 + $0x28] sm:$0xff]  ;;  %s715_s7 = scalar_lea.vmem %s790_s2, %s495_s4 }
  0x15   : > { %v654_v12 = vrot.slane %v496_v7, %v224_v3  ;;  %v656_v13 = vrot.slane %v496_v7, %v228_v4  ;;  %v661_v17 = vrot.slane %v496_v7, %v232_v5  ;;  %v663_v18 = vrot.slane %v496_v7, %v236_v6  ;;  %v192_v25 = vld [vmem:[%s652_s29 + $0x30] sm:$0xff]  ;;  %v193_v26 = vld [vmem:[%s652_s29 + $0x38] sm:$0xff]  ;;  %v194_v38 = vld [vmem:[%s652_s29 + $0x40] sm:$0xff] }
  0x16   : > { %v242_v22 = vmul.f32 %v637_v8, %v186_v14  ;;  %v243_v23 = vmul.f32 %v639_v9, %v187_v15  ;;  %v244_v24 = vmul.f32 %v641_v10, %v188_v16  ;;  %v245_v27 = vmul.f32 %v647_v11, %v189_v19  ;;  %v195_v43 = vld [vmem:[%s652_s29 + $0x48] sm:$0xff]  ;;  %v196_v44 = vld [vmem:[%s652_s29 + $0x50] sm:$0xff]  ;;  %v197_v45 = vld [vmem:[%s652_s29 + $0x58] sm:$0xff] }
  0x17   : > { %v246_v28 = vmul.f32 %v637_v8, %v190_v20  ;;  %v247_v29 = vmul.f32 %v639_v9, %v191_v21  ;;  %v248_v30 = vmul.f32 %v641_v10, %v192_v25  ;;  %v249_v31 = vmul.f32 %v647_v11, %v193_v26  ;;  %v198_v50 = vld [vmem:[%s652_s29 + $0x60] sm:$0xff]  ;;  %v199_v51 = vld [vmem:[%s652_s29 + $0x68] sm:$0xff]  ;;  %v200_v55 = vld [vmem:[%s652_s29 + $0x70] sm:$0xff] }
  0x18   : > { %v295_v32 = vadd.f32 %v654_v12, %v242_v22  ;;  %v296_v33 = vadd.f32 %v656_v13, %v243_v23  ;;  %v297_v34 = vadd.f32 %v661_v17, %v244_v24  ;;  %v298_v35 = vadd.f32 %v663_v18, %v245_v27  ;;  %v201_v56 = vld [vmem:[%s652_s29 + $0x78] sm:$0xff]  ;;  %v202_v22 = vld [vmem:[%s652_s29 + $0x80] sm:$0xff]  ;;  %v203_v23 = vld [vmem:[%s652_s29 + $0x88] sm:$0xff] }
  0x19   : > { %v299_v36 = vadd.f32 %v654_v12, %v246_v28  ;;  %v300_v37 = vadd.f32 %v656_v13, %v247_v29  ;;  %v301_v39 = vadd.f32 %v661_v17, %v248_v30  ;;  %v302_v40 = vadd.f32 %v663_v18, %v249_v31  ;;  %v204_v28 = vld [vmem:[%s652_s29 + $0x90] sm:$0xff]  ;;  %v205_v29 = vld [vmem:[%s652_s29 + $0x98] sm:$0xff]  ;;  %v206_v30 = vld [vmem:[%s652_s29 + $0xa0] sm:$0xff] }
  0x1a   : > { %v327_v41 = vmax.f32 %v295_v32, 0.0  ;;  %v328_v42 = vmax.f32 %v296_v33, 0.0  ;;  %v329_v46 = vmax.f32 %v297_v34, 0.0  ;;  %v330_v47 = vmax.f32 %v298_v35, 0.0  ;;  %v207_v35 = vld [vmem:[%s652_s29 + $0xa8] sm:$0xff] }
  0x1b   : > { %v331_v48 = vmax.f32 %v299_v36, 0.0  ;;  %v332_v49 = vmax.f32 %v300_v37, 0.0  ;;  %v333_v52 = vmax.f32 %v301_v39, 0.0  ;;  %v334_v53 = vmax.f32 %v302_v40, 0.0  ;;  %v208_v36 = vld [vmem:[%s652_s29 + $0xb0] sm:$0xff]  ;;  %v209_v39 = vld [vmem:[%s652_s29 + $0xb8] sm:$0xff] }
  0x1c   : > { %v359_v54 = vadd.f32 %v328_v42, %v327_v41  ;;  %v250_v57 = vmul.f32 %v637_v8, %v194_v38  ;;  %v367_v59 = vadd.f32 %v330_v47, %v329_v46  ;;  %v251_v60 = vmul.f32 %v639_v9, %v195_v43 }
  0x1d   : > { %v360_v58 = vadd.f32 %v332_v49, %v331_v48  ;;  %v252_v61 = vmul.f32 %v641_v10, %v196_v44  ;;  %v368_v62 = vadd.f32 %v334_v53, %v333_v52  ;;  %v253_v63 = vmul.f32 %v647_v11, %v197_v45 }
  0x1e   : > { %v254_v0 = vmul.f32 %v637_v8, %v198_v50  ;;  %v255_v1 = vmul.f32 %v639_v9, %v199_v51  ;;  %v375_v2 = vmax.f32 %v359_v54, %v367_v59  ;;  %v256_v3 = vmul.f32 %v641_v10, %v200_v55 }
  0x1f   : > { %v257_v4 = vmul.f32 %v647_v11, %v201_v56  ;;  %v303_v5 = vadd.f32 %v654_v12, %v250_v57  ;;  %v376_v6 = vmax.f32 %v360_v58, %v368_v62  ;;  %v304_v7 = vadd.f32 %v656_v13, %v251_v60  ;;  %v210_v62 = vld [vmem:[%s652_s29 + $0xc0] sm:$0xff] }
  0x20   : > { %v305_v14 = vadd.f32 %v661_v17, %v252_v61  ;;  %v306_v15 = vadd.f32 %v663_v18, %v253_v63  ;;  %v307_v16 = vadd.f32 %v654_v12, %v254_v0  ;;  %v308_v19 = vadd.f32 %v656_v13, %v255_v1  ;;  %v211_v63 = vld [vmem:[%s652_s29 + $0xc8] sm:$0xff] }
  0x21   : > { %v309_v20 = vadd.f32 %v661_v17, %v256_v3  ;;  %v310_v21 = vadd.f32 %v663_v18, %v257_v4  ;;  %v383_v24 = vmax.f32 %v375_v2, %v376_v6  ;;  %v335_v25 = vmax.f32 %v303_v5, 0.0  ;;  %v212_v4 = vld [vmem:[%s652_s29 + $0xd0] sm:$0xff]  ;;  %v213_v5 = vld [vmem:[%s652_s29 + $0xd8] sm:$0xff]  ;;  %v214_v6 = vld [vmem:[%s652_s29 + $0xe0] sm:$0xff] }
  0x22   : > { %v336_v26 = vmax.f32 %v304_v7, 0.0  ;;  %v337_v27 = vmax.f32 %v305_v14, 0.0  ;;  %v338_v31 = vmax.f32 %v306_v15, 0.0  ;;  %v339_v32 = vmax.f32 %v307_v16, 0.0 }
  0x23   : > { %v340_v33 = vmax.f32 %v308_v19, 0.0  ;;  %v341_v34 = vmax.f32 %v309_v20, 0.0  ;;  %387 = vst [vmem:[%s715_s7] sm:$0xff] %v383_v24  ;;  %v342_v37 = vmax.f32 %v310_v21, 0.0  ;;  %v258_v40 = vmul.f32 %v637_v8, %v202_v22  ;;  %v215_v19 = vld [vmem:[%s652_s29 + $0xe8] sm:$0xff]  ;;  %v216_v20 = vld [vmem:[%s652_s29 + $0xf0] sm:$0xff] }
  0x24   : > { %v361_v38 = vadd.f32 %v336_v26, %v335_v25  ;;  %v259_v41 = vmul.f32 %v639_v9, %v203_v23  ;;  %v369_v43 = vadd.f32 %v338_v31, %v337_v27  ;;  %v260_v44 = vmul.f32 %v641_v10, %v204_v28  ;;  %v217_v23 = vld [vmem:[%s652_s29 + $0xf8] sm:$0xff] }
  0x25   : > { %v362_v42 = vadd.f32 %v340_v33, %v339_v32  ;;  %v261_v45 = vmul.f32 %v647_v11, %v205_v29  ;;  %v370_v46 = vadd.f32 %v342_v37, %v341_v34  ;;  %v262_v47 = vmul.f32 %v637_v8, %v206_v30 }
  0x26   : > { %v263_v48 = vmul.f32 %v639_v9, %v207_v35  ;;  %v264_v49 = vmul.f32 %v641_v10, %v208_v36  ;;  %v377_v50 = vmax.f32 %v361_v38, %v369_v43  ;;  %v265_v51 = vmul.f32 %v647_v11, %v209_v39 }
  0x27   : > { %v311_v52 = vadd.f32 %v654_v12, %v258_v40  ;;  %v312_v53 = vadd.f32 %v656_v13, %v259_v41  ;;  %v378_v54 = vmax.f32 %v362_v42, %v370_v46  ;;  %v313_v55 = vadd.f32 %v661_v17, %v260_v44 }
  0x28   : > { %v314_v56 = vadd.f32 %v663_v18, %v261_v45  ;;  %v315_v57 = vadd.f32 %v654_v12, %v262_v47  ;;  %v316_v58 = vadd.f32 %v656_v13, %v263_v48  ;;  %v317_v59 = vadd.f32 %v661_v17, %v264_v49 }
  0x29   : > { %v318_v60 = vadd.f32 %v663_v18, %v265_v51  ;;  %v343_v61 = vmax.f32 %v311_v52, 0.0  ;;  %v384_v0 = vmax.f32 %v377_v50, %v378_v54  ;;  %v344_v1 = vmax.f32 %v312_v53, 0.0 }
  0x2a   : > { %v345_v2 = vmax.f32 %v313_v55, 0.0  ;;  %v346_v3 = vmax.f32 %v314_v56, 0.0  ;;  %v347_v7 = vmax.f32 %v315_v57, 0.0  ;;  %v348_v14 = vmax.f32 %v316_v58, 0.0 }
  0x2b   : > { %v349_v15 = vmax.f32 %v317_v59, 0.0  ;;  %v350_v16 = vmax.f32 %v318_v60, 0.0  ;;  %388 = vst [vmem:[%s715_s7 + $0x8] sm:$0xff] %v384_v0  ;;  %v363_v21 = vadd.f32 %v344_v1, %v343_v61  ;;  %v266_v24 = vmul.f32 %v637_v8, %v210_v62 }
  0x2c   : > { %v371_v22 = vadd.f32 %v346_v3, %v345_v2  ;;  %v267_v25 = vmul.f32 %v639_v9, %v211_v63  ;;  %v364_v26 = vadd.f32 %v348_v14, %v347_v7  ;;  %v268_v28 = vmul.f32 %v641_v10, %v212_v4 }
  0x2d   : > { %v372_v27 = vadd.f32 %v350_v16, %v349_v15  ;;  %v269_v29 = vmul.f32 %v647_v11, %v213_v5  ;;  %v270_v31 = vmul.f32 %v637_v8, %v214_v6  ;;  %v271_v32 = vmul.f32 %v639_v9, %v215_v19 }
  0x2e   : > { %v379_v30 = vmax.f32 %v363_v21, %v371_v22  ;;  %v272_v33 = vmul.f32 %v641_v10, %v216_v20  ;;  %v273_v35 = vmul.f32 %v647_v11, %v217_v23  ;;  %v319_v36 = vadd.f32 %v654_v12, %v266_v24 }
  0x2f   : > { %v380_v34 = vmax.f32 %v364_v26, %v372_v27  ;;  %v320_v37 = vadd.f32 %v656_v13, %v267_v25  ;;  %v321_v38 = vadd.f32 %v661_v17, %v268_v28  ;;  %v322_v39 = vadd.f32 %v663_v18, %v269_v29 }
  0x30   : > { %v323_v40 = vadd.f32 %v654_v12, %v270_v31  ;;  %v324_v8 = vadd.f32 %v656_v13, %v271_v32  ;;  %v325_v9 = vadd.f32 %v661_v17, %v272_v33  ;;  %v326_v10 = vadd.f32 %v663_v18, %v273_v35 }
  0x31   : > { %v385_v41 = vmax.f32 %v379_v30, %v380_v34  ;;  %v351_v42 = vmax.f32 %v319_v36, 0.0  ;;  %v352_v11 = vmax.f32 %v320_v37, 0.0  ;;  %v353_v43 = vmax.f32 %v321_v38, 0.0 }
  0x32   : > { %v354_v44 = vmax.f32 %v322_v39, 0.0  ;;  %v355_v45 = vmax.f32 %v323_v40, 0.0  ;;  %v356_v46 = vmax.f32 %v324_v8, 0.0  ;;  %v357_v47 = vmax.f32 %v325_v9, 0.0 }
  0x33   : > { %389 = vst [vmem:[%s715_s7 + $0x10] sm:$0xff] %v385_v41  ;;  %v358_v48 = vmax.f32 %v326_v10, 0.0  ;;  %v365_v49 = vadd.f32 %v352_v11, %v351_v42 }
  0x34   : > { %v373_v50 = vadd.f32 %v354_v44, %v353_v43  ;;  %v366_v12 = vadd.f32 %v356_v46, %v355_v45 }
  0x35   : > { %v374_v51 = vadd.f32 %v358_v48, %v357_v47 }
  0x36   : > { %v381_v13 = vmax.f32 %v365_v49, %v373_v50 }
  0x37   : > { %v382_v52 = vmax.f32 %v366_v12, %v374_v51 }
  0x39   : > { %v386_v53 = vmax.f32 %v381_v13, %v382_v52 }
  0x3b   : > { %390 = vst [vmem:[%s715_s7 + $0x18] sm:$0xff] %v386_v53 }
  0x3c PF: > { %s12_s13 = sadd.s32 1, %s577_s13   ;;  %s792_s9 = smov %s569_s11 }
  0x3d   : > { %p9_p8 = scmp.ge.s32.totalorder %s12_s13, 6   ;;  %s793_s10 = smov %s573_s12 }
  0x3e   : > { %s794_s11 = smov %s797_s14  ;;  %s795_s12 = smov %s801_s15 }
  0x3f   :  { %11 = sbr.rel (!%p9_p8) target bundleno = 3 (0x3), region = 59 }

// kernel: down_block_forward.4
= control target key start
LH: loop header
LB: loop body
LE: loop exit
PB: predicated region body
PF: predicated region fallthrough
CT: control target
= control target key end

     0   :  { %s5942_s18 = smov 0   ;;  %s7640_s0 = inlined_call_operand.vmem [shape: f32[2,256,256], index: 0, kind: input, shape index: {}]   ;;  %s7641_s1 = inlined_call_operand.vmem [shape: f32[2,256], index: 1, kind: input, shape index: {}]   ;;  %s7642_s2 = inlined_call_operand.vmem [shape: f32[9,8,128], index: 2, kind: input, shape index: {}]   ;;  %s7643_s3 = inlined_call_operand.vmem [shape: f32[8,128], index: 3, kind: input, shape index: {}]   ;;  %s7644_s4 = inlined_call_operand.vmem [shape: f32[2,256,256], index: 4, kind: output, shape index: {0}]   ;;  %s7645_s5 = inlined_call_operand.vmem [shape: f32[2,2,256], index: 5, kind: output, shape index: {1}]  }
   0x1 LB: > { %s4718_s19 = sadd.s32 4294967295, %s5909_s18   ;;  %p4722_p0 = scmp.ge.s32.totalorder %s5909_s18, 1  ;;  %s5909_s18 = sphi %s5942_s18, %s16_s18  }
   0x2   : > { %p190_p1 = scmp.lt.s32.totalorder %s5909_s18, 3 }
   0x4   : > { %p191_p2 = pnand %p4722_p0, %p190_p1 }
   0x6   : > { %194 = sbr.rel (%p191_p2) target bundleno = 580 (0x244), region = 36 }
   0xb   : > { %v4730_v0 = vld [vmem:[%s7642_s2 + $0x8] sm:$0xff]  ;;  %v630_v1 = vld [vmem:[%s7642_s2] sm:$0xff]  ;;  %vm519_vm0 = vcmask 64512   ;;  %vm528_vm1 = vcmask 57344   ;;  %vm522_vm2 = vcmask 58368   ;;  %v5911_v2 = vmov 0.0  }
   0xc   : > { %5394 = vmatprep.subr.mxu0 %v4730_v0  ;;  %5444 = vmatprep.subr.mxu1 %v630_v1  ;;  %520 = vst.msk [vmem:[#allocation2] sm:$0xff] %vm519_vm0, %v5911_v2  ;;  %521 = vst.msk [vmem:[#allocation2 + $0x8] sm:$0xff] %vm519_vm0, %v5911_v2  ;;  %v4795_v3 = vld [vmem:[%s7642_s2 + $0x10] sm:$0xff]  ;;  %v4828_v4 = vld [vmem:[%s7642_s2 + $0x18] sm:$0xff]  ;;  %p223_p3 = scmp.lt.s32.totalorder %s4718_s19, 1  ;;  %v306_v5 = vlaneseq  ;;  %vm4509_vm3 = vcmask 1040384  }
   0xd   : > { %525 = vst.msk [vmem:[#allocation2 + $0x198] sm:$0xff] %vm519_vm0, %v5911_v2  ;;  %526 = vst.msk [vmem:[#allocation2 + $0x1a0] sm:$0xff] %vm519_vm0, %v5911_v2  ;;  %5395 = vmatpush3.msra.mxu0 %v4730_v0  ;;  %5445 = vmatpush3.msra.mxu1 %v630_v1  ;;  %v6015_v7 = vld [vmem:[%s7641_s1] ss:$2 sm:$0x3]  ;;  %v6048_v19 = vld [vmem:[%s7642_s2 + $0x28] sm:$0xff] }
   0xe   : > { %530 = vst.msk [vmem:[#allocation2 + $0x18] sm:$0x1] %vm528_vm1, %v5911_v2  ;;  %531 = vst.msk [vmem:[#allocation2 + $0x30] sm:$0x1] %vm528_vm1, %v5911_v2  ;;  %5494 = vmatprep.subr.mxu0 %v4795_v3  ;;  %5544 = vmatprep.subr.mxu1 %v4828_v4  ;;  %s7798_s19 = smov (!%p223_p3, %s4718_s19), 1  ;;  %v6010_v6 = vshrl.u32 %v306_v5, 7 }
   0xf   : > { %532 = vst.msk [vmem:[#allocation2 + $0x48] sm:$0x1] %vm528_vm1, %v5911_v2  ;;  %533 = vst.msk [vmem:[#allocation2 + $0x60] sm:$0x1] %vm528_vm1, %v5911_v2  ;;  %s5061_s7 = sshll.u32 %s7798_s19, 9  ;;  %v6043_v18 = vld [vmem:[%s7642_s2 + $0x20] sm:$0xff] }
  0x10   : > { %534 = vst.msk [vmem:[#allocation2 + $0x78] sm:$0x1] %vm528_vm1, %v5911_v2  ;;  %535 = vst.msk [vmem:[#allocation2 + $0x90] sm:$0x1] %vm528_vm1, %v5911_v2  ;;  %v308_v9 = vsub.s32 0, %v6010_v6  ;;  %s6029_s10 = scalar_lea.vmem %s7640_s0, %s5061_s7  ;;  %s7425_s27 = scalar_lea.vmem %s7644_s4, %s5061_s7 }
  0x11   : > { %536 = vst.msk [vmem:[#allocation2 + $0xa8] sm:$0x1] %vm528_vm1, %v5911_v2  ;;  %537 = vst.msk [vmem:[#allocation2 + $0xc0] sm:$0x1] %vm528_vm1, %v5911_v2  ;;  %v238_v10 = vld [vmem:[%s6029_s10] sm:$0xff]  ;;  %v240_v13 = vld [vmem:[%s6029_s10 + $0x10] sm:$0xff] }
  0x12   : > { %538 = vst.msk [vmem:[#allocation2 + $0xd8] sm:$0x1] %vm528_vm1, %v5911_v2  ;;  %539 = vst.msk [vmem:[#allocation2 + $0xf0] sm:$0x1] %vm528_vm1, %v5911_v2  ;;  %v6033_v11 = vrot.slane %v6015_v7, %v308_v9  ;;  %v242_v14 = vld [vmem:[%s6029_s10 + $0x20] sm:$0xff]  ;;  %v244_v24 = vld [vmem:[%s6029_s10 + $0x30] sm:$0xff] }
  0x13   : > { %540 = vst.msk [vmem:[#allocation2 + $0x108] sm:$0x1] %vm528_vm1, %v5911_v2  ;;  %541 = vst.msk [vmem:[#allocation2 + $0x120] sm:$0x1] %vm528_vm1, %v5911_v2  ;;  %v631_v15 = vld [vmem:[#allocation2 + $0x1] sm:$0xff]  ;;  %v248_v28 = vld [vmem:[%s6029_s10 + $0x50] sm:$0xff] }
  0x14   : > { %542 = vst.msk [vmem:[#allocation2 + $0x138] sm:$0x1] %vm528_vm1, %v5911_v2  ;;  %543 = vst.msk [vmem:[#allocation2 + $0x150] sm:$0x1] %vm528_vm1, %v5911_v2  ;;  %v599_v17 = vld [vmem:[#allocation2 + $0x8] sm:$0xff]  ;;  %5396 = vmatprep.mubr.msk.f32.mxu0 %vm519_vm0, %v631_v15  ;;  %v316_v21 = vmul.f32 %v6033_v11, %v238_v10  ;;  %v318_v22 = vmul.f32 %v6033_v11, %v240_v13  ;;  %v320_v23 = vmul.f32 %v6033_v11, %v242_v14  ;;  %v246_v25 = vld [vmem:[%s6029_s10 + $0x40] sm:$0xff] }
  0x15   : > { %544 = vst.msk [vmem:[#allocation2 + $0x168] sm:$0x1] %vm528_vm1, %v5911_v2  ;;  %545 = vst.msk [vmem:[#allocation2 + $0x180] sm:$0x1] %vm528_vm1, %v5911_v2  ;;  %v322_v26 = vmul.f32 %v6033_v11, %v244_v24  ;;  %v324_v27 = vmul.f32 %v6033_v11, %v246_v25  ;;  %v250_v29 = vld [vmem:[%s6029_s10 + $0x60] sm:$0xff]  ;;  %v252_v30 = vld [vmem:[%s6029_s10 + $0x70] sm:$0xff]  ;;  %v326_v36 = vmul.f32 %v6033_v11, %v248_v28 }
  0x16   : > { %548 = vst.msk [vmem:[#allocation2 + $0x29] sm:$0x1] %vm528_vm1, %v5911_v2  ;;  %549 = vst.msk [vmem:[#allocation2 + $0x41] sm:$0x1] %vm528_vm1, %v5911_v2  ;;  %v328_v37 = vmul.f32 %v6033_v11, %v250_v29  ;;  %v254_v38 = vld [vmem:[%s6029_s10 + $0x80] sm:$0xff]  ;;  %v256_v39 = vld [vmem:[%s6029_s10 + $0x90] sm:$0xff]  ;;  %v330_v44 = vmul.f32 %v6033_v11, %v252_v30 }
  0x17   : > { %550 = vst.msk [vmem:[#allocation2 + $0x59] sm:$0x1] %vm528_vm1, %v5911_v2  ;;  %551 = vst.msk [vmem:[#allocation2 + $0x71] sm:$0x1] %vm528_vm1, %v5911_v2  ;;  %v258_v40 = vld [vmem:[%s6029_s10 + $0xa0] sm:$0xff]  ;;  %v260_v45 = vld [vmem:[%s6029_s10 + $0xb0] sm:$0xff]  ;;  %v332_v52 = vmul.f32 %v6033_v11, %v254_v38  ;;  %v334_v53 = vmul.f32 %v6033_v11, %v256_v39 }
  0x18   : > { %552 = vst.msk [vmem:[#allocation2 + $0x89] sm:$0x1] %vm528_vm1, %v5911_v2  ;;  %553 = vst.msk [vmem:[#allocation2 + $0xa1] sm:$0x1] %vm528_vm1, %v5911_v2  ;;  %v262_v46 = vld [vmem:[%s6029_s10 + $0xc0] sm:$0xff]  ;;  %v336_v54 = vmul.f32 %v6033_v11, %v258_v40  ;;  %v264_v55 = vld [vmem:[%s6029_s10 + $0xd0] sm:$0xff]  ;;  %v338_v59 = vmul.f32 %v6033_v11, %v260_v45 }
  0x19   : > { %554 = vst.msk [vmem:[#allocation2 + $0xb9] sm:$0x1] %vm528_vm1, %v5911_v2  ;;  %555 = vst.msk [vmem:[#allocation2 + $0xd1] sm:$0x1] %vm528_vm1, %v5911_v2  ;;  %v266_v56 = vld [vmem:[%s6029_s10 + $0xe0] sm:$0xff]  ;;  %v340_v60 = vmul.f32 %v6033_v11, %v262_v46  ;;  %v268_v61 = vld [vmem:[%s6029_s10 + $0xf0] sm:$0xff] }
  0x1a   : > { %556 = vst.msk [vmem:[#allocation2 + $0xe9] sm:$0x1] %vm528_vm1, %v5911_v2  ;;  %557 = vst.msk [vmem:[#allocation2 + $0x101] sm:$0x1] %vm528_vm1, %v5911_v2  ;;  %v344_v5 = vmul.f32 %v6033_v11, %v266_v56  ;;  %v272_v10 = vld [vmem:[%s6029_s10 + $0x110] sm:$0xff]  ;;  %v274_v13 = vld [vmem:[%s6029_s10 + $0x120] sm:$0xff] }
  0x1b   : > { %558 = vst.msk [vmem:[#allocation2 + $0x119] sm:$0x1] %vm528_vm1, %v5911_v2  ;;  %559 = vst.msk [vmem:[#allocation2 + $0x131] sm:$0x1] %vm528_vm1, %v5911_v2  ;;  %v350_v28 = vmul.f32 %v6033_v11, %v272_v10  ;;  %v352_v29 = vmul.f32 %v6033_v11, %v274_v13  ;;  %v280_v30 = vld [vmem:[%s6029_s10 + $0x150] sm:$0xff]  ;;  %v286_v40 = vld [vmem:[%s6029_s10 + $0x180] sm:$0xff] }
  0x1c   : > { %560 = vst.msk [vmem:[#allocation2 + $0x149] sm:$0x1] %vm528_vm1, %v5911_v2  ;;  %561 = vst.msk [vmem:[#allocation2 + $0x161] sm:$0x1] %vm528_vm1, %v5911_v2  ;;  %v296_v10 = vld [vmem:[%s6029_s10 + $0x1d0] sm:$0xff]  ;;  %s5063_s28 = sshll.u32 %s7798_s19, 2 }
  0x1d   : > { %562 = vst.msk [vmem:[#allocation2 + $0x179] sm:$0x1] %vm528_vm1, %v5911_v2  ;;  %563 = vst.msk [vmem:[#allocation2 + $0x191] sm:$0x1] %vm528_vm1, %v5911_v2  ;;  %s237_s6 = scalar_lea.vmem %s7645_s5, %s5063_s28 }
  0x1e   : > { %523 = vst.msk [vmem:[#allocation2 + $0x10] sm:$0x3] %vm522_vm2, %v5911_v2  ;;  %527 = vst.msk [vmem:[#allocation2 + $0x1a8] sm:$0x3] %vm522_vm2, %v5911_v2 }
  0x1f   : > { %529 = vst.msk [vmem:[#allocation2] sm:$0x1] %vm528_vm1, %v5911_v2  ;;  %546 = vst.msk [vmem:[#allocation2 + $0x198] sm:$0x1] %vm528_vm1, %v5911_v2 }
  0x20   : > { %547 = vst.msk [vmem:[#allocation2 + $0x11] sm:$0x1] %vm528_vm1, %v5911_v2  ;;  %564 = vst.msk [vmem:[#allocation2 + $0x1a9] sm:$0x1] %vm528_vm1, %v5911_v2 }
  0x21   : > { %7673 = vst [vmem:[#allocation3_spill] sm:$0xff] %v6015_v7  ;;  %v6020_v8 = vld [vmem:[%s7641_s1 + $0x1] ss:$2 sm:$0x3] }
  0x22   : > { %7674 = vst [vmem:[#allocation4_spill] sm:$0xff] %v6020_v8  ;;  %v6036_v12 = vrot.slane %v6020_v8, %v308_v9  ;;  %v270_v9 = vld [vmem:[%s6029_s10 + $0x100] sm:$0xff] }
  0x23   : > { %v1307_v7 = vld [vmem:[#allocation2 + $0x2] sm:$0xff] }
  0x24   : > { %v391_v31 = vadd.f32 %v6036_v12, %v316_v21  ;;  %v393_v32 = vadd.f32 %v6036_v12, %v318_v22  ;;  %v395_v33 = vadd.f32 %v6036_v12, %v320_v23  ;;  %v397_v34 = vadd.f32 %v6036_v12, %v322_v26  ;;  %v278_v21 = vld [vmem:[%s6029_s10 + $0x140] sm:$0xff] }
  0x25   : > { %v632_v16 = vld [vmem:[#allocation2 + $0x9] sm:$0xff]  ;;  %v399_v35 = vadd.f32 %v6036_v12, %v324_v27  ;;  %v401_v49 = vadd.f32 %v6036_v12, %v326_v36  ;;  %v403_v50 = vadd.f32 %v6036_v12, %v328_v37  ;;  %v405_v51 = vadd.f32 %v6036_v12, %v330_v44 }
  0x26   : > { %v598_v20 = vld [vmem:[#allocation2] sm:$0xff]  ;;  %5397 = vmatmul.mubr.msk.f32.vlgmr.msra.gmra.mxu0 %vm519_vm0, %v632_v16  ;;  %v455_v41 = vmax.f32 %v391_v31, 0.0  ;;  %v457_v42 = vmax.f32 %v393_v32, 0.0  ;;  %v459_v43 = vmax.f32 %v395_v33, 0.0  ;;  %v461_v47 = vmax.f32 %v397_v34, 0.0  ;;  %v284_v32 = vld [vmem:[%s6029_s10 + $0x170] sm:$0xff] }
  0x27   : > { %5446 = vmatprep.mubr.msk.f32.mxu1 %vm519_vm0, %v598_v20  ;;  %5495 = vmatpush3.msra.mxu0 %v4795_v3  ;;  %v463_v48 = vmax.f32 %v399_v35, 0.0  ;;  %v465_v57 = vmax.f32 %v401_v49, 0.0  ;;  %v467_v58 = vmax.f32 %v403_v50, 0.0  ;;  %v469_v62 = vmax.f32 %v405_v51, 0.0  ;;  %v276_v20 = vld [vmem:[%s6029_s10 + $0x130] sm:$0xff]  ;;  %v282_v31 = vld [vmem:[%s6029_s10 + $0x160] sm:$0xff] }
  0x28   : > { %5447 = vmatmul.mubr.msk.f32.vlgmr.msra.gmra.mxu1 %vm519_vm0, %v599_v17  ;;  %5594 = vmatprep.subr.mxu0 %v6043_v18  ;;  %566 = vst.msk [vmem:[#allocation2 + $0x19] sm:$0xff] %vm519_vm0, %v455_v41  ;;  %567 = vst.msk [vmem:[#allocation2 + $0x21] sm:$0xff] %vm519_vm0, %v457_v42  ;;  %v407_v63 = vadd.f32 %v6036_v12, %v332_v52  ;;  %v409_v0 = vadd.f32 %v6036_v12, %v334_v53  ;;  %v288_v51 = vld [vmem:[%s6029_s10 + $0x190] sm:$0xff]  ;;  %v290_v52 = vld [vmem:[%s6029_s10 + $0x1a0] sm:$0xff] }
  0x29   : > { %5545 = vmatpush3.msra.mxu1 %v4828_v4  ;;  %568 = vst.msk [vmem:[#allocation2 + $0x31] sm:$0xff] %vm519_vm0, %v459_v43  ;;  %569 = vst.msk [vmem:[#allocation2 + $0x39] sm:$0xff] %vm519_vm0, %v461_v47  ;;  %v411_v1 = vadd.f32 %v6036_v12, %v336_v54  ;;  %v413_v2 = vadd.f32 %v6036_v12, %v338_v59  ;;  %v415_v3 = vadd.f32 %v6036_v12, %v340_v60  ;;  %v292_v53 = vld [vmem:[%s6029_s10 + $0x1b0] sm:$0xff]  ;;  %v294_v60 = vld [vmem:[%s6029_s10 + $0x1c0] sm:$0xff] }
  0x2a   : > { %5644 = vmatprep.subr.mxu1 %v6048_v19  ;;  %570 = vst.msk [vmem:[#allocation2 + $0x49] sm:$0xff] %vm519_vm0, %v463_v48  ;;  %571 = vst.msk [vmem:[#allocation2 + $0x51] sm:$0xff] %vm519_vm0, %v465_v57  ;;  %v342_v4 = vmul.f32 %v6033_v11, %v264_v55  ;;  %v471_v14 = vmax.f32 %v407_v63, 0.0  ;;  %v473_v15 = vmax.f32 %v409_v0, 0.0  ;;  %v346_v17 = vmul.f32 %v6033_v11, %v268_v61 }
  0x2b   : > { %572 = vst.msk [vmem:[#allocation2 + $0x61] sm:$0xff] %vm519_vm0, %v467_v58  ;;  %573 = vst.msk [vmem:[#allocation2 + $0x69] sm:$0xff] %vm519_vm0, %v469_v62  ;;  %v475_v16 = vmax.f32 %v411_v1, 0.0  ;;  %v477_v22 = vmax.f32 %v413_v2, 0.0  ;;  %v479_v23 = vmax.f32 %v415_v3, 0.0  ;;  %v419_v25 = vadd.f32 %v6036_v12, %v344_v5 }
  0x2c   : > { %v417_v24 = vadd.f32 %v6036_v12, %v342_v4  ;;  %574 = vst.msk [vmem:[#allocation2 + $0x79] sm:$0xff] %vm519_vm0, %v471_v14  ;;  %575 = vst.msk [vmem:[#allocation2 + $0x81] sm:$0xff] %vm519_vm0, %v473_v15  ;;  %v421_v26 = vadd.f32 %v6036_v12, %v346_v17  ;;  %v348_v27 = vmul.f32 %v6033_v11, %v270_v9  ;;  %v298_v17 = vld [vmem:[%s6029_s10 + $0x1e0] sm:$0xff] }
  0x2d   : > { %576 = vst.msk [vmem:[#allocation2 + $0x91] sm:$0xff] %vm519_vm0, %v475_v16  ;;  %577 = vst.msk [vmem:[#allocation2 + $0x99] sm:$0xff] %vm519_vm0, %v477_v22  ;;  %v483_v37 = vmax.f32 %v419_v25, 0.0  ;;  %v354_v38 = vmul.f32 %v6033_v11, %v276_v20  ;;  %v356_v39 = vmul.f32 %v6033_v11, %v278_v21  ;;  %v425_v46 = vadd.f32 %v6036_v12, %v350_v28 }
  0x2e   : > { %578 = vst.msk [vmem:[#allocation2 + $0xa9] sm:$0xff] %vm519_vm0, %v479_v23  ;;  %v481_v36 = vmax.f32 %v417_v24, 0.0  ;;  %v485_v44 = vmax.f32 %v421_v26, 0.0  ;;  %v423_v45 = vadd.f32 %v6036_v12, %v348_v27  ;;  %v427_v47 = vadd.f32 %v6036_v12, %v352_v29  ;;  %v300_v26 = vld [vmem:[%s6029_s10 + $0x1f0] sm:$0xff] }
  0x2f   : > { %v6123_v33 = vld [vmem:[#allocation2 + $0x19] sm:$0xff]  ;;  %v6127_v35 = vld [vmem:[#allocation2 + $0x21] sm:$0xff]  ;;  %580 = vst.msk [vmem:[#allocation2 + $0xc1] sm:$0xff] %vm519_vm0, %v483_v37  ;;  %v429_v48 = vadd.f32 %v6036_v12, %v354_v38  ;;  %v431_v49 = vadd.f32 %v6036_v12, %v356_v39  ;;  %v358_v50 = vmul.f32 %v6033_v11, %v280_v30  ;;  %v489_v57 = vmax.f32 %v425_v46, 0.0 }
  0x30   : > { %v6125_v34 = vld [vmem:[#allocation2 + $0x18] sm:$0xff]  ;;  %5399 = vmatprep.mubr.msk.f32.mxu0 %vm519_vm0, %v6123_v33  ;;  %v6138_v41 = vld [vmem:[#allocation2 + $0x20] sm:$0xff]  ;;  %v6142_v43 = vld [vmem:[#allocation2 + $0x30] sm:$0xff]  ;;  %579 = vst.msk [vmem:[#allocation2 + $0xb1] sm:$0xff] %vm519_vm0, %v481_v36  ;;  %v487_v56 = vmax.f32 %v423_v45, 0.0  ;;  %v491_v58 = vmax.f32 %v427_v47, 0.0  ;;  %v360_v59 = vmul.f32 %v6033_v11, %v282_v31  ;;  %v362_v2 = vmul.f32 %v6033_v11, %v284_v32 }
  0x31   : > { %5449 = vmatprep.mubr.msk.f32.mxu1 %vm519_vm0, %v6125_v34  ;;  %v6140_v42 = vld [vmem:[#allocation2 + $0x31] sm:$0xff]  ;;  %5400 = vmatmul.mubr.msk.f32.gmra.mxu0 %vm519_vm0, %v6127_v35  ;;  %v6163_v54 = vld [vmem:[#allocation2 + $0x39] sm:$0xff]  ;;  %581 = vst.msk [vmem:[#allocation2 + $0xc9] sm:$0xff] %vm519_vm0, %v485_v44  ;;  %v6170_v61 = vld [vmem:[#allocation2 + $0x49] sm:$0xff]  ;;  %v493_v63 = vmax.f32 %v429_v48, 0.0  ;;  %v495_v0 = vmax.f32 %v431_v49, 0.0  ;;  %v433_v1 = vadd.f32 %v6036_v12, %v358_v50  ;;  %v364_v4 = vmul.f32 %v6033_v11, %v286_v40 }
  0x32   : > { %5450 = vmatmul.mubr.msk.f32.gmra.mxu1 %vm519_vm0, %v6138_v41  ;;  %5402 = vmatprep.mubr.msk.f32.mxu0 %vm519_vm0, %v6140_v42  ;;  %v6165_v55 = vld [vmem:[#allocation2 + $0x38] sm:$0xff]  ;;  %v6172_v62 = vld [vmem:[#allocation2 + $0x48] sm:$0xff]  ;;  %582 = vst.msk [vmem:[#allocation2 + $0xd9] sm:$0xff] %vm519_vm0, %v487_v56  ;;  %583 = vst.msk [vmem:[#allocation2 + $0xe1] sm:$0xff] %vm519_vm0, %v489_v57  ;;  %v435_v3 = vadd.f32 %v6036_v12, %v360_v59  ;;  %v366_v5 = vmul.f32 %v6033_v11, %v288_v51 }
  0x33   : > { %5452 = vmatprep.mubr.msk.f32.mxu1 %vm519_vm0, %v6142_v43  ;;  %584 = vst.msk [vmem:[#allocation2 + $0xf1] sm:$0xff] %vm519_vm0, %v491_v58  ;;  %v368_v9 = vmul.f32 %v6033_v11, %v290_v52  ;;  %585 = vst.msk [vmem:[#allocation2 + $0xf9] sm:$0xff] %vm519_vm0, %v493_v63  ;;  %v497_v13 = vmax.f32 %v433_v1, 0.0  ;;  %v437_v14 = vadd.f32 %v6036_v12, %v362_v2  ;;  %v6198_v20 = vld [vmem:[#allocation2 + $0x51] sm:$0xff]  ;;  %v6206_v27 = vld [vmem:[#allocation2 + $0x61] sm:$0xff] }
  0x34   : > { %586 = vst.msk [vmem:[#allocation2 + $0x109] sm:$0xff] %vm519_vm0, %v495_v0  ;;  %v370_v15 = vmul.f32 %v6033_v11, %v292_v53  ;;  %v372_v16 = vmul.f32 %v6033_v11, %v294_v60  ;;  %v6200_v21 = vld [vmem:[#allocation2 + $0x50] sm:$0xff]  ;;  %v499_v22 = vmax.f32 %v435_v3, 0.0  ;;  %v439_v23 = vadd.f32 %v6036_v12, %v364_v4  ;;  %v6208_v28 = vld [vmem:[#allocation2 + $0x60] sm:$0xff]  ;;  %v6229_v48 = vld [vmem:[#allocation2 + $0x68] sm:$0xff] }
  0x35   : > { %5403 = vmatmul.mubr.msk.f32.gmra.mxu0 %vm519_vm0, %v6163_v54  ;;  %v441_v24 = vadd.f32 %v6036_v12, %v366_v5  ;;  %v443_v25 = vadd.f32 %v6036_v12, %v368_v9  ;;  %587 = vst.msk [vmem:[#allocation2 + $0x111] sm:$0xff] %vm519_vm0, %v497_v13  ;;  %v501_v29 = vmax.f32 %v437_v14, 0.0  ;;  %v374_v32 = vmul.f32 %v6033_v11, %v296_v10  ;;  %v6227_v47 = vld [vmem:[#allocation2 + $0x69] sm:$0xff]  ;;  %v6235_v50 = vld [vmem:[#allocation2 + $0x79] sm:$0xff]  ;;  %v6251_v57 = vld [vmem:[#allocation2 + $0x81] sm:$0xff] }
  0x36   : > { %5453 = vmatmul.mubr.msk.f32.gmra.mxu1 %vm519_vm0, %v6165_v55  ;;  %5405 = vmatprep.mubr.msk.f32.mxu0 %vm519_vm0, %v6170_v61  ;;  %v445_v30 = vadd.f32 %v6036_v12, %v370_v15  ;;  %v447_v31 = vadd.f32 %v6036_v12, %v372_v16  ;;  %588 = vst.msk [vmem:[#allocation2 + $0x121] sm:$0xff] %vm519_vm0, %v499_v22  ;;  %v503_v36 = vmax.f32 %v439_v23, 0.0  ;;  %v6253_v58 = vld [vmem:[#allocation2 + $0x80] sm:$0xff]  ;;  %v6258_v59 = vld [vmem:[#allocation2 + $0x90] sm:$0xff]  ;;  %v6271_v63 = vld [vmem:[#allocation2 + $0x98] sm:$0xff] }
  0x37   : > { %5455 = vmatprep.mubr.msk.f32.mxu1 %vm519_vm0, %v6172_v62  ;;  %v505_v37 = vmax.f32 %v441_v24, 0.0  ;;  %v507_v38 = vmax.f32 %v443_v25, 0.0  ;;  %v376_v39 = vmul.f32 %v6033_v11, %v298_v17  ;;  %589 = vst.msk [vmem:[#allocation2 + $0x129] sm:$0xff] %vm519_vm0, %v501_v29  ;;  %v449_v45 = vadd.f32 %v6036_v12, %v374_v32  ;;  %v6269_v60 = vld [vmem:[#allocation2 + $0x99] sm:$0xff]  ;;  %v6273_v0 = vld [vmem:[#allocation2 + $0xa9] sm:$0xff]  ;;  %v6285_v2 = vld [vmem:[#allocation2 + $0xb1] sm:$0xff] }
  0x38   : > { %v509_v40 = vmax.f32 %v445_v30, 0.0  ;;  %v511_v44 = vmax.f32 %v447_v31, 0.0  ;;  %v378_v46 = vmul.f32 %v6033_v11, %v300_v26  ;;  %590 = vst.msk [vmem:[#allocation2 + $0x139] sm:$0xff] %vm519_vm0, %v503_v36  ;;  %v6237_v11 = vld [vmem:[#allocation2 + $0x78] sm:$0xff]  ;;  %v6275_v1 = vld [vmem:[#allocation2 + $0xa8] sm:$0xff]  ;;  %v6287_v3 = vld [vmem:[#allocation2 + $0xb0] sm:$0xff] }
  0x39   : > { %5406 = vmatmul.mubr.msk.f32.gmra.mxu0 %vm519_vm0, %v6198_v20  ;;  %591 = vst.msk [vmem:[#allocation2 + $0x141] sm:$0xff] %vm519_vm0, %v505_v37  ;;  %592 = vst.msk [vmem:[#allocation2 + $0x151] sm:$0xff] %vm519_vm0, %v507_v38  ;;  %v451_v49 = vadd.f32 %v6036_v12, %v376_v39  ;;  %v513_v51 = vmax.f32 %v449_v45, 0.0  ;;  %v6289_v4 = vld [vmem:[#allocation2 + $0xc1] sm:$0xff]  ;;  %v6301_v9 = vld [vmem:[#allocation2 + $0xc9] sm:$0xff] }
  0x3a   : > { %5456 = vmatmul.mubr.msk.f32.gmra.mxu1 %vm519_vm0, %v6200_v21  ;;  %5408 = vmatprep.mubr.msk.f32.mxu0 %vm519_vm0, %v6206_v27  ;;  %593 = vst.msk [vmem:[#allocation2 + $0x159] sm:$0xff] %vm519_vm0, %v509_v40  ;;  %594 = vst.msk [vmem:[#allocation2 + $0x169] sm:$0xff] %vm519_vm0, %v511_v44  ;;  %v453_v52 = vadd.f32 %v6036_v12, %v378_v46  ;;  %v6256_v12 = vld [vmem:[#allocation2 + $0x91] sm:$0xff]  ;;  %v6291_v5 = vld [vmem:[#allocation2 + $0xc0] sm:$0xff] }
  0x3b   : > { %5458 = vmatprep.mubr.msk.f32.mxu1 %vm519_vm0, %v6208_v28  ;;  %v515_v53 = vmax.f32 %v451_v49, 0.0  ;;  %595 = vst.msk [vmem:[#allocation2 + $0x171] sm:$0xff] %vm519_vm0, %v513_v51  ;;  %7675 = vst [vmem:[#allocation5_spill] sm:$0xff] %v6275_v1  ;;  %v6303_v10 = vld [vmem:[#allocation2 + $0xc8] sm:$0xff]  ;;  %v6305_v13 = vld [vmem:[#allocation2 + $0xd9] sm:$0xff] }
  0x3c   : > { %v517_v56 = vmax.f32 %v453_v52, 0.0  ;;  %7676 = vst [vmem:[#allocation6_spill] sm:$0xff] %v6287_v3  ;;  %7677 = vst [vmem:[#allocation7_spill] sm:$0xff] %v6291_v5  ;;  %v6307_v14 = vld [vmem:[#allocation2 + $0xd8] sm:$0xff]  ;;  %v6317_v15 = vld [vmem:[#allocation2 + $0xe1] sm:$0xff] }
  0x3d   : > { %5409 = vmatmul.mubr.msk.f32.gmra.mxu0 %vm519_vm0, %v6227_v47  ;;  %596 = vst.msk [vmem:[#allocation2 + $0x181] sm:$0xff] %vm519_vm0, %v515_v53  ;;  %7678 = vst [vmem:[#allocation8_spill] sm:$0xff] %v6303_v10  ;;  %v6319_v16 = vld [vmem:[#allocation2 + $0xe0] sm:$0xff]  ;;  %v6321_v17 = vld [vmem:[#allocation2 + $0xf1] sm:$0xff] }
  0x3e   : > { %5459 = vmatmul.mubr.msk.f32.gmra.mxu1 %vm519_vm0, %v6229_v48  ;;  %5411 = vmatprep.mubr.msk.f32.mxu0 %vm519_vm0, %v6235_v50  ;;  %597 = vst.msk [vmem:[#allocation2 + $0x189] sm:$0xff] %vm519_vm0, %v517_v56  ;;  %7679 = vst [vmem:[#allocation9_spill] sm:$0xff] %v6307_v14  ;;  %v6323_v22 = vld [vmem:[#allocation2 + $0xf0] sm:$0xff]  ;;  %v6333_v23 = vld [vmem:[#allocation2 + $0xf9] sm:$0xff] }
  0x3f   : > { %5461 = vmatprep.mubr.msk.f32.mxu1 %vm519_vm0, %v6237_v11  ;;  %7680 = vst [vmem:[#allocation10_spill] sm:$0xff] %v6319_v16  ;;  %7681 = vst [vmem:[#allocation11_spill] sm:$0xff] %v6323_v22  ;;  %v6335_v24 = vld [vmem:[#allocation2 + $0xf8] sm:$0xff]  ;;  %v6337_v25 = vld [vmem:[#allocation2 + $0x109] sm:$0xff] }
  0x40   : > { %7682 = vst [vmem:[#allocation12_spill] sm:$0xff] %v6335_v24  ;;  %v6339_v26 = vld [vmem:[#allocation2 + $0x108] sm:$0xff]  ;;  %v6349_v29 = vld [vmem:[#allocation2 + $0x111] sm:$0xff]  ;;  %v6355_v32 = vld [vmem:[#allocation2 + $0x120] sm:$0xff] }
  0x41   : > { %5412 = vmatmul.mubr.msk.f32.gmra.mxu0 %vm519_vm0, %v6251_v57  ;;  %7683 = vst [vmem:[#allocation13_spill] sm:$0xff] %v6339_v26  ;;  %v6351_v30 = vld [vmem:[#allocation2 + $0x110] sm:$0xff]  ;;  %v6353_v31 = vld [vmem:[#allocation2 + $0x121] sm:$0xff]  ;;  %7685 = vst [vmem:[#allocation15_spill] sm:$0xff] %v6355_v32 }
  0x42   : > { %5462 = vmatmul.mubr.msk.f32.gmra.mxu1 %vm519_vm0, %v6253_v58  ;;  %5414 = vmatprep.mubr.msk.f32.mxu0 %vm519_vm0, %v6256_v12  ;;  %7684 = vst [vmem:[#allocation14_spill] sm:$0xff] %v6351_v30  ;;  %v6365_v36 = vld [vmem:[#allocation2 + $0x129] sm:$0xff]  ;;  %v6369_v38 = vld [vmem:[#allocation2 + $0x139] sm:$0xff]  ;;  %v6381_v40 = vld [vmem:[#allocation2 + $0x141] sm:$0xff] }
  0x43   : > { %5464 = vmatprep.mubr.msk.f32.mxu1 %vm519_vm0, %v6258_v59  ;;  %v6367_v37 = vld [vmem:[#allocation2 + $0x128] sm:$0xff]  ;;  %v6371_v39 = vld [vmem:[#allocation2 + $0x138] sm:$0xff]  ;;  %v6383_v44 = vld [vmem:[#allocation2 + $0x140] sm:$0xff] }
  0x44   : > { %7686 = vst [vmem:[#allocation16_spill] sm:$0xff] %v6367_v37  ;;  %7687 = vst [vmem:[#allocation17_spill] sm:$0xff] %v6371_v39  ;;  %v6385_v45 = vld [vmem:[#allocation2 + $0x151] sm:$0xff]  ;;  %v6397_v49 = vld [vmem:[#allocation2 + $0x159] sm:$0xff] }
  0x45   : > { %5415 = vmatmul.mubr.msk.f32.gmra.mxu0 %vm519_vm0, %v6269_v60  ;;  %7688 = vst [vmem:[#allocation18_spill] sm:$0xff] %v6383_v44  ;;  %v6387_v46 = vld [vmem:[#allocation2 + $0x150] sm:$0xff]  ;;  %7690 = vst [vmem:[#allocation20_spill] sm:$0xff] %v6397_v49  ;;  %v6399_v51 = vld [vmem:[#allocation2 + $0x158] sm:$0xff] }
  0x46   : > { %5465 = vmatmul.mubr.msk.f32.gmra.mxu1 %vm519_vm0, %v6271_v63  ;;  %5417 = vmatprep.mubr.msk.f32.mxu0 %vm519_vm0, %v6273_v0  ;;  %7689 = vst [vmem:[#allocation19_spill] sm:$0xff] %v6387_v46  ;;  %7691 = vst [vmem:[#allocation21_spill] sm:$0xff] %v6399_v51  ;;  %v6401_v52 = vld [vmem:[#allocation2 + $0x169] sm:$0xff]  ;;  %v6413_v56 = vld [vmem:[#allocation2 + $0x171] sm:$0xff] }
  0x47   : > { %5467 = vmatprep.mubr.msk.f32.mxu1 %vm519_vm0, %v6275_v1  ;;  %7692 = vst [vmem:[#allocation22_spill] sm:$0xff] %v6401_v52  ;;  %v6403_v53 = vld [vmem:[#allocation2 + $0x168] sm:$0xff]  ;;  %7694 = vst [vmem:[#allocation24_spill] sm:$0xff] %v6413_v56  ;;  %v6415_v8 = vld [vmem:[#allocation2 + $0x170] sm:$0xff] }
  0x48   : > { %7693 = vst [vmem:[#allocation23_spill] sm:$0xff] %v6403_v53 }
  0x49   : > { %5418 = vmatmul.mubr.msk.f32.gmra.mxu0 %vm519_vm0, %v6285_v2 }
  0x4a   : > { %5468 = vmatmul.mubr.msk.f32.gmra.mxu1 %vm519_vm0, %v6287_v3  ;;  %5420 = vmatprep.mubr.msk.f32.mxu0 %vm519_vm0, %v6289_v4 }
  0x4b   : > { %5470 = vmatprep.mubr.msk.f32.mxu1 %vm519_vm0, %v6291_v5 }
  0x4d   : > { %5421 = vmatmul.mubr.msk.f32.gmra.mxu0 %vm519_vm0, %v6301_v9 }
  0x4e   : > { %5471 = vmatmul.mubr.msk.f32.gmra.mxu1 %vm519_vm0, %v6303_v10  ;;  %5423 = vmatprep.mubr.msk.f32.mxu0 %vm519_vm0, %v6305_v13 }
  0x4f   : > { %5473 = vmatprep.mubr.msk.f32.mxu1 %vm519_vm0, %v6307_v14 }
  0x51   : > { %5424 = vmatmul.mubr.msk.f32.gmra.mxu0 %vm519_vm0, %v6317_v15 }
  0x52   : > { %5474 = vmatmul.mubr.msk.f32.gmra.mxu1 %vm519_vm0, %v6319_v16  ;;  %5426 = vmatprep.mubr.msk.f32.mxu0 %vm519_vm0, %v6321_v17 }
  0x53   : > { %5476 = vmatprep.mubr.msk.f32.mxu1 %vm519_vm0, %v6323_v22 }
  0x55   : > { %5427 = vmatmul.mubr.msk.f32.gmra.mxu0 %vm519_vm0, %v6333_v23 }
  0x56   : > { %5477 = vmatmul.mubr.msk.f32.gmra.mxu1 %vm519_vm0, %v6335_v24  ;;  %5429 = vmatprep.mubr.msk.f32.mxu0 %vm519_vm0, %v6337_v25 }
  0x57   : > { %5479 = vmatprep.mubr.msk.f32.mxu1 %vm519_vm0, %v6339_v26 }
  0x59   : > { %5430 = vmatmul.mubr.msk.f32.gmra.mxu0 %vm519_vm0, %v6349_v29 }
  0x5a   : > { %5480 = vmatmul.mubr.msk.f32.gmra.mxu1 %vm519_vm0, %v6351_v30  ;;  %5432 = vmatprep.mubr.msk.f32.mxu0 %vm519_vm0, %v6353_v31 }
  0x5b   : > { %5482 = vmatprep.mubr.msk.f32.mxu1 %vm519_vm0, %v6355_v32 }
  0x5d   : > { %5433 = vmatmul.mubr.msk.f32.gmra.mxu0 %vm519_vm0, %v6365_v36 }
  0x5e   : > { %5483 = vmatmul.mubr.msk.f32.gmra.mxu1 %vm519_vm0, %v6367_v37  ;;  %5435 = vmatprep.mubr.msk.f32.mxu0 %vm519_vm0, %v6369_v38 }
  0x5f   : > { %5485 = vmatprep.mubr.msk.f32.mxu1 %vm519_vm0, %v6371_v39 }
  0x61   : > { %5436 = vmatmul.mubr.msk.f32.gmra.mxu0 %vm519_vm0, %v6381_v40 }
  0x62   : > { %5486 = vmatmul.mubr.msk.f32.gmra.mxu1 %vm519_vm0, %v6383_v44  ;;  %5438 = vmatprep.mubr.msk.f32.mxu0 %vm519_vm0, %v6385_v45 }
  0x63   : > { %5488 = vmatprep.mubr.msk.f32.mxu1 %vm519_vm0, %v6387_v46 }
  0x65   : > { %5439 = vmatmul.mubr.msk.f32.gmra.mxu0 %vm519_vm0, %v6397_v49  ;;  %v6424_v49 = vld [vmem:[#allocation2 + $0x1a] sm:$0xff] }
  0x66   : > { %5489 = vmatmul.mubr.msk.f32.gmra.mxu1 %vm519_vm0, %v6399_v51  ;;  %5441 = vmatprep.mubr.msk.f32.mxu0 %vm519_vm0, %v6401_v52  ;;  %v1308_v52 = vld [vmem:[#allocation2 + $0xa] sm:$0xff] }
  0x67   : > { %5491 = vmatprep.mubr.msk.f32.mxu1 %vm519_vm0, %v6403_v53 }
  0x69   : > { %5442 = vmatmul.mubr.msk.f32.gmra.mxu0 %vm519_vm0, %v6413_v56  ;;  %v6432_v56 = vld [vmem:[%s7642_s2 + $0x30] sm:$0xff] }
  0x6a   : > { %5492 = vmatmul.mubr.msk.f32.gmra.mxu1 %vm519_vm0, %v6415_v8  ;;  %5496 = vmatprep.mubr.msk.f32.mxu0 %vm519_vm0, %v1307_v7  ;;  %v6437_v7 = vld [vmem:[%s7642_s2 + $0x38] sm:$0xff] }
  0x6b   : > { %5546 = vmatprep.mubr.msk.f32.mxu1 %vm519_vm0, %v6125_v34  ;;  %v6441_v34 = vld [vmem:[#allocation2 + $0x22] sm:$0xff] }
  0x6d   : > { %5497 = vmatmul.mubr.msk.f32.vlgmr.msra.gmra.mxu0 %vm519_vm0, %v1308_v52  ;;  %v6521_v52 = vld [vmem:[#allocation2 + $0xc2] sm:$0xff] }
  0x6e   : > { %5547 = vmatmul.mubr.msk.f32.vlgmr.msra.gmra.mxu1 %vm519_vm0, %v6138_v41  ;;  %5595 = vmatpush3.msra.mxu0 %v6043_v18  ;;  %v6447_v41 = vld [vmem:[#allocation2 + $0x32] sm:$0xff]  ;;  %v6459_v18 = vld [vmem:[#allocation2 + $0x3a] sm:$0xff] }
  0x6f   : > { %5645 = vmatpush3.msra.mxu1 %v6048_v19  ;;  %5499 = vmatprep.mubr.msk.f32.mxu0 %vm519_vm0, %v6424_v49  ;;  %v6461_v19 = vld [vmem:[#allocation2 + $0x4a] sm:$0xff] }
  0x70   : > { %5549 = vmatprep.mubr.msk.f32.mxu1 %vm519_vm0, %v6142_v43  ;;  %5694 = vmatprep.subr.mxu0 %v6432_v56  ;;  %v6471_v43 = vld [vmem:[#allocation2 + $0x52] sm:$0xff] }
  0x71   : > { %5744 = vmatprep.subr.mxu1 %v6437_v7  ;;  %5500 = vmatmul.mubr.msk.f32.gmra.mxu0 %vm519_vm0, %v6441_v34 }
  0x72   : > { %5550 = vmatmul.mubr.msk.f32.gmra.mxu1 %vm519_vm0, %v6165_v55  ;;  %5502 = vmatprep.mubr.msk.f32.mxu0 %vm519_vm0, %v6447_v41  ;;  %v6473_v55 = vld [vmem:[#allocation2 + $0x62] sm:$0xff] }
  0x73   : > { %5552 = vmatprep.mubr.msk.f32.mxu1 %vm519_vm0, %v6172_v62  ;;  %v6483_v62 = vld [vmem:[#allocation2 + $0x6a] sm:$0xff] }
  0x75   : > { %5503 = vmatmul.mubr.msk.f32.gmra.mxu0 %vm519_vm0, %v6459_v18 }
  0x76   : > { %5553 = vmatmul.mubr.msk.f32.gmra.mxu1 %vm519_vm0, %v6200_v21  ;;  %5505 = vmatprep.mubr.msk.f32.mxu0 %vm519_vm0, %v6461_v19  ;;  %v6485_v21 = vld [vmem:[#allocation2 + $0x7a] sm:$0xff] }
  0x77   : > { %5555 = vmatprep.mubr.msk.f32.mxu1 %vm519_vm0, %v6208_v28  ;;  %v6495_v28 = vld [vmem:[#allocation2 + $0x82] sm:$0xff] }
  0x79   : > { %5506 = vmatmul.mubr.msk.f32.gmra.mxu0 %vm519_vm0, %v6471_v43 }
  0x7a   : > { %5556 = vmatmul.mubr.msk.f32.gmra.mxu1 %vm519_vm0, %v6229_v48  ;;  %5508 = vmatprep.mubr.msk.f32.mxu0 %vm519_vm0, %v6473_v55  ;;  %v6497_v48 = vld [vmem:[#allocation2 + $0x92] sm:$0xff] }
  0x7b   : > { %5558 = vmatprep.mubr.msk.f32.mxu1 %vm519_vm0, %v6237_v11  ;;  %v6507_v11 = vld [vmem:[#allocation2 + $0x9a] sm:$0xff] }
  0x7d   : > { %5509 = vmatmul.mubr.msk.f32.gmra.mxu0 %vm519_vm0, %v6483_v62 }
  0x7e   : > { %5559 = vmatmul.mubr.msk.f32.gmra.mxu1 %vm519_vm0, %v6253_v58  ;;  %5511 = vmatprep.mubr.msk.f32.mxu0 %vm519_vm0, %v6485_v21  ;;  %v6509_v58 = vld [vmem:[#allocation2 + $0xaa] sm:$0xff] }
  0x7f   : > { %5561 = vmatprep.mubr.msk.f32.mxu1 %vm519_vm0, %v6258_v59  ;;  %v6519_v59 = vld [vmem:[#allocation2 + $0xb2] sm:$0xff] }
  0x81   : > { %5512 = vmatmul.mubr.msk.f32.gmra.mxu0 %vm519_vm0, %v6495_v28 }
  0x82   : > { %5562 = vmatmul.mubr.msk.f32.gmra.mxu1 %vm519_vm0, %v6271_v63  ;;  %5514 = vmatprep.mubr.msk.f32.mxu0 %vm519_vm0, %v6497_v48 }
  0x83   : > { %5564 = vmatprep.mubr.msk.f32.mxu1 %vm519_vm0, %v6275_v1  ;;  %v6533_v1 = vld [vmem:[#allocation2 + $0xda] sm:$0xff] }
  0x85   : > { %5515 = vmatmul.mubr.msk.f32.gmra.mxu0 %vm519_vm0, %v6507_v11 }
  0x86   : > { %5565 = vmatmul.mubr.msk.f32.gmra.mxu1 %vm519_vm0, %v6287_v3  ;;  %5517 = vmatprep.mubr.msk.f32.mxu0 %vm519_vm0, %v6509_v58  ;;  %v6531_v3 = vld [vmem:[#allocation2 + $0xca] sm:$0xff] }
  0x87   : > { %5567 = vmatprep.mubr.msk.f32.mxu1 %vm519_vm0, %v6291_v5  ;;  %v6545_v5 = vld [vmem:[#allocation2 + $0xf2] sm:$0xff] }
  0x89   : > { %5518 = vmatmul.mubr.msk.f32.gmra.mxu0 %vm519_vm0, %v6519_v59 }
  0x8a   : > { %5568 = vmatmul.mubr.msk.f32.gmra.mxu1 %vm519_vm0, %v6303_v10  ;;  %5520 = vmatprep.mubr.msk.f32.mxu0 %vm519_vm0, %v6521_v52  ;;  %v6543_v10 = vld [vmem:[#allocation2 + $0xe2] sm:$0xff] }
  0x8b   : > { %5570 = vmatprep.mubr.msk.f32.mxu1 %vm519_vm0, %v6307_v14  ;;  %v6557_v14 = vld [vmem:[#allocation2 + $0x10a] sm:$0xff] }
  0x8d   : > { %5521 = vmatmul.mubr.msk.f32.gmra.mxu0 %vm519_vm0, %v6531_v3 }
  0x8e   : > { %5571 = vmatmul.mubr.msk.f32.gmra.mxu1 %vm519_vm0, %v6319_v16  ;;  %5523 = vmatprep.mubr.msk.f32.mxu0 %vm519_vm0, %v6533_v1  ;;  %v6555_v16 = vld [vmem:[#allocation2 + $0xfa] sm:$0xff] }
  0x8f   : > { %5573 = vmatprep.mubr.msk.f32.mxu1 %vm519_vm0, %v6323_v22  ;;  %v6569_v22 = vld [vmem:[#allocation2 + $0x122] sm:$0xff] }
  0x91   : > { %5524 = vmatmul.mubr.msk.f32.gmra.mxu0 %vm519_vm0, %v6543_v10 }
  0x92   : > { %5574 = vmatmul.mubr.msk.f32.gmra.mxu1 %vm519_vm0, %v6335_v24  ;;  %5526 = vmatprep.mubr.msk.f32.mxu0 %vm519_vm0, %v6545_v5  ;;  %v6567_v24 = vld [vmem:[#allocation2 + $0x112] sm:$0xff] }
  0x93   : > { %5576 = vmatprep.mubr.msk.f32.mxu1 %vm519_vm0, %v6339_v26  ;;  %v6581_v26 = vld [vmem:[#allocation2 + $0x13a] sm:$0xff] }
  0x95   : > { %5527 = vmatmul.mubr.msk.f32.gmra.mxu0 %vm519_vm0, %v6555_v16 }
  0x96   : > { %5577 = vmatmul.mubr.msk.f32.gmra.mxu1 %vm519_vm0, %v6351_v30  ;;  %5529 = vmatprep.mubr.msk.f32.mxu0 %vm519_vm0, %v6557_v14  ;;  %v6579_v30 = vld [vmem:[#allocation2 + $0x12a] sm:$0xff] }
  0x97   : > { %5579 = vmatprep.mubr.msk.f32.mxu1 %vm519_vm0, %v6355_v32  ;;  %v6593_v32 = vld [vmem:[#allocation2 + $0x152] sm:$0xff] }
  0x99   : > { %5530 = vmatmul.mubr.msk.f32.gmra.mxu0 %vm519_vm0, %v6567_v24 }
  0x9a   : > { %5580 = vmatmul.mubr.msk.f32.gmra.mxu1 %vm519_vm0, %v6367_v37  ;;  %5532 = vmatprep.mubr.msk.f32.mxu0 %vm519_vm0, %v6569_v22  ;;  %v6591_v37 = vld [vmem:[#allocation2 + $0x142] sm:$0xff] }
  0x9b   : > { %5582 = vmatprep.mubr.msk.f32.mxu1 %vm519_vm0, %v6371_v39  ;;  %v6605_v39 = vld [vmem:[#allocation2 + $0x16a] sm:$0xff] }
  0x9d   : > { %5533 = vmatmul.mubr.msk.f32.gmra.mxu0 %vm519_vm0, %v6579_v30 }
  0x9e   : > { %5583 = vmatmul.mubr.msk.f32.gmra.mxu1 %vm519_vm0, %v6383_v44  ;;  %5535 = vmatprep.mubr.msk.f32.mxu0 %vm519_vm0, %v6581_v26  ;;  %v6603_v44 = vld [vmem:[#allocation2 + $0x15a] sm:$0xff] }
  0x9f   : > { %5585 = vmatprep.mubr.msk.f32.mxu1 %vm519_vm0, %v6387_v46  ;;  %v6607_v46 = vld [vmem:[#allocation2 + $0x180] sm:$0xff] }
  0xa0   : > { %7695 = vst [vmem:[#allocation25_spill] sm:$0xff] %v6607_v46 }
  0xa1   : > { %5536 = vmatmul.mubr.msk.f32.gmra.mxu0 %vm519_vm0, %v6591_v37 }
  0xa2   : > { %5586 = vmatmul.mubr.msk.f32.gmra.mxu1 %vm519_vm0, %v6399_v51  ;;  %5538 = vmatprep.mubr.msk.f32.mxu0 %vm519_vm0, %v6593_v32  ;;  %v6617_v51 = vld [vmem:[#allocation2 + $0x172] sm:$0xff] }
  0xa3   : > { %5588 = vmatprep.mubr.msk.f32.mxu1 %vm519_vm0, %v6403_v53  ;;  %v6619_v53 = vld [vmem:[#allocation2 + $0x188] sm:$0xff] }
  0xa4   : > { %7696 = vst [vmem:[#allocation26_spill] sm:$0xff] %v6619_v53 }
  0xa5   : > { %5539 = vmatmul.mubr.msk.f32.gmra.mxu0 %vm519_vm0, %v6603_v44 }
  0xa6   : > { %5589 = vmatmul.mubr.msk.f32.gmra.mxu1 %vm519_vm0, %v6415_v8  ;;  %5541 = vmatprep.mubr.msk.f32.mxu0 %vm519_vm0, %v6605_v39 }
  0xa7   : > { %5591 = vmatprep.mubr.msk.f32.mxu1 %vm519_vm0, %v6607_v46  ;;  %v6636_v46 = vld [vmem:[%s7642_s2 + $0x40] sm:$0xff] }
  0xa9   : > { %5542 = vmatmul.mubr.msk.f32.gmra.mxu0 %vm519_vm0, %v6617_v51 }
  0xaa   : > { %5592 = vmatmul.mubr.msk.f32.gmra.mxu1 %vm519_vm0, %v6619_v53  ;;  %5596 = vmatprep.mubr.msk.f32.mxu0 %vm519_vm0, %v6123_v33  ;;  %v6641_v53 = vld [vmem:[%s7643_s3] sm:$0xff]  ;;  %v312_v33 = vsub.s32 1, %v6010_v6  ;;  %v301_v6 = vld [vmem:[%s6029_s10 + $0x1f8] sm:$0xff] }
  0xab   : > { %5646 = vmatprep.mubr.msk.f32.mxu1 %vm519_vm0, %v6424_v49  ;;  %v3246_v49 = vld [vmem:[#allocation2 + $0x51] sm:$0xff] }
  0xad   : > { %5597 = vmatmul.mubr.msk.f32.vlgmr.msra.gmra.mxu0 %vm519_vm0, %v6127_v35  ;;  %v7697_v35 = vld [vmem:[#allocation20_spill] sm:$0xff] }
  0xae   : > { %5647 = vmatmul.mubr.msk.f32.vlgmr.msra.gmra.mxu1 %vm519_vm0, %v6441_v34  ;;  %5695 = vmatpush3.msra.mxu0 %v6432_v56  ;;  %v3247_v56 = vld [vmem:[#allocation2 + $0x61] sm:$0xff] }
  0xaf   : > { %5745 = vmatpush3.msra.mxu1 %v6437_v7  ;;  %5599 = vmatprep.mubr.msk.f32.mxu0 %vm519_vm0, %v6140_v42  ;;  %v7698_v42 = vld [vmem:[#allocation3_spill] sm:$0xff] }
  0xb0   : > { %5649 = vmatprep.mubr.msk.f32.mxu1 %vm519_vm0, %v6447_v41  ;;  %5794 = vmatprep.subr.mxu0 %v6636_v46 }
  0xb1   : > { %5844 = vmatprep.subr.mxu1 %v6641_v53  ;;  %5600 = vmatmul.mubr.msk.f32.gmra.mxu0 %vm519_vm0, %v6163_v54  ;;  %v6753_v54 = vrot.slane %v7698_v42, %v312_v33  ;;  %v3250_v42 = vld [vmem:[#allocation2 + $0x81] sm:$0xff] }
  0xb2   : > { %5650 = vmatmul.mubr.msk.f32.gmra.mxu1 %vm519_vm0, %v6459_v18  ;;  %5602 = vmatprep.mubr.msk.f32.mxu0 %vm519_vm0, %v6170_v61  ;;  %v7699_v61 = vld [vmem:[#allocation22_spill] sm:$0xff] }
  0xb3   : > { %5652 = vmatprep.mubr.msk.f32.mxu1 %vm519_vm0, %v6461_v19 }
  0xb5   : > { %5603 = vmatmul.mubr.msk.f32.gmra.mxu0 %vm519_vm0, %v6198_v20  ;;  %v6760_v20 = vld [vmem:[#allocation2 + $0x181] sm:$0xff] }
  0xb6   : > { %5653 = vmatmul.mubr.msk.f32.gmra.mxu1 %vm519_vm0, %v6471_v43  ;;  %5605 = vmatprep.mubr.msk.f32.mxu0 %vm519_vm0, %v6206_v27  ;;  %v2498_v27 = vld [vmem:[#allocation2 + $0x182] sm:$0xff] }
  0xb7   : > { %5655 = vmatprep.mubr.msk.f32.mxu1 %vm519_vm0, %v6473_v55 }
  0xb9   : > { %5606 = vmatmul.mubr.msk.f32.gmra.mxu0 %vm519_vm0, %v6227_v47 }
  0xba   : > { %5656 = vmatmul.mubr.msk.f32.gmra.mxu1 %vm519_vm0, %v6483_v62  ;;  %5608 = vmatprep.mubr.msk.f32.mxu0 %vm519_vm0, %v6235_v50  ;;  %v7700_v50 = vld [vmem:[#allocation4_spill] sm:$0xff] }
  0xbb   : > { %5658 = vmatprep.mubr.msk.f32.mxu1 %vm519_vm0, %v6485_v21 }
  0xbd   : > { %5609 = vmatmul.mubr.msk.f32.gmra.mxu0 %vm519_vm0, %v6251_v57  ;;  %v6763_v57 = vrot.slane %v7700_v50, %v312_v33  ;;  %v2863_v33 = vld [vmem:[#allocation2 + $0x80] sm:$0xff]  ;;  %v3251_v50 = vld [vmem:[#allocation2 + $0x91] sm:$0xff] }
  0xbe   : > { %5659 = vmatmul.mubr.msk.f32.gmra.mxu1 %vm519_vm0, %v6495_v28  ;;  %5611 = vmatprep.mubr.msk.f32.mxu0 %vm519_vm0, %v6256_v12  ;;  %v379_v12 = vmul.f32 %v6753_v54, %v301_v6  ;;  %v2862_v28 = vld [vmem:[#allocation2 + $0x78] sm:$0xff] }
  0xbf   : > { %5661 = vmatprep.mubr.msk.f32.mxu1 %vm519_vm0, %v6497_v48  ;;  %v3249_v48 = vld [vmem:[#allocation2 + $0x79] sm:$0xff] }
  0xc1   : > { %5612 = vmatmul.mubr.msk.f32.gmra.mxu0 %vm519_vm0, %v6269_v60 }
  0xc2   : > { %5662 = vmatmul.mubr.msk.f32.gmra.mxu1 %vm519_vm0, %v6507_v11  ;;  %5614 = vmatprep.mubr.msk.f32.mxu0 %vm519_vm0, %v6273_v0  ;;  %v7701_v0 = vld [vmem:[#allocation24_spill] sm:$0xff] }
  0xc3   : > { %5664 = vmatprep.mubr.msk.f32.mxu1 %vm519_vm0, %v6509_v58 }
  0xc5   : > { %5615 = vmatmul.mubr.msk.f32.gmra.mxu0 %vm519_vm0, %v6285_v2 }
  0xc6   : > { %5665 = vmatmul.mubr.msk.f32.gmra.mxu1 %vm519_vm0, %v6519_v59  ;;  %5617 = vmatprep.mubr.msk.f32.mxu0 %vm519_vm0, %v6289_v4 }
  0xc7   : > { %5667 = vmatprep.mubr.msk.f32.mxu1 %vm519_vm0, %v6521_v52 }
  0xc9   : > { %5618 = vmatmul.mubr.msk.f32.gmra.mxu0 %vm519_vm0, %v6301_v9 }
  0xca   : > { %5668 = vmatmul.mubr.msk.f32.gmra.mxu1 %vm519_vm0, %v6531_v3  ;;  %5620 = vmatprep.mubr.msk.f32.mxu0 %vm519_vm0, %v6305_v13 }
  0xcb   : > { %5670 = vmatprep.mubr.msk.f32.mxu1 %vm519_vm0, %v6533_v1 }
  0xcd   : > { %5621 = vmatmul.mubr.msk.f32.gmra.mxu0 %vm519_vm0, %v6317_v15 }
  0xce   : > { %5671 = vmatmul.mubr.msk.f32.gmra.mxu1 %vm519_vm0, %v6543_v10  ;;  %5623 = vmatprep.mubr.msk.f32.mxu0 %vm519_vm0, %v6321_v17  ;;  %v6778_v10 = vld [vmem:[#allocation2 + $0x189] sm:$0xff] }
  0xcf   : > { %5673 = vmatprep.mubr.msk.f32.mxu1 %vm519_vm0, %v6545_v5  ;;  %v6773_v5 = vadd.f32 %v6763_v57, %v379_v12 }
  0xd1   : > { %5624 = vmatmul.mubr.msk.f32.gmra.mxu0 %vm519_vm0, %v6333_v23 }
  0xd2   : > { %5674 = vmatmul.mubr.msk.f32.gmra.mxu1 %vm519_vm0, %v6555_v16  ;;  %5626 = vmatprep.mubr.msk.f32.mxu0 %vm519_vm0, %v6337_v25 }
  0xd3   : > { %5676 = vmatprep.mubr.msk.f32.mxu1 %vm519_vm0, %v6557_v14  ;;  %v2499_v14 = vld [vmem:[#allocation2 + $0x18a] sm:$0xff] }
  0xd5   : > { %5627 = vmatmul.mubr.msk.f32.gmra.mxu0 %vm519_vm0, %v6349_v29 }
  0xd6   : > { %5677 = vmatmul.mubr.msk.f32.gmra.mxu1 %vm519_vm0, %v6567_v24  ;;  %5629 = vmatprep.mubr.msk.f32.mxu0 %vm519_vm0, %v6353_v31  ;;  %v3243_v24 = vld [vmem:[#allocation2 + $0x31] sm:$0xff] }
  0xd7   : > { %5679 = vmatprep.mubr.msk.f32.mxu1 %vm519_vm0, %v6569_v22  ;;  %v2856_v22 = vld [vmem:[#allocation2 + $0x30] sm:$0xff] }
  0xd9   : > { %5630 = vmatmul.mubr.msk.f32.gmra.mxu0 %vm519_vm0, %v6365_v36 }
  0xda   : > { %5680 = vmatmul.mubr.msk.f32.gmra.mxu1 %vm519_vm0, %v6579_v30  ;;  %5632 = vmatprep.mubr.msk.f32.mxu0 %vm519_vm0, %v6369_v38  ;;  %v2857_v30 = vld [vmem:[#allocation2 + $0x38] sm:$0xff] }
  0xdb   : > { %5682 = vmatprep.mubr.msk.f32.mxu1 %vm519_vm0, %v6581_v26 }
  0xdd   : > { %5633 = vmatmul.mubr.msk.f32.gmra.mxu0 %vm519_vm0, %v6381_v40 }
  0xde   : > { %5683 = vmatmul.mubr.msk.f32.gmra.mxu1 %vm519_vm0, %v6591_v37  ;;  %5635 = vmatprep.mubr.msk.f32.mxu0 %vm519_vm0, %v6385_v45  ;;  %v2858_v37 = vld [vmem:[#allocation2 + $0x48] sm:$0xff] }
  0xdf   : > { %5685 = vmatprep.mubr.msk.f32.mxu1 %vm519_vm0, %v6593_v32  ;;  %v3244_v32 = vld [vmem:[#allocation2 + $0x39] sm:$0xff] }
  0xe1   : > { %5636 = vmatmul.mubr.msk.f32.gmra.mxu0 %vm519_vm0, %v7697_v35 }
  0xe2   : > { %5686 = vmatmul.mubr.msk.f32.gmra.mxu1 %vm519_vm0, %v6603_v44  ;;  %5638 = vmatprep.mubr.msk.f32.mxu0 %vm519_vm0, %v7699_v61  ;;  %v2859_v44 = vld [vmem:[#allocation2 + $0x50] sm:$0xff] }
  0xe3   : > { %5688 = vmatprep.mubr.msk.f32.mxu1 %vm519_vm0, %v6605_v39  ;;  %v3245_v39 = vld [vmem:[#allocation2 + $0x49] sm:$0xff] }
  0xe5   : > { %5639 = vmatmul.mubr.msk.f32.gmra.mxu0 %vm519_vm0, %v7701_v0 }
  0xe6   : > { %v5398_v47 = vpop.f32.mrf.mxu0  ;;  %5689 = vmatmul.mubr.msk.f32.gmra.mxu1 %vm519_vm0, %v6617_v51  ;;  %5641 = vmatprep.mubr.msk.f32.mxu0 %vm519_vm0, %v6760_v20  ;;  %v2860_v51 = vld [vmem:[#allocation2 + $0x60] sm:$0xff] }
  0xe7   : > { %5691 = vmatprep.mubr.msk.f32.mxu1 %vm519_vm0, %v2498_v27 }
  0xe8   : > { %v5448_v60 = vpop.f32.mrf.mxu1  ;;  %v827_v3 = vpop.f32.mrf.mxu0 }
  0xe9   : > { %v6770_v1 = vadd.f32 %v5448_v60, %v5398_v47  ;;  %5642 = vmatmul.mubr.msk.f32.gmra.mxu0 %vm519_vm0, %v6778_v10  ;;  %v2864_v47 = vld [vmem:[#allocation2 + $0x90] sm:$0xff] }
  0xea   : > { %v1148_v16 = vpop.f32.mrf.mxu1  ;;  %5692 = vmatmul.mubr.msk.f32.gmra.mxu1 %vm519_vm0, %v2499_v14  ;;  %5696 = vmatprep.mubr.msk.f32.mxu0 %vm519_vm0, %v2856_v22 }
  0xeb   : > { %v6780_v26 = vadd.f32 %v1148_v16, %v827_v3  ;;  %5746 = vmatprep.mubr.msk.f32.mxu1 %vm519_vm0, %v3243_v24  ;;  %v3252_v16 = vld [vmem:[#allocation2 + $0x99] sm:$0xff] }
  0xed   : > { %5697 = vmatmul.mubr.msk.f32.vlgmr.msra.gmra.mxu0 %vm519_vm0, %v2857_v30  ;;  %v3253_v30 = vld [vmem:[#allocation2 + $0xa9] sm:$0xff] }
  0xee   : > { %5747 = vmatmul.mubr.msk.f32.vlgmr.msra.gmra.mxu1 %vm519_vm0, %v3244_v32  ;;  %5795 = vmatpush3.msra.mxu0 %v6636_v46  ;;  %v2861_v46 = vld [vmem:[#allocation2 + $0x68] sm:$0xff] }
  0xef   : > { %5845 = vmatpush3.msra.mxu1 %v6641_v53  ;;  %5699 = vmatprep.mubr.msk.f32.mxu0 %vm519_vm0, %v2858_v37  ;;  %v3248_v53 = vld [vmem:[#allocation2 + $0x69] sm:$0xff] }
  0xf0   : > { %5749 = vmatprep.mubr.msk.f32.mxu1 %vm519_vm0, %v3245_v39 }
  0xf1   : > { %v5401_v7 = vpop.f32.mrf.mxu0  ;;  %5700 = vmatmul.mubr.msk.f32.gmra.mxu0 %vm519_vm0, %v2859_v44 }
  0xf2   : > { %v5451_v34 = vpop.f32.mrf.mxu1  ;;  %5750 = vmatmul.mubr.msk.f32.gmra.mxu1 %vm519_vm0, %v3246_v49  ;;  %5702 = vmatprep.mubr.msk.f32.mxu0 %vm519_vm0, %v2860_v51  ;;  %v7702_v49 = vld [vmem:[#allocation5_spill] sm:$0xff] }
  0xf3   : > { %v6795_v55 = vadd.f32 %v5451_v34, %v5401_v7  ;;  %5752 = vmatprep.mubr.msk.f32.mxu1 %vm519_vm0, %v3247_v56  ;;  %v837_v62 = vpop.f32.mrf.mxu0 }
  0xf4   : > { %v1158_v21 = vpop.f32.mrf.mxu1 }
  0xf5   : > { %v6799_v11 = vadd.f32 %v1158_v21, %v837_v62  ;;  %v5404_v58 = vpop.f32.mrf.mxu0  ;;  %5703 = vmatmul.mubr.msk.f32.gmra.mxu0 %vm519_vm0, %v2861_v46  ;;  %v7704_v62 = vld [vmem:[#allocation7_spill] sm:$0xff] }
  0xf6   : > { %v5454_v59 = vpop.f32.mrf.mxu1  ;;  %5753 = vmatmul.mubr.msk.f32.gmra.mxu1 %vm519_vm0, %v3248_v53  ;;  %5705 = vmatprep.mubr.msk.f32.mxu0 %vm519_vm0, %v2862_v28  ;;  %v7703_v53 = vld [vmem:[#allocation6_spill] sm:$0xff] }
  0xf7   : > { %v6803_v52 = vadd.f32 %v5454_v59, %v5404_v58  ;;  %5755 = vmatprep.mubr.msk.f32.mxu1 %vm519_vm0, %v3249_v48  ;;  %v847_v6 = vpop.f32.mrf.mxu0 }
  0xf8   : > { %v1168_v27 = vpop.f32.mrf.mxu1 }
  0xf9   : > { %v6807_v12 = vadd.f32 %v1168_v27, %v847_v6  ;;  %v5407_v60 = vpop.f32.mrf.mxu0  ;;  %5706 = vmatmul.mubr.msk.f32.gmra.mxu0 %vm519_vm0, %v2863_v33  ;;  %v7705_v33 = vld [vmem:[#allocation8_spill] sm:$0xff] }
  0xfa   : > { %v5457_v3 = vpop.f32.mrf.mxu1  ;;  %5756 = vmatmul.mubr.msk.f32.gmra.mxu1 %vm519_vm0, %v3250_v42  ;;  %5708 = vmatprep.mubr.msk.f32.mxu0 %vm519_vm0, %v2864_v47  ;;  %v7706_v42 = vld [vmem:[#allocation9_spill] sm:$0xff] }
  0xfb   : > { %v6811_v14 = vadd.f32 %v5457_v3, %v5407_v60  ;;  %5758 = vmatprep.mubr.msk.f32.mxu1 %vm519_vm0, %v3251_v50  ;;  %v857_v22 = vpop.f32.mrf.mxu0  ;;  %v7707_v60 = vld [vmem:[#allocation10_spill] sm:$0xff]  ;;  %v7708_v3 = vld [vmem:[#allocation11_spill] sm:$0xff] }
  0xfc   : > { %v1178_v24 = vpop.f32.mrf.mxu1 }
  0xfd   : > { %v6815_v32 = vadd.f32 %v1178_v24, %v857_v22  ;;  %v5410_v37 = vpop.f32.mrf.mxu0  ;;  %5709 = vmatmul.mubr.msk.f32.gmra.mxu0 %vm519_vm0, %v6271_v63 }
  0xfe   : > { %v5460_v39 = vpop.f32.mrf.mxu1  ;;  %5759 = vmatmul.mubr.msk.f32.gmra.mxu1 %vm519_vm0, %v3252_v16  ;;  %5711 = vmatprep.mubr.msk.f32.mxu0 %vm519_vm0, %v7702_v49 }
  0xff   : > { %v6820_v44 = vadd.f32 %v5460_v39, %v5410_v37  ;;  %5761 = vmatprep.mubr.msk.f32.mxu1 %vm519_vm0, %v3253_v30  ;;  %v867_v51 = vpop.f32.mrf.mxu0  ;;  %v7709_v37 = vld [vmem:[#allocation12_spill] sm:$0xff]  ;;  %v7710_v39 = vld [vmem:[#allocation13_spill] sm:$0xff] }
 0x100   : > { %v1188_v56 = vpop.f32.mrf.mxu1 }
 0x101   : > { %v6825_v7 = vadd.f32 %v1188_v56, %v867_v51  ;;  %v5413_v34 = vpop.f32.mrf.mxu0  ;;  %5712 = vmatmul.mubr.msk.f32.gmra.mxu0 %vm519_vm0, %v7703_v53  ;;  %v7712_v53 = vld [vmem:[#allocation15_spill] sm:$0xff] }
 0x102   : > { %v5463_v46 = vpop.f32.mrf.mxu1  ;;  %5762 = vmatmul.mubr.msk.f32.gmra.mxu1 %vm519_vm0, %v6285_v2  ;;  %5714 = vmatprep.mubr.msk.f32.mxu0 %vm519_vm0, %v7704_v62 }
 0x103   : > { %v6831_v63 = vadd.f32 %v5463_v46, %v5413_v34  ;;  %5764 = vmatprep.mubr.msk.f32.mxu1 %vm519_vm0, %v6289_v4  ;;  %v877_v21 = vpop.f32.mrf.mxu0  ;;  %v7711_v46 = vld [vmem:[#allocation14_spill] sm:$0xff] }
 0x104   : > { %v1198_v28 = vpop.f32.mrf.mxu1 }
 0x105   : > { %v6837_v48 = vadd.f32 %v1198_v28, %v877_v21  ;;  %v5416_v58 = vpop.f32.mrf.mxu0  ;;  %5715 = vmatmul.mubr.msk.f32.gmra.mxu0 %vm519_vm0, %v7705_v33  ;;  %v7714_v33 = vld [vmem:[#allocation17_spill] sm:$0xff] }
 0x106   : > { %v5466_v59 = vpop.f32.mrf.mxu1  ;;  %5765 = vmatmul.mubr.msk.f32.gmra.mxu1 %vm519_vm0, %v6301_v9  ;;  %5717 = vmatprep.mubr.msk.f32.mxu0 %vm519_vm0, %v7706_v42 }
 0x107   : > { %v6843_v2 = vadd.f32 %v5466_v59, %v5416_v58  ;;  %5767 = vmatprep.mubr.msk.f32.mxu1 %vm519_vm0, %v6305_v13  ;;  %v887_v4 = vpop.f32.mrf.mxu0  ;;  %v7713_v59 = vld [vmem:[#allocation16_spill] sm:$0xff] }
 0x108   : > { %v1208_v6 = vpop.f32.mrf.mxu1 }
 0x109   : > { %v6849_v27 = vadd.f32 %v1208_v6, %v887_v4  ;;  %v5419_v47 = vpop.f32.mrf.mxu0  ;;  %5718 = vmatmul.mubr.msk.f32.gmra.mxu0 %vm519_vm0, %v7707_v60  ;;  %v7716_v60 = vld [vmem:[#allocation19_spill] sm:$0xff] }
 0x10a   : > { %v5469_v50 = vpop.f32.mrf.mxu1  ;;  %5768 = vmatmul.mubr.msk.f32.gmra.mxu1 %vm519_vm0, %v6317_v15  ;;  %5720 = vmatprep.mubr.msk.f32.mxu0 %vm519_vm0, %v7708_v3 }
 0x10b   : > { %v6855_v9 = vadd.f32 %v5469_v50, %v5419_v47  ;;  %5770 = vmatprep.mubr.msk.f32.mxu1 %vm519_vm0, %v6321_v17  ;;  %v897_v13 = vpop.f32.mrf.mxu0  ;;  %v7715_v50 = vld [vmem:[#allocation18_spill] sm:$0xff] }
 0x10c   : > { %v1218_v16 = vpop.f32.mrf.mxu1 }
 0x10d   : > { %v6861_v22 = vadd.f32 %v1218_v16, %v897_v13  ;;  %v5422_v24 = vpop.f32.mrf.mxu0  ;;  %5721 = vmatmul.mubr.msk.f32.gmra.mxu0 %vm519_vm0, %v7709_v37  ;;  %v239_v13 = vld [vmem:[%s6029_s10 + $0x8] sm:$0xff]  ;;  %v7717_v37 = vld [vmem:[#allocation21_spill] sm:$0xff] }
 0x10e   : > { %v5472_v30 = vpop.f32.mrf.mxu1  ;;  %5771 = vmatmul.mubr.msk.f32.gmra.mxu1 %vm519_vm0, %v6333_v23  ;;  %5723 = vmatprep.mubr.msk.f32.mxu0 %vm519_vm0, %v7710_v39  ;;  %v7718_v39 = vld [vmem:[#allocation23_spill] sm:$0xff] }
 0x10f   : > { %v6867_v15 = vadd.f32 %v5472_v30, %v5422_v24  ;;  %5773 = vmatprep.mubr.msk.f32.mxu1 %vm519_vm0, %v6337_v25  ;;  %v907_v17 = vpop.f32.mrf.mxu0 }
 0x110   : > { %v1228_v49 = vpop.f32.mrf.mxu1 }
 0x111   : > { %v6873_v51 = vadd.f32 %v1228_v49, %v907_v17  ;;  %v5425_v56 = vpop.f32.mrf.mxu0  ;;  %5724 = vmatmul.mubr.msk.f32.gmra.mxu0 %vm519_vm0, %v7711_v46  ;;  %v241_v17 = vld [vmem:[%s6029_s10 + $0x18] sm:$0xff] }
 0x112   : > { %v5475_v34 = vpop.f32.mrf.mxu1  ;;  %5774 = vmatmul.mubr.msk.f32.gmra.mxu1 %vm519_vm0, %v6349_v29  ;;  %5726 = vmatprep.mubr.msk.f32.mxu0 %vm519_vm0, %v7712_v53 }
 0x113   : > { %v6879_v23 = vadd.f32 %v5475_v34, %v5425_v56  ;;  %5776 = vmatprep.mubr.msk.f32.mxu1 %vm519_vm0, %v6353_v31  ;;  %v917_v25 = vpop.f32.mrf.mxu0  ;;  %v243_v34 = vld [vmem:[%s6029_s10 + $0x28] sm:$0xff] }
 0x114   : > { %v1238_v62 = vpop.f32.mrf.mxu1 }
 0x115   : > { %v6885_v21 = vadd.f32 %v1238_v62, %v917_v25  ;;  %v5428_v28 = vpop.f32.mrf.mxu0  ;;  %5727 = vmatmul.mubr.msk.f32.gmra.mxu0 %vm519_vm0, %v7713_v59  ;;  %v7719_v62 = vld [vmem:[#allocation25_spill] sm:$0xff]  ;;  %v245_v59 = vld [vmem:[%s6029_s10 + $0x38] sm:$0xff] }
 0x116   : > { %v5478_v58 = vpop.f32.mrf.mxu1  ;;  %5777 = vmatmul.mubr.msk.f32.gmra.mxu1 %vm519_vm0, %v6365_v36  ;;  %5729 = vmatprep.mubr.msk.f32.mxu0 %vm519_vm0, %v7714_v33 }
 0x117   : > { %v6891_v29 = vadd.f32 %v5478_v58, %v5428_v28  ;;  %5779 = vmatprep.mubr.msk.f32.mxu1 %vm519_vm0, %v6369_v38  ;;  %v927_v31 = vpop.f32.mrf.mxu0  ;;  %v321_v58 = vmul.f32 %v6753_v54, %v243_v34 }
 0x118   : > { %v1248_v42 = vpop.f32.mrf.mxu1 }
 0x119   : > { %v6897_v4 = vadd.f32 %v1248_v42, %v927_v31  ;;  %v5431_v6 = vpop.f32.mrf.mxu0  ;;  %5730 = vmatmul.mubr.msk.f32.gmra.mxu0 %vm519_vm0, %v7715_v50  ;;  %v2886_v31 = vld [vmem:[#allocation2 + $0x198] sm:$0xff] }
 0x11a   : > { %v5481_v47 = vpop.f32.mrf.mxu1  ;;  %5780 = vmatmul.mubr.msk.f32.gmra.mxu1 %vm519_vm0, %v6381_v40  ;;  %5732 = vmatprep.mubr.msk.f32.mxu0 %vm519_vm0, %v7716_v60  ;;  %v3273_v42 = vld [vmem:[#allocation2 + $0x199] sm:$0xff]  ;;  %v7720_v60 = vld [vmem:[#allocation26_spill] sm:$0xff] }
 0x11b   : > { %v6903_v36 = vadd.f32 %v5481_v47, %v5431_v6  ;;  %5782 = vmatprep.mubr.msk.f32.mxu1 %vm519_vm0, %v6385_v45  ;;  %v937_v38 = vpop.f32.mrf.mxu0  ;;  %v317_v45 = vmul.f32 %v6753_v54, %v239_v13  ;;  %v2887_v13 = vld [vmem:[#allocation2 + $0x1a0] sm:$0xff] }
 0x11c   : > { %v1258_v3 = vpop.f32.mrf.mxu1 }
 0x11d   : > { %v6910_v16 = vadd.f32 %v1258_v3, %v937_v38  ;;  %v5434_v24 = vpop.f32.mrf.mxu0  ;;  %5733 = vmatmul.mubr.msk.f32.gmra.mxu0 %vm519_vm0, %v7717_v37  ;;  %v392_v28 = vadd.f32 %v6763_v57, %v317_v45  ;;  %v323_v38 = vmul.f32 %v6753_v54, %v245_v59  ;;  %v396_v37 = vadd.f32 %v6763_v57, %v321_v58  ;;  %v249_v45 = vld [vmem:[%s6029_s10 + $0x58] sm:$0xff] }
 0x11e   : > { %v5484_v30 = vpop.f32.mrf.mxu1  ;;  %5783 = vmatmul.mubr.msk.f32.gmra.mxu1 %vm519_vm0, %v7697_v35  ;;  %5735 = vmatprep.mubr.msk.f32.mxu0 %vm519_vm0, %v7718_v39 }
 0x11f   : > { %v6916_v40 = vadd.f32 %v5484_v30, %v5434_v24  ;;  %5785 = vmatprep.mubr.msk.f32.mxu1 %vm519_vm0, %v7699_v61  ;;  %v947_v49 = vpop.f32.mrf.mxu0  ;;  %v319_v61 = vmul.f32 %v6753_v54, %v241_v17  ;;  %v3274_v24 = vld [vmem:[#allocation2 + $0x1a1] sm:$0xff]  ;;  %v456_v30 = vmax.f32 %v392_v28, 0.0  ;;  %v460_v58 = vmax.f32 %v396_v37, 0.0 }
 0x120   : > { %v1268_v56 = vpop.f32.mrf.mxu1 }
 0x121   : > { %v6925_v46 = vadd.f32 %v1268_v56, %v947_v49  ;;  %v5437_v53 = vpop.f32.mrf.mxu0  ;;  %5736 = vmatmul.mubr.msk.f32.gmra.mxu0 %vm519_vm0, %v6415_v8  ;;  %v251_v49 = vld [vmem:[%s6029_s10 + $0x68] sm:$0xff] }
 0x122   : > { %v5487_v35 = vpop.f32.mrf.mxu1  ;;  %5786 = vmatmul.mubr.msk.f32.gmra.mxu1 %vm519_vm0, %v7701_v0  ;;  %5738 = vmatprep.mubr.msk.f32.mxu0 %vm519_vm0, %v7719_v62  ;;  %v247_v0 = vld [vmem:[%s6029_s10 + $0x48] sm:$0xff]  ;;  %v327_v62 = vmul.f32 %v6753_v54, %v249_v45 }
 0x123   : > { %v6932_v25 = vadd.f32 %v5487_v35, %v5437_v53  ;;  %5788 = vmatprep.mubr.msk.f32.mxu1 %vm519_vm0, %v6760_v20  ;;  %v957_v33 = vpop.f32.mrf.mxu0  ;;  %v394_v20 = vadd.f32 %v6763_v57, %v319_v61  ;;  %v325_v39 = vmul.f32 %v6753_v54, %v247_v0  ;;  %v398_v61 = vadd.f32 %v6763_v57, %v323_v38 }
 0x124   : > { %v1278_v8 = vpop.f32.mrf.mxu1 }
 0x125   : > { %v6942_v6 = vadd.f32 %v1278_v8, %v957_v33  ;;  %v5440_v47 = vpop.f32.mrf.mxu0  ;;  %5739 = vmatmul.mubr.msk.f32.gmra.mxu0 %vm519_vm0, %v7720_v60  ;;  %v458_v35 = vmax.f32 %v394_v20, 0.0  ;;  %v400_v59 = vadd.f32 %v6763_v57, %v325_v39  ;;  %v329_v33 = vmul.f32 %v6753_v54, %v251_v49  ;;  %v253_v8 = vld [vmem:[%s6029_s10 + $0x78] sm:$0xff] }
 0x126   : > { %v5490_v50 = vpop.f32.mrf.mxu1  ;;  %5789 = vmatmul.mubr.msk.f32.gmra.mxu1 %vm519_vm0, %v6778_v10  ;;  %5741 = vmatprep.mubr.msk.f32.mxu0 %vm519_vm0, %v2886_v31  ;;  %v255_v31 = vld [vmem:[%s6029_s10 + $0x88] sm:$0xff]  ;;  %v402_v20 = vadd.f32 %v6763_v57, %v327_v62  ;;  %v331_v38 = vmul.f32 %v6753_v54, %v253_v8  ;;  %v261_v8 = vld [vmem:[%s6029_s10 + $0xb8] sm:$0xff] }
 0x127   : > { %v6950_v3 = vadd.f32 %v5490_v50, %v5440_v47  ;;  %5791 = vmatprep.mubr.msk.f32.mxu1 %vm519_vm0, %v3273_v42  ;;  %v967_v17 = vpop.f32.mrf.mxu0  ;;  %v404_v37 = vadd.f32 %v6763_v57, %v329_v33 }
 0x128   : > { %v1288_v10 = vpop.f32.mrf.mxu1 }
 0x129   : > { %v6958_v56 = vadd.f32 %v1288_v10, %v967_v17  ;;  %v5443_v34 = vpop.f32.mrf.mxu0  ;;  %5742 = vmatmul.mubr.msk.f32.gmra.mxu0 %vm519_vm0, %v2887_v13  ;;  %v333_v13 = vmul.f32 %v6753_v54, %v255_v31  ;;  %v3634_v17 = vld [vmem:[#allocation2 + $0x62] sm:$0xff]  ;;  %v468_v33 = vmax.f32 %v404_v37, 0.0 }
 0x12a   : > { %v5493_v53 = vpop.f32.mrf.mxu1  ;;  %5792 = vmatmul.mubr.msk.f32.gmra.mxu1 %vm519_vm0, %v3274_v24  ;;  %5796 = vmatprep.mubr.msk.f32.mxu0 %vm519_vm0, %v6447_v41  ;;  %v462_v41 = vmax.f32 %v398_v61, 0.0  ;;  %v259_v10 = vld [vmem:[%s6029_s10 + $0xa8] sm:$0xff] }
 0x12b   : > { %v6964_v28 = vadd.f32 %v5493_v53, %v5443_v34  ;;  %5846 = vmatprep.mubr.msk.f32.mxu1 %vm519_vm0, %v456_v30  ;;  %v977_v42 = vpop.f32.mrf.mxu0  ;;  %v464_v30 = vmax.f32 %v400_v59, 0.0  ;;  %v408_v61 = vadd.f32 %v6763_v57, %v333_v13  ;;  %v3635_v59 = vld [vmem:[#allocation2 + $0x6a] sm:$0xff] }
 0x12c   : > { %v1298_v0 = vpop.f32.mrf.mxu1  ;;  %v263_v31 = vld [vmem:[%s6029_s10 + $0xc8] sm:$0xff] }
 0x12d   : > { %v6973_v47 = vadd.f32 %v1298_v0, %v977_v42  ;;  %v5498_v50 = vpop.f32.mrf.mxu0  ;;  %5797 = vmatmul.mubr.msk.f32.vlgmr.msra.gmra.mxu0 %vm519_vm0, %v6459_v18  ;;  %v257_v18 = vld [vmem:[%s6029_s10 + $0x98] sm:$0xff] }
 0x12e   : > { %v5548_v60 = vpop.f32.mrf.mxu1  ;;  %5847 = vmatmul.mubr.msk.f32.vlgmr.msra.gmra.mxu1 %vm519_vm0, %v458_v35  ;;  %v1663_v24 = vadd.f32 %v5498_v50, %v6770_v1  ;;  %5799 = vmatprep.mubr.msk.f32.mxu0 %vm519_vm0, %v6461_v19  ;;  %v466_v19 = vmax.f32 %v402_v20, 0.0  ;;  %v406_v35 = vadd.f32 %v6763_v57, %v331_v38  ;;  %v335_v62 = vmul.f32 %v6753_v54, %v257_v18  ;;  %v3636_v50 = vld [vmem:[#allocation2 + $0x7a] sm:$0xff] }
 0x12f   : > { %5849 = vmatprep.mubr.msk.f32.mxu1 %vm519_vm0, %v460_v58  ;;  %v1503_v39 = vpop.f32.mrf.mxu0 }
 0x130   : > { %v1890_v45 = vpop.f32.mrf.mxu1  ;;  %v6988_v49 = vadd.f32 %v5548_v60, %v1663_v24  ;;  %v1662_v34 = vadd.f32 %v1503_v39, %v6780_v26  ;;  %v470_v38 = vmax.f32 %v406_v35, 0.0  ;;  %v410_v13 = vadd.f32 %v6763_v57, %v335_v62 }
 0x131   : > { %v5501_v53 = vpop.f32.mrf.mxu0  ;;  %5800 = vmatmul.mubr.msk.f32.gmra.mxu0 %vm519_vm0, %v6471_v43  ;;  %v337_v43 = vmul.f32 %v6753_v54, %v259_v10  ;;  %v339_v24 = vmul.f32 %v6753_v54, %v261_v8  ;;  %v472_v39 = vmax.f32 %v408_v61, 0.0 }
 0x132   : > { %v5551_v1 = vpop.f32.mrf.mxu1  ;;  %5850 = vmatmul.mubr.msk.f32.gmra.mxu1 %vm519_vm0, %v462_v41  ;;  %v6997_v58 = vadd.f32 %v1890_v45, %v1662_v34  ;;  %v1665_v26 = vadd.f32 %v5501_v53, %v6795_v55  ;;  %5802 = vmatprep.mubr.msk.f32.mxu0 %vm519_vm0, %v3634_v17  ;;  %v265_v17 = vld [vmem:[%s6029_s10 + $0xd8] sm:$0xff]  ;;  %v474_v61 = vmax.f32 %v410_v13, 0.0 }
 0x133   : > { %5852 = vmatprep.mubr.msk.f32.mxu1 %vm519_vm0, %v464_v30  ;;  %v1513_v42 = vpop.f32.mrf.mxu0  ;;  %v341_v30 = vmul.f32 %v6753_v54, %v263_v31  ;;  %v412_v45 = vadd.f32 %v6763_v57, %v337_v43  ;;  %v3638_v53 = vld [vmem:[#allocation2 + $0x92] sm:$0xff] }
 0x134   : > { %v1900_v0 = vpop.f32.mrf.mxu1  ;;  %v7005_v60 = vadd.f32 %v5551_v1, %v1665_v26  ;;  %v1664_v41 = vadd.f32 %v1513_v42, %v6799_v11  ;;  %v3637_v11 = vld [vmem:[#allocation2 + $0x82] sm:$0xff]  ;;  %v414_v26 = vadd.f32 %v6763_v57, %v339_v24 }
 0x135   : > { %v5504_v20 = vpop.f32.mrf.mxu0  ;;  %5803 = vmatmul.mubr.msk.f32.gmra.mxu0 %vm519_vm0, %v3635_v59  ;;  %v267_v1 = vld [vmem:[%s6029_s10 + $0xe8] sm:$0xff]  ;;  %v416_v59 = vadd.f32 %v6763_v57, %v341_v30  ;;  %v476_v31 = vmax.f32 %v412_v45, 0.0 }
 0x136   : > { %v5554_v55 = vpop.f32.mrf.mxu1  ;;  %5853 = vmatmul.mubr.msk.f32.gmra.mxu1 %vm519_vm0, %v466_v19  ;;  %v7013_v37 = vadd.f32 %v1900_v0, %v1664_v41  ;;  %v1667_v18 = vadd.f32 %v5504_v20, %v6803_v52  ;;  %5805 = vmatprep.mubr.msk.f32.mxu0 %vm519_vm0, %v3636_v50  ;;  %v345_v42 = vmul.f32 %v6753_v54, %v267_v1  ;;  %v269_v0 = vld [vmem:[%s6029_s10 + $0xf8] sm:$0xff]  ;;  %v271_v50 = vld [vmem:[%s6029_s10 + $0x108] sm:$0xff]  ;;  %v478_v30 = vmax.f32 %v414_v26, 0.0 }
 0x137   : > { %5855 = vmatprep.mubr.msk.f32.mxu1 %vm519_vm0, %v468_v33  ;;  %v1523_v10 = vpop.f32.mrf.mxu0  ;;  %v343_v33 = vmul.f32 %v6753_v54, %v265_v17 }
 0x138   : > { %v1910_v34 = vpop.f32.mrf.mxu1  ;;  %v7021_v19 = vadd.f32 %v5554_v55, %v1667_v18  ;;  %v1666_v35 = vadd.f32 %v1523_v10, %v6807_v12  ;;  %v3639_v12 = vld [vmem:[#allocation2 + $0x9a] sm:$0xff]  ;;  %v3640_v55 = vld [vmem:[#allocation2 + $0xaa] sm:$0xff]  ;;  %v480_v10 = vmax.f32 %v416_v59, 0.0 }
 0x139   : > { %v5507_v62 = vpop.f32.mrf.mxu0  ;;  %5806 = vmatmul.mubr.msk.f32.gmra.mxu0 %vm519_vm0, %v3637_v11  ;;  %v418_v18 = vadd.f32 %v6763_v57, %v343_v33  ;;  %v347_v11 = vmul.f32 %v6753_v54, %v269_v0 }
 0x13a   : > { %v5557_v52 = vpop.f32.mrf.mxu1  ;;  %5856 = vmatmul.mubr.msk.f32.gmra.mxu1 %vm519_vm0, %v470_v38  ;;  %v7029_v43 = vadd.f32 %v1910_v34, %v1666_v35  ;;  %v1669_v8 = vadd.f32 %v5507_v62, %v6811_v14  ;;  %5808 = vmatprep.mubr.msk.f32.mxu0 %vm519_vm0, %v3638_v53  ;;  %v420_v34 = vadd.f32 %v6763_v57, %v345_v42  ;;  %v273_v53 = vld [vmem:[%s6029_s10 + $0x118] sm:$0xff]  ;;  %v3642_v62 = vld [vmem:[#allocation2 + $0xc2] sm:$0xff] }
 0x13b   : > { %5858 = vmatprep.mubr.msk.f32.mxu1 %vm519_vm0, %v472_v39  ;;  %v1533_v41 = vpop.f32.mrf.mxu0  ;;  %v349_v39 = vmul.f32 %v6753_v54, %v271_v50  ;;  %v482_v59 = vmax.f32 %v418_v18, 0.0 }
 0x13c   : > { %v1920_v20 = vpop.f32.mrf.mxu1  ;;  %v7037_v38 = vadd.f32 %v5557_v52, %v1669_v8  ;;  %v1668_v13 = vadd.f32 %v1533_v41, %v6815_v32  ;;  %v3641_v32 = vld [vmem:[#allocation2 + $0xb2] sm:$0xff]  ;;  %v275_v52 = vld [vmem:[%s6029_s10 + $0x128] sm:$0xff]  ;;  %v422_v8 = vadd.f32 %v6763_v57, %v347_v11  ;;  %v484_v50 = vmax.f32 %v420_v34, 0.0 }
 0x13d   : > { %v5510_v24 = vpop.f32.mrf.mxu0  ;;  %5809 = vmatmul.mubr.msk.f32.gmra.mxu0 %vm519_vm0, %v3639_v12  ;;  %v424_v12 = vadd.f32 %v6763_v57, %v349_v39  ;;  %v353_v41 = vmul.f32 %v6753_v54, %v275_v52 }
 0x13e   : > { %v5560_v14 = vpop.f32.mrf.mxu1  ;;  %5859 = vmatmul.mubr.msk.f32.gmra.mxu1 %vm519_vm0, %v474_v61  ;;  %v7045_v45 = vadd.f32 %v1920_v20, %v1668_v13  ;;  %v1671_v17 = vadd.f32 %v5510_v24, %v6820_v44  ;;  %5811 = vmatprep.mubr.msk.f32.mxu0 %vm519_vm0, %v3640_v55  ;;  %v277_v20 = vld [vmem:[%s6029_s10 + $0x138] sm:$0xff]  ;;  %v279_v55 = vld [vmem:[%s6029_s10 + $0x148] sm:$0xff]  ;;  %v486_v39 = vmax.f32 %v422_v8, 0.0 }
 0x13f   : > { %5861 = vmatprep.mubr.msk.f32.mxu1 %vm519_vm0, %v476_v31  ;;  %v1543_v1 = vpop.f32.mrf.mxu0  ;;  %v351_v31 = vmul.f32 %v6753_v54, %v273_v53 }
 0x140   : > { %v1930_v35 = vpop.f32.mrf.mxu1  ;;  %v7053_v61 = vadd.f32 %v5560_v14, %v1671_v17  ;;  %v1670_v26 = vadd.f32 %v1543_v1, %v6825_v7  ;;  %v3643_v7 = vld [vmem:[#allocation2 + $0xca] sm:$0xff]  ;;  %v3644_v14 = vld [vmem:[#allocation2 + $0xda] sm:$0xff]  ;;  %v488_v1 = vmax.f32 %v424_v12, 0.0 }
 0x141   : > { %v5513_v33 = vpop.f32.mrf.mxu0  ;;  %5812 = vmatmul.mubr.msk.f32.gmra.mxu0 %vm519_vm0, %v3641_v32  ;;  %v426_v17 = vadd.f32 %v6763_v57, %v351_v31  ;;  %v355_v32 = vmul.f32 %v6753_v54, %v277_v20 }
 0x142   : > { %v5563_v44 = vpop.f32.mrf.mxu1  ;;  %5862 = vmatmul.mubr.msk.f32.gmra.mxu1 %vm519_vm0, %v478_v30  ;;  %v7061_v42 = vadd.f32 %v1930_v35, %v1670_v26  ;;  %v1673_v0 = vadd.f32 %v5513_v33, %v6831_v63  ;;  %5814 = vmatprep.mubr.msk.f32.mxu0 %vm519_vm0, %v3642_v62  ;;  %v428_v35 = vadd.f32 %v6763_v57, %v353_v41  ;;  %v281_v62 = vld [vmem:[%s6029_s10 + $0x158] sm:$0xff] }
 0x143   : > { %5864 = vmatprep.mubr.msk.f32.mxu1 %vm519_vm0, %v480_v10  ;;  %v1553_v13 = vpop.f32.mrf.mxu0  ;;  %v357_v10 = vmul.f32 %v6753_v54, %v279_v55  ;;  %v3646_v33 = vld [vmem:[#allocation2 + $0xf2] sm:$0xff]  ;;  %v490_v12 = vmax.f32 %v426_v17, 0.0 }
 0x144   : > { %v1940_v24 = vpop.f32.mrf.mxu1  ;;  %v7069_v30 = vadd.f32 %v5563_v44, %v1673_v0  ;;  %v1672_v18 = vadd.f32 %v1553_v13, %v6837_v48  ;;  %v3645_v48 = vld [vmem:[#allocation2 + $0xe2] sm:$0xff]  ;;  %v430_v0 = vadd.f32 %v6763_v57, %v355_v32  ;;  %v492_v55 = vmax.f32 %v428_v35, 0.0 }
 0x145   : > { %v5516_v11 = vpop.f32.mrf.mxu0  ;;  %5815 = vmatmul.mubr.msk.f32.gmra.mxu0 %vm519_vm0, %v3643_v7  ;;  %v283_v44 = vld [vmem:[%s6029_s10 + $0x168] sm:$0xff]  ;;  %v432_v7 = vadd.f32 %v6763_v57, %v357_v10 }
 0x146   : > { %v5566_v63 = vpop.f32.mrf.mxu1  ;;  %5865 = vmatmul.mubr.msk.f32.gmra.mxu1 %vm519_vm0, %v482_v59  ;;  %v7077_v34 = vadd.f32 %v1940_v24, %v1672_v18  ;;  %v1675_v53 = vadd.f32 %v5516_v11, %v6843_v2  ;;  %5817 = vmatprep.mubr.msk.f32.mxu0 %vm519_vm0, %v3644_v14  ;;  %v361_v13 = vmul.f32 %v6753_v54, %v283_v44  ;;  %v285_v24 = vld [vmem:[%s6029_s10 + $0x178] sm:$0xff]  ;;  %v287_v14 = vld [vmem:[%s6029_s10 + $0x188] sm:$0xff]  ;;  %v494_v10 = vmax.f32 %v430_v0, 0.0 }
 0x147   : > { %5867 = vmatprep.mubr.msk.f32.mxu1 %vm519_vm0, %v484_v50  ;;  %v1563_v52 = vpop.f32.mrf.mxu0  ;;  %v359_v50 = vmul.f32 %v6753_v54, %v281_v62 }
 0x148   : > { %v1950_v26 = vpop.f32.mrf.mxu1  ;;  %v7085_v59 = vadd.f32 %v5566_v63, %v1675_v53  ;;  %v1674_v8 = vadd.f32 %v1563_v52, %v6849_v27  ;;  %v3647_v27 = vld [vmem:[#allocation2 + $0xfa] sm:$0xff]  ;;  %v3648_v63 = vld [vmem:[#allocation2 + $0x10a] sm:$0xff]  ;;  %v496_v52 = vmax.f32 %v432_v7, 0.0 }
 0x149   : > { %v5519_v31 = vpop.f32.mrf.mxu0  ;;  %5818 = vmatmul.mubr.msk.f32.gmra.mxu0 %vm519_vm0, %v3645_v48  ;;  %v434_v53 = vadd.f32 %v6763_v57, %v359_v50  ;;  %v363_v48 = vmul.f32 %v6753_v54, %v285_v24 }
 0x14a   : > { %v5569_v2 = vpop.f32.mrf.mxu1  ;;  %5868 = vmatmul.mubr.msk.f32.gmra.mxu1 %vm519_vm0, %v486_v39  ;;  %v7093_v41 = vadd.f32 %v1950_v26, %v1674_v8  ;;  %v1677_v20 = vadd.f32 %v5519_v31, %v6855_v9  ;;  %5820 = vmatprep.mubr.msk.f32.mxu0 %vm519_vm0, %v3646_v33  ;;  %v436_v26 = vadd.f32 %v6763_v57, %v361_v13  ;;  %v289_v33 = vld [vmem:[%s6029_s10 + $0x198] sm:$0xff]  ;;  %v3650_v31 = vld [vmem:[#allocation2 + $0x122] sm:$0xff] }
 0x14b   : > { %5870 = vmatprep.mubr.msk.f32.mxu1 %vm519_vm0, %v488_v1  ;;  %v1573_v18 = vpop.f32.mrf.mxu0  ;;  %v365_v1 = vmul.f32 %v6753_v54, %v287_v14  ;;  %v498_v7 = vmax.f32 %v434_v53, 0.0 }
 0x14c   : > { %v1960_v11 = vpop.f32.mrf.mxu1  ;;  %v7101_v39 = vadd.f32 %v5569_v2, %v1677_v20  ;;  %v1676_v17 = vadd.f32 %v1573_v18, %v6861_v22  ;;  %v3649_v22 = vld [vmem:[#allocation2 + $0x112] sm:$0xff]  ;;  %v291_v2 = vld [vmem:[%s6029_s10 + $0x1a8] sm:$0xff]  ;;  %v438_v20 = vadd.f32 %v6763_v57, %v363_v48  ;;  %v500_v14 = vmax.f32 %v436_v26, 0.0 }
 0x14d   : > { %v5522_v32 = vpop.f32.mrf.mxu0  ;;  %5821 = vmatmul.mubr.msk.f32.gmra.mxu0 %vm519_vm0, %v3647_v27  ;;  %v440_v27 = vadd.f32 %v6763_v57, %v365_v1  ;;  %v369_v18 = vmul.f32 %v6753_v54, %v291_v2 }
 0x14e   : > { %v5572_v9 = vpop.f32.mrf.mxu1  ;;  %5871 = vmatmul.mubr.msk.f32.gmra.mxu1 %vm519_vm0, %v490_v12  ;;  %v7109_v35 = vadd.f32 %v1960_v11, %v1676_v17  ;;  %v1679_v62 = vadd.f32 %v5522_v32, %v6867_v15  ;;  %5823 = vmatprep.mubr.msk.f32.mxu0 %vm519_vm0, %v3648_v63  ;;  %v293_v11 = vld [vmem:[%s6029_s10 + $0x1b8] sm:$0xff]  ;;  %v295_v63 = vld [vmem:[%s6029_s10 + $0x1c8] sm:$0xff]  ;;  %v502_v1 = vmax.f32 %v438_v20, 0.0 }
 0x14f   : > { %5873 = vmatprep.mubr.msk.f32.mxu1 %vm519_vm0, %v492_v55  ;;  %v1583_v44 = vpop.f32.mrf.mxu0  ;;  %v367_v55 = vmul.f32 %v6753_v54, %v289_v33 }
 0x150   : > { %v1970_v8 = vpop.f32.mrf.mxu1  ;;  %v7117_v12 = vadd.f32 %v5572_v9, %v1679_v62  ;;  %v1678_v0 = vadd.f32 %v1583_v44, %v6873_v51  ;;  %v3651_v51 = vld [vmem:[#allocation2 + $0x12a] sm:$0xff]  ;;  %v3652_v9 = vld [vmem:[#allocation2 + $0x13a] sm:$0xff]  ;;  %v504_v44 = vmax.f32 %v440_v27, 0.0 }
 0x151   : > { %v5525_v50 = vpop.f32.mrf.mxu0  ;;  %5824 = vmatmul.mubr.msk.f32.gmra.mxu0 %vm519_vm0, %v3649_v22  ;;  %v442_v62 = vadd.f32 %v6763_v57, %v367_v55  ;;  %v371_v22 = vmul.f32 %v6753_v54, %v293_v11 }
 0x152   : > { %v5575_v15 = vpop.f32.mrf.mxu1  ;;  %5874 = vmatmul.mubr.msk.f32.gmra.mxu1 %vm519_vm0, %v494_v10  ;;  %v7125_v13 = vadd.f32 %v1970_v8, %v1678_v0  ;;  %v1681_v24 = vadd.f32 %v5525_v50, %v6879_v23  ;;  %5826 = vmatprep.mubr.msk.f32.mxu0 %vm519_vm0, %v3650_v31  ;;  %v444_v8 = vadd.f32 %v6763_v57, %v369_v18  ;;  %v297_v31 = vld [vmem:[%s6029_s10 + $0x1d8] sm:$0xff] }
 0x153   : > { %5876 = vmatprep.mubr.msk.f32.mxu1 %vm519_vm0, %v496_v52  ;;  %v1593_v17 = vpop.f32.mrf.mxu0  ;;  %v373_v52 = vmul.f32 %v6753_v54, %v295_v63  ;;  %v3654_v50 = vld [vmem:[#allocation2 + $0x152] sm:$0xff]  ;;  %v446_v27 = vadd.f32 %v6763_v57, %v371_v22 }
 0x154   : > { %v1980_v32 = vpop.f32.mrf.mxu1  ;;  %v7133_v10 = vadd.f32 %v5575_v15, %v1681_v24  ;;  %v1680_v53 = vadd.f32 %v1593_v17, %v6885_v21  ;;  %v3653_v21 = vld [vmem:[#allocation2 + $0x142] sm:$0xff]  ;;  %v508_v63 = vmax.f32 %v444_v8, 0.0 }
 0x155   : > { %v5528_v48 = vpop.f32.mrf.mxu0  ;;  %5827 = vmatmul.mubr.msk.f32.gmra.mxu0 %vm519_vm0, %v3651_v51  ;;  %v299_v15 = vld [vmem:[%s6029_s10 + $0x1e8] sm:$0xff]  ;;  %v448_v51 = vadd.f32 %v6763_v57, %v373_v52 }
 0x156   : > { %v5578_v23 = vpop.f32.mrf.mxu1  ;;  %5877 = vmatmul.mubr.msk.f32.gmra.mxu1 %vm519_vm0, %v498_v7  ;;  %v7141_v26 = vadd.f32 %v1980_v32, %v1680_v53  ;;  %v1683_v33 = vadd.f32 %v5528_v48, %v6891_v29  ;;  %5829 = vmatprep.mubr.msk.f32.mxu0 %vm519_vm0, %v3652_v9  ;;  %v506_v29 = vmax.f32 %v442_v62, 0.0  ;;  %v377_v17 = vmul.f32 %v6753_v54, %v299_v15  ;;  %v3656_v53 = vld [vmem:[#allocation2 + $0x16a] sm:$0xff] }
 0x157   : > { %5879 = vmatprep.mubr.msk.f32.mxu1 %vm519_vm0, %v500_v14  ;;  %v1603_v2 = vpop.f32.mrf.mxu0  ;;  %v375_v14 = vmul.f32 %v6753_v54, %v297_v31  ;;  %v3658_v31 = vld [vmem:[#allocation2 + $0x182] sm:$0xff] }
 0x158   : > { %v1990_v0 = vpop.f32.mrf.mxu1  ;;  %v7149_v7 = vadd.f32 %v5578_v23, %v1683_v33  ;;  %v1682_v20 = vadd.f32 %v1603_v2, %v6897_v4  ;;  %v3655_v4 = vld [vmem:[#allocation2 + $0x15a] sm:$0xff]  ;;  %v3657_v33 = vld [vmem:[#allocation2 + $0x172] sm:$0xff] }
 0x159   : > { %v5531_v55 = vpop.f32.mrf.mxu0  ;;  %5830 = vmatmul.mubr.msk.f32.gmra.mxu0 %vm519_vm0, %v3653_v21  ;;  %v450_v22 = vadd.f32 %v6763_v57, %v375_v14  ;;  %v512_v21 = vmax.f32 %v448_v51, 0.0 }
 0x15a   : > { %v5581_v24 = vpop.f32.mrf.mxu1  ;;  %5880 = vmatmul.mubr.msk.f32.gmra.mxu1 %vm519_vm0, %v502_v1  ;;  %v7157_v18 = vadd.f32 %v1990_v0, %v1682_v20  ;;  %v1685_v11 = vadd.f32 %v5531_v55, %v6903_v36  ;;  %5832 = vmatprep.mubr.msk.f32.mxu0 %vm519_vm0, %v3654_v50  ;;  %v510_v36 = vmax.f32 %v446_v27, 0.0 }
 0x15b   : > { %5882 = vmatprep.mubr.msk.f32.mxu1 %vm519_vm0, %v504_v44  ;;  %v1613_v32 = vpop.f32.mrf.mxu0 }
 0x15c   : > { %v2000_v9 = vpop.f32.mrf.mxu1  ;;  %v7163_v48 = vadd.f32 %v5581_v24, %v1685_v11  ;;  %v1684_v23 = vadd.f32 %v1613_v32, %v6910_v16  ;;  %v452_v16 = vadd.f32 %v6763_v57, %v377_v17  ;;  %v3659_v57 = vld [vmem:[#allocation2 + $0x18a] sm:$0xff]  ;;  %v3661_v32 = vld [vmem:[#allocation2 + $0x1a2] sm:$0xff] }
 0x15d   : > { %v5534_v1 = vpop.f32.mrf.mxu0  ;;  %5833 = vmatmul.mubr.msk.f32.gmra.mxu0 %vm519_vm0, %v3655_v4 }
 0x15e   : > { %v5584_v62 = vpop.f32.mrf.mxu1  ;;  %5883 = vmatmul.mubr.msk.f32.gmra.mxu1 %vm519_vm0, %v506_v29  ;;  %v7169_v52 = vadd.f32 %v2000_v9, %v1684_v23  ;;  %v1687_v54 = vadd.f32 %v5534_v1, %v6916_v40  ;;  %5835 = vmatprep.mubr.msk.f32.mxu0 %vm519_vm0, %v3656_v53  ;;  %v514_v40 = vmax.f32 %v450_v22, 0.0  ;;  %v516_v24 = vmax.f32 %v452_v16, 0.0 }
 0x15f   : > { %5885 = vmatprep.mubr.msk.f32.mxu1 %vm519_vm0, %v508_v63  ;;  %v1623_v44 = vpop.f32.mrf.mxu0 }
 0x160   : > { %v2010_v8 = vpop.f32.mrf.mxu1  ;;  %v7175_v2 = vadd.f32 %v5584_v62, %v1687_v54  ;;  %v1686_v0 = vadd.f32 %v1623_v44, %v6925_v46  ;;  %v3660_v46 = vld [vmem:[#allocation2 + $0x19a] sm:$0xff] }
 0x161   : > { %v5537_v50 = vpop.f32.mrf.mxu0  ;;  %5836 = vmatmul.mubr.msk.f32.gmra.mxu0 %vm519_vm0, %v3657_v33 }
 0x162   : > { %v5587_v15 = vpop.f32.mrf.mxu1  ;;  %5886 = vmatmul.mubr.msk.f32.gmra.mxu1 %vm519_vm0, %v510_v36  ;;  %v7180_v20 = vadd.f32 %v2010_v8, %v1686_v0  ;;  %v1689_v55 = vadd.f32 %v5537_v50, %v6932_v25  ;;  %5838 = vmatprep.mubr.msk.f32.mxu0 %vm519_vm0, %v3658_v31  ;;  %v518_v25 = vmax.f32 %v6773_v5, 0.0 }
 0x163   : > { %5888 = vmatprep.mubr.msk.f32.mxu1 %vm519_vm0, %v512_v21  ;;  %v1633_v29 = vpop.f32.mrf.mxu0 }
 0x164   : > { %v2020_v27 = vpop.f32.mrf.mxu1  ;;  %v7185_v51 = vadd.f32 %v5587_v15, %v1689_v55  ;;  %v1688_v14 = vadd.f32 %v1633_v29, %v6942_v6 }
 0x165   : > { %v5540_v11 = vpop.f32.mrf.mxu0  ;;  %5839 = vmatmul.mubr.msk.f32.gmra.mxu0 %vm519_vm0, %v3659_v57 }
 0x166   : > { %v5590_v4 = vpop.f32.mrf.mxu1  ;;  %5889 = vmatmul.mubr.msk.f32.gmra.mxu1 %vm519_vm0, %v514_v40  ;;  %v7191_v63 = vadd.f32 %v2020_v27, %v1688_v14  ;;  %v1691_v17 = vadd.f32 %v5540_v11, %v6950_v3  ;;  %5841 = vmatprep.mubr.msk.f32.mxu0 %vm519_vm0, %v3660_v46 }
 0x167   : > { %5891 = vmatprep.mubr.msk.f32.mxu1 %vm519_vm0, %v516_v24  ;;  %v1643_v9 = vpop.f32.mrf.mxu0 }
 0x168   : > { %v2030_v53 = vpop.f32.mrf.mxu1  ;;  %v7196_v6 = vadd.f32 %v5590_v4, %v1691_v17  ;;  %v1690_v23 = vadd.f32 %v1643_v9, %v6958_v56 }
 0x169   : > { %v5543_v1 = vpop.f32.mrf.mxu0  ;;  %5842 = vmatmul.mubr.msk.f32.gmra.mxu0 %vm519_vm0, %v3661_v32 }
 0x16a   : > { %v5593_v62 = vpop.f32.mrf.mxu1  ;;  %5892 = vmatmul.mubr.msk.f32.gmra.mxu1 %vm519_vm0, %v518_v25  ;;  %v7201_v5 = vadd.f32 %v2030_v53, %v1690_v23  ;;  %v1693_v3 = vadd.f32 %v5543_v1, %v6964_v28 }
 0x16b   : > { %v1653_v36 = vpop.f32.mrf.mxu0 }
 0x16c   : > { %v2040_v22 = vpop.f32.mrf.mxu1  ;;  %v7204_v54 = vadd.f32 %v5593_v62, %v1693_v3  ;;  %v1692_v33 = vadd.f32 %v1653_v36, %v6973_v47 }
 0x16d   : > { %v5598_v21 = vpop.f32.mrf.mxu0 }
 0x16e   : > { %v5648_v16 = vpop.f32.mrf.mxu1  ;;  %v7207_v44 = vadd.f32 %v2040_v22, %v1692_v33  ;;  %v2437_v56 = vadd.f32 %v5598_v21, %v6988_v49 }
 0x16f   : > { %v2277_v8 = vpop.f32.mrf.mxu0 }
 0x170   : > { %v2664_v31 = vpop.f32.mrf.mxu1  ;;  %v7210_v0 = vadd.f32 %v5648_v16, %v2437_v56  ;;  %v2436_v50 = vadd.f32 %v2277_v8, %v6997_v58 }
 0x171   : > { %v5601_v15 = vpop.f32.mrf.mxu0 }
 0x172   : > { %v5651_v28 = vpop.f32.mrf.mxu1  ;;  %v7213_v40 = vadd.f32 %v2664_v31, %v2436_v50  ;;  %v2439_v55 = vadd.f32 %v5601_v15, %v7005_v60 }
 0x173   : > { %v2287_v57 = vpop.f32.mrf.mxu0 }
 0x174   : > { %v2674_v47 = vpop.f32.mrf.mxu1  ;;  %v7216_v24 = vadd.f32 %v5651_v28, %v2439_v55  ;;  %v2438_v29 = vadd.f32 %v2287_v57, %v7013_v37 }
 0x175   : > { %v5604_v27 = vpop.f32.mrf.mxu0 }
 0x176   : > { %v5654_v49 = vpop.f32.mrf.mxu1  ;;  %v7219_v46 = vadd.f32 %v2674_v47, %v2438_v29  ;;  %v2441_v14 = vadd.f32 %v5604_v27, %v7021_v19 }
 0x177   : > { %v2297_v11 = vpop.f32.mrf.mxu0 }
 0x178   : > { %v2684_v58 = vpop.f32.mrf.mxu1  ;;  %v7222_v4 = vadd.f32 %v5654_v49, %v2441_v14  ;;  %v2440_v25 = vadd.f32 %v2297_v11, %v7029_v43 }
 0x179   : > { %v5607_v17 = vpop.f32.mrf.mxu0 }
 0x17a   : > { %v5657_v60 = vpop.f32.mrf.mxu1  ;;  %v7225_v32 = vadd.f32 %v2684_v58, %v2440_v25  ;;  %v2443_v9 = vadd.f32 %v5607_v17, %v7037_v38 }
 0x17b   : > { %v2307_v53 = vpop.f32.mrf.mxu0 }
 0x17c   : > { %v2694_v37 = vpop.f32.mrf.mxu1  ;;  %v7228_v23 = vadd.f32 %v5657_v60, %v2443_v9  ;;  %v2442_v1 = vadd.f32 %v2307_v53, %v7045_v45 }
 0x17d   : > { %v5610_v62 = vpop.f32.mrf.mxu0 }
 0x17e   : > { %v5660_v19 = vpop.f32.mrf.mxu1  ;;  %v7231_v3 = vadd.f32 %v2694_v37, %v2442_v1  ;;  %v2445_v36 = vadd.f32 %v5610_v62, %v7053_v61 }
 0x17f   : > { %v2317_v22 = vpop.f32.mrf.mxu0 }
 0x180   : > { %v2704_v43 = vpop.f32.mrf.mxu1  ;;  %v7234_v33 = vadd.f32 %v5660_v19, %v2445_v36  ;;  %v2444_v21 = vadd.f32 %v2317_v22, %v7061_v42 }
 0x181   : > { %v5613_v16 = vpop.f32.mrf.mxu0 }
 0x182   : > { %v5663_v38 = vpop.f32.mrf.mxu1  ;;  %v7237_v56 = vadd.f32 %v2704_v43, %v2444_v21  ;;  %v2447_v8 = vadd.f32 %v5613_v16, %v7069_v30 }
 0x183   : > { %v2327_v31 = vpop.f32.mrf.mxu0 }
 0x184   : > { %v2714_v45 = vpop.f32.mrf.mxu1  ;;  %v7240_v50 = vadd.f32 %v5663_v38, %v2447_v8  ;;  %v2446_v15 = vadd.f32 %v2327_v31, %v7077_v34 }
 0x185   : > { %v5616_v28 = vpop.f32.mrf.mxu0 }
 0x186   : > { %v5666_v61 = vpop.f32.mrf.mxu1  ;;  %v7243_v55 = vadd.f32 %v2714_v45, %v2446_v15  ;;  %v2449_v57 = vadd.f32 %v5616_v28, %v7085_v59 }
 0x187   : > { %v2337_v47 = vpop.f32.mrf.mxu0 }
 0x188   : > { %v2724_v42 = vpop.f32.mrf.mxu1  ;;  %v7246_v29 = vadd.f32 %v5666_v61, %v2449_v57  ;;  %v2448_v27 = vadd.f32 %v2337_v47, %v7093_v41 }
 0x189   : > { %v5619_v49 = vpop.f32.mrf.mxu0 }
 0x18a   : > { %v5669_v30 = vpop.f32.mrf.mxu1  ;;  %v7249_v14 = vadd.f32 %v2724_v42, %v2448_v27  ;;  %v2451_v11 = vadd.f32 %v5619_v49, %v7101_v39 }
 0x18b   : > { %v2347_v58 = vpop.f32.mrf.mxu0 }
 0x18c   : > { %v2734_v34 = vpop.f32.mrf.mxu1  ;;  %v7252_v25 = vadd.f32 %v5669_v30, %v2451_v11  ;;  %v2450_v17 = vadd.f32 %v2347_v58, %v7109_v35 }
 0x18d   : > { %v5622_v60 = vpop.f32.mrf.mxu0 }
 0x18e   : > { %v5672_v59 = vpop.f32.mrf.mxu1  ;;  %v7255_v9 = vadd.f32 %v2734_v34, %v2450_v17  ;;  %v2453_v53 = vadd.f32 %v5622_v60, %v7117_v12 }
 0x18f   : > { %v2357_v37 = vpop.f32.mrf.mxu0 }
 0x190   : > { %v2744_v41 = vpop.f32.mrf.mxu1  ;;  %v7258_v1 = vadd.f32 %v5672_v59, %v2453_v53  ;;  %v2452_v62 = vadd.f32 %v2357_v37, %v7125_v13 }
 0x191   : > { %v5625_v19 = vpop.f32.mrf.mxu0 }
 0x192   : > { %v5675_v39 = vpop.f32.mrf.mxu1  ;;  %v7261_v36 = vadd.f32 %v2744_v41, %v2452_v62  ;;  %v2455_v22 = vadd.f32 %v5625_v19, %v7133_v10 }
 0x193   : > { %v2367_v43 = vpop.f32.mrf.mxu0 }
 0x194   : > { %v2754_v35 = vpop.f32.mrf.mxu1  ;;  %v7264_v21 = vadd.f32 %v5675_v39, %v2455_v22  ;;  %v2454_v16 = vadd.f32 %v2367_v43, %v7141_v26 }
 0x195   : > { %v5628_v38 = vpop.f32.mrf.mxu0 }
 0x196   : > { %v5678_v12 = vpop.f32.mrf.mxu1  ;;  %v7267_v8 = vadd.f32 %v2754_v35, %v2454_v16  ;;  %v2457_v31 = vadd.f32 %v5628_v38, %v7149_v7 }
 0x197   : > { %v2377_v45 = vpop.f32.mrf.mxu0 }
 0x198   : > { %7721 = vst [vmem:[#allocation20_spill] sm:$0xff] %v7267_v8  ;;  %v2764_v13 = vpop.f32.mrf.mxu1  ;;  %v7270_v15 = vadd.f32 %v5678_v12, %v2457_v31  ;;  %v2456_v28 = vadd.f32 %v2377_v45, %v7157_v18 }
 0x199   : > { %v5631_v61 = vpop.f32.mrf.mxu0 }
 0x19a   : > { %7722 = vst [vmem:[#allocation3_spill] sm:$0xff] %v7270_v15  ;;  %v5681_v10 = vpop.f32.mrf.mxu1  ;;  %v7273_v57 = vadd.f32 %v2764_v13, %v2456_v28  ;;  %v2459_v47 = vadd.f32 %v5631_v61, %v7163_v48 }
 0x19b   : > { %v2387_v42 = vpop.f32.mrf.mxu0 }
 0x19c   : > { %7723 = vst [vmem:[#allocation22_spill] sm:$0xff] %v7273_v57  ;;  %v2774_v26 = vpop.f32.mrf.mxu1  ;;  %v7276_v27 = vadd.f32 %v5681_v10, %v2459_v47  ;;  %v2458_v49 = vadd.f32 %v2387_v42, %v7169_v52 }
 0x19d   : > { %v5634_v30 = vpop.f32.mrf.mxu0 }
 0x19e   : > { %7724 = vst [vmem:[#allocation4_spill] sm:$0xff] %v7276_v27  ;;  %v5684_v7 = vpop.f32.mrf.mxu1  ;;  %v7279_v11 = vadd.f32 %v2774_v26, %v2458_v49  ;;  %v2461_v58 = vadd.f32 %v5634_v30, %v7175_v2 }
 0x19f   : > { %v2397_v34 = vpop.f32.mrf.mxu0 }
 0x1a0   : > { %7725 = vst [vmem:[#allocation24_spill] sm:$0xff] %v7279_v11  ;;  %v2784_v18 = vpop.f32.mrf.mxu1  ;;  %v7282_v17 = vadd.f32 %v5684_v7, %v2461_v58  ;;  %v2460_v60 = vadd.f32 %v2397_v34, %v7180_v20 }
 0x1a1   : > { %v5637_v59 = vpop.f32.mrf.mxu0 }
 0x1a2   : > { %7726 = vst [vmem:[#allocation5_spill] sm:$0xff] %v7282_v17  ;;  %v5687_v48 = vpop.f32.mrf.mxu1  ;;  %v7285_v53 = vadd.f32 %v2784_v18, %v2460_v60  ;;  %v2463_v37 = vadd.f32 %v5637_v59, %v7185_v51 }
 0x1a3   : > { %v2407_v41 = vpop.f32.mrf.mxu0 }
 0x1a4   : > { %7727 = vst [vmem:[#allocation6_spill] sm:$0xff] %v7285_v53  ;;  %v2794_v52 = vpop.f32.mrf.mxu1  ;;  %v7288_v62 = vadd.f32 %v5687_v48, %v2463_v37  ;;  %v2462_v19 = vadd.f32 %v2407_v41, %v7191_v63 }
 0x1a5   : > { %v5640_v39 = vpop.f32.mrf.mxu0 }
 0x1a6   : > { %7728 = vst [vmem:[#allocation7_spill] sm:$0xff] %v7288_v62  ;;  %v5690_v2 = vpop.f32.mrf.mxu1  ;;  %v7291_v22 = vadd.f32 %v2794_v52, %v2462_v19  ;;  %v2465_v43 = vadd.f32 %v5640_v39, %v7196_v6 }
 0x1a7   : > { %v2417_v35 = vpop.f32.mrf.mxu0 }
 0x1a8   : > { %7729 = vst [vmem:[#allocation8_spill] sm:$0xff] %v7291_v22  ;;  %v2804_v20 = vpop.f32.mrf.mxu1  ;;  %v7294_v16 = vadd.f32 %v5690_v2, %v2465_v43  ;;  %v2464_v38 = vadd.f32 %v2417_v35, %v7201_v5 }
 0x1a9   : > { %v5643_v12 = vpop.f32.mrf.mxu0 }
 0x1aa   : > { %7730 = vst [vmem:[#allocation9_spill] sm:$0xff] %v7294_v16  ;;  %v5693_v51 = vpop.f32.mrf.mxu1  ;;  %v7297_v31 = vadd.f32 %v2804_v20, %v2464_v38  ;;  %v2467_v45 = vadd.f32 %v5643_v12, %v7204_v54 }
 0x1ab   : > { %v2427_v13 = vpop.f32.mrf.mxu0 }
 0x1ac   : > { %7731 = vst [vmem:[#allocation10_spill] sm:$0xff] %v7297_v31  ;;  %v2814_v63 = vpop.f32.mrf.mxu1  ;;  %v7300_v28 = vadd.f32 %v5693_v51, %v2467_v45  ;;  %v2466_v61 = vadd.f32 %v2427_v13, %v7207_v44 }
 0x1ad   : > { %v5698_v10 = vpop.f32.mrf.mxu0 }
 0x1ae   : > { %7732 = vst [vmem:[#allocation11_spill] sm:$0xff] %v7300_v28  ;;  %v7303_v6 = vpop.f32.mrf.mxu1  ;;  %v7305_v47 = vadd.f32 %v2814_v63, %v2466_v61 }
 0x1af   : > { %v3052_v42 = vpop.f32.mrf.mxu0 }
 0x1b0   : > { %7733 = vst [vmem:[#allocation12_spill] sm:$0xff] %v7305_v47  ;;  %v7307_v26 = vpop.f32.mrf.mxu1 }
 0x1b1   : > { %v5701_v5 = vpop.f32.mrf.mxu0 }
 0x1b2   : > { %v7309_v49 = vpop.f32.mrf.mxu1 }
 0x1b3   : > { %v3062_v30 = vpop.f32.mrf.mxu0 }
 0x1b4   : > { %v7311_v7 = vpop.f32.mrf.mxu1 }
 0x1b5   : > { %v5704_v54 = vpop.f32.mrf.mxu0 }
 0x1b6   : > { %v7313_v58 = vpop.f32.mrf.mxu1 }
 0x1b7   : > { %v3072_v34 = vpop.f32.mrf.mxu0 }
 0x1b8   : > { %v7315_v18 = vpop.f32.mrf.mxu1 }
 0x1b9   : > { %v5707_v44 = vpop.f32.mrf.mxu0 }
 0x1ba   : > { %v7317_v60 = vpop.f32.mrf.mxu1 }
 0x1bb   : > { %v3082_v59 = vpop.f32.mrf.mxu0 }
 0x1bc   : > { %v7319_v48 = vpop.f32.mrf.mxu1 }
 0x1bd   : > { %v5710_v37 = vpop.f32.mrf.mxu0 }
 0x1be   : > { %v7321_v41 = vpop.f32.mrf.mxu1 }
 0x1bf   : > { %v3092_v52 = vpop.f32.mrf.mxu0 }
 0x1c0   : > { %v7323_v19 = vpop.f32.mrf.mxu1 }
 0x1c1   : > { %v5713_v39 = vpop.f32.mrf.mxu0 }
 0x1c2   : > { %v7325_v2 = vpop.f32.mrf.mxu1 }
 0x1c3   : > { %v3102_v43 = vpop.f32.mrf.mxu0 }
 0x1c4   : > { %v7327_v35 = vpop.f32.mrf.mxu1 }
 0x1c5   : > { %v7329_v20 = vpop.f32.mrf.mxu0 }
 0x1c6   : > { %v7331_v38 = vpop.f32.mrf.mxu1 }
 0x1c7   : > { %v7333_v12 = vpop.f32.mrf.mxu0 }
 0x1c8   : > { %v7335_v51 = vpop.f32.mrf.mxu1 }
 0x1c9   : > { %v7337_v45 = vpop.f32.mrf.mxu0 }
 0x1ca   : > { %v7339_v13 = vpop.f32.mrf.mxu1 }
 0x1cb   : > { %v7341_v63 = vpop.f32.mrf.mxu0 }
 0x1cc   : > { %v7343_v61 = vpop.f32.mrf.mxu1 }
 0x1cd   : > { %7734 = vst [vmem:[#allocation13_spill] sm:$0xff] %v7343_v61  ;;  %v7345_v47 = vpop.f32.mrf.mxu0 }
 0x1ce   : > { %v7347_v28 = vpop.f32.mrf.mxu1 }
 0x1cf   : > { %7735 = vst [vmem:[#allocation14_spill] sm:$0xff] %v7347_v28  ;;  %v7349_v31 = vpop.f32.mrf.mxu0 }
 0x1d0   : > { %v7351_v16 = vpop.f32.mrf.mxu1 }
 0x1d1   : > { %7736 = vst [vmem:[#allocation15_spill] sm:$0xff] %v7351_v16  ;;  %v7353_v22 = vpop.f32.mrf.mxu0 }
 0x1d2   : > { %v7355_v62 = vpop.f32.mrf.mxu1 }
 0x1d3   : > { %7737 = vst [vmem:[#allocation16_spill] sm:$0xff] %v7355_v62  ;;  %v7357_v53 = vpop.f32.mrf.mxu0 }
 0x1d4   : > { %7738 = vst [vmem:[#allocation17_spill] sm:$0xff] %v7357_v53  ;;  %v7359_v17 = vpop.f32.mrf.mxu1 }
 0x1d5   : > { %7739 = vst [vmem:[#allocation18_spill] sm:$0xff] %v7359_v17  ;;  %v7361_v11 = vpop.f32.mrf.mxu0 }
 0x1d6   : > { %7740 = vst [vmem:[#allocation19_spill] sm:$0xff] %v7361_v11  ;;  %v7363_v27 = vpop.f32.mrf.mxu1 }
 0x1d7   : > { %7741 = vst [vmem:[#allocation21_spill] sm:$0xff] %v7363_v27  ;;  %v7365_v57 = vpop.f32.mrf.mxu0 }
 0x1d8   : > { %7742 = vst [vmem:[#allocation23_spill] sm:$0xff] %v7365_v57  ;;  %v7367_v15 = vpop.f32.mrf.mxu1 }
 0x1d9   : > { %7743 = vst [vmem:[#allocation25_spill] sm:$0xff] %v7367_v15  ;;  %v7369_v8 = vpop.f32.mrf.mxu0 }
 0x1da   : > { %7744 = vst [vmem:[#allocation26_spill] sm:$0xff] %v7369_v8  ;;  %v7371_v28 = vpop.f32.mrf.mxu1 }
 0x1db   : > { %7745 = vst [vmem:[#allocation27_spill] sm:$0xff] %v7371_v28  ;;  %v7373_v16 = vpop.f32.mrf.mxu0 }
 0x1dc   : > { %7746 = vst [vmem:[#allocation28_spill] sm:$0xff] %v7373_v16  ;;  %v7375_v61 = vpop.f32.mrf.mxu1 }
 0x1dd   : > { %7747 = vst [vmem:[#allocation29_spill] sm:$0xff] %v7375_v61  ;;  %v7377_v62 = vpop.f32.mrf.mxu0 }
 0x1de   : > { %7748 = vst [vmem:[#allocation30_spill] sm:$0xff] %v7377_v62  ;;  %v7379_v53 = vpop.f32.mrf.mxu1 }
 0x1df   : > { %7749 = vst [vmem:[#allocation31_spill] sm:$0xff] %v7379_v53  ;;  %v7381_v17 = vpop.f32.mrf.mxu0  ;;  %v3212_v53 = vadd.f32 %v5698_v10, %v7210_v0  ;;  %v3220_v0 = vadd.f32 %v5710_v37, %v7234_v33 }
 0x1e0   : > { %v7383_v11 = vpop.f32.mrf.mxu1 }
 0x1e1   : > { %7750 = vst [vmem:[#allocation32_spill] sm:$0xff] %v7383_v11  ;;  %v7385_v27 = vpop.f32.mrf.mxu0  ;;  %v3211_v11 = vadd.f32 %v3052_v42, %v7213_v40  ;;  %v3219_v40 = vadd.f32 %v3092_v52, %v7237_v56 }
 0x1e2   : > { %7751 = vst [vmem:[#allocation33_spill] sm:$0xff] %v7385_v27  ;;  %v7387_v57 = vpop.f32.mrf.mxu1  ;;  %v3214_v27 = vadd.f32 %v5701_v5, %v7216_v24  ;;  %v3222_v24 = vadd.f32 %v5713_v39, %v7240_v50 }
 0x1e3   : > { %7752 = vst [vmem:[#allocation34_spill] sm:$0xff] %v7387_v57  ;;  %v7389_v15 = vpop.f32.mrf.mxu0  ;;  %v3213_v57 = vadd.f32 %v3062_v30, %v7219_v46 }
 0x1e4   : > { %7753 = vst [vmem:[#allocation35_spill] sm:$0xff] %v7389_v15  ;;  %v7391_v8 = vpop.f32.mrf.mxu1  ;;  %v3216_v15 = vadd.f32 %v5704_v54, %v7222_v4  ;;  %v3599_v4 = vadd.f32 %v7303_v6, %v3212_v53 }
 0x1e5   : > { %7754 = vst [vmem:[#allocation36_spill] sm:$0xff] %v7391_v8  ;;  %v7393_v28 = vpop.f32.mrf.mxu0  ;;  %v3215_v8 = vadd.f32 %v3072_v34, %v7225_v32  ;;  %v3598_v32 = vadd.f32 %v7307_v26, %v3211_v11  ;;  %v3600_v33 = vadd.f32 %v7311_v7, %v3213_v57  ;;  %v3224_v57 = vadd.f32 %v7329_v20, %v7246_v29  ;;  %v7761_v20 = vld [vmem:[#allocation20_spill] sm:$0xff] }
 0x1e6   : > { %7755 = vst [vmem:[#allocation37_spill] sm:$0xff] %v7393_v28  ;;  %v7395_v16 = vpop.f32.mrf.mxu1  ;;  %v3218_v28 = vadd.f32 %v5707_v44, %v7228_v23  ;;  %v3601_v23 = vadd.f32 %v7309_v49, %v3214_v27  ;;  %v3603_v56 = vadd.f32 %v7313_v58, %v3216_v15  ;;  %v7443_v27 = vadd.f32 %v7321_v41, %v3220_v0  ;;  %v7759_v41 = vld [vmem:[#allocation13_spill] sm:$0xff] }
 0x1e7   : > { %7756 = vst [vmem:[#allocation38_spill] sm:$0xff] %v7395_v16  ;;  %v7397_v61 = vpop.f32.mrf.mxu0  ;;  %v7434_v50 = vadd.f32 %v7315_v18, %v3215_v8  ;;  %v7450_v8 = vadd.f32 %v7325_v2, %v3222_v24  ;;  %v3223_v11 = vadd.f32 %v7333_v12, %v7249_v14  ;;  %v3225_v49 = vadd.f32 %v7341_v63, %v7255_v9 }
 0x1e8   : > { %7757 = vst [vmem:[#allocation39_spill] sm:$0xff] %v7397_v61  ;;  %v7399_v62 = vpop.f32.mrf.mxu1  ;;  %v7437_v42 = vadd.f32 %v7317_v60, %v3218_v28  ;;  %v3228_v7 = vadd.f32 %v7345_v47, %v7258_v1  ;;  %v3227_v14 = vadd.f32 %v7349_v31, %v7261_v36  ;;  %v7472_v1 = vadd.f32 %v7331_v38, %v3224_v57  ;;  %v7762_v38 = vld [vmem:[#allocation17_spill] sm:$0xff] }
 0x1e9   : > { %7758 = vst [vmem:[#allocation40_spill] sm:$0xff] %v7399_v62  ;;  %v7408_v16 = vpop.f32.mrf.mxu0  ;;  %v3217_v62 = vadd.f32 %v3082_v59, %v7231_v3  ;;  %v3221_v3 = vadd.f32 %v3102_v43, %v7243_v55  ;;  %v7446_v55 = vadd.f32 %v7323_v19, %v3219_v40  ;;  %v7475_v47 = vadd.f32 %v7335_v51, %v3223_v11  ;;  %v7760_v43 = vld [vmem:[#allocation14_spill] sm:$0xff] }
 0x1ea   : > { %v7410_v61 = vpop.f32.mrf.mxu1  ;;  %v3230_v31 = vadd.f32 %v7353_v22, %v7264_v21  ;;  %v7483_v52 = vadd.f32 %v7759_v41, %v3225_v49  ;;  %v3229_v12 = vadd.f32 %v7762_v38, %v7761_v20 }
 0x1eb   : > { %v7416_v10 = vpop.f32.mrf.mxu0  ;;  %v7440_v53 = vadd.f32 %v7319_v48, %v3217_v62  ;;  %v3226_v62 = vadd.f32 %v7337_v45, %v7252_v25  ;;  %v7459_v26 = vadd.f32 %v7327_v35, %v3221_v3  ;;  %v7488_v35 = vadd.f32 %v7760_v43, %v3228_v7 }
 0x1ec   : > { %v7418_v46 = vpop.f32.mrf.mxu1 }
 0x1ed   : > { %v5798_v5 = vpop.f32.mrf.mxu0  ;;  %v7478_v36 = vadd.f32 %v7339_v13, %v3226_v62  ;;  %v7763_v13 = vld [vmem:[#allocation15_spill] sm:$0xff] }
 0x1ee   : > { %v5848_v30 = vpop.f32.mrf.mxu1  ;;  %v3986_v15 = vadd.f32 %v5798_v5, %v3599_v4  ;;  %v7493_v63 = vadd.f32 %v7763_v13, %v3227_v14  ;;  %v7764_v4 = vld [vmem:[#allocation16_spill] sm:$0xff] }
 0x1ef   : > { %4372 = vst [vmem:[%s7425_s27 + $0x18] sm:$0xff] %v5848_v30  ;;  %v3826_v28 = vpop.f32.mrf.mxu0  ;;  %v4549_v25 = vmul.f32 %v5848_v30, %v5848_v30 }
 0x1f0   : > { %v4180_v6 = vpop.f32.mrf.mxu1  ;;  %4340 = vst [vmem:[%s7425_s27 + $0x10] sm:$0xff] %v3986_v15  ;;  %v3985_v29 = vadd.f32 %v3826_v28, %v3598_v32  ;;  %v4441_v54 = vmul.f32 %v3986_v15, %v3986_v15  ;;  %v7498_v32 = vadd.f32 %v7764_v4, %v3230_v31  ;;  %v7765_v28 = vld [vmem:[#allocation18_spill] sm:$0xff] }
 0x1f1   : > { %4371 = vst [vmem:[%s7425_s27 + $0x8] sm:$0xff] %v4180_v6  ;;  %v4548_v58 = vmul.f32 %v4180_v6, %v4180_v6  ;;  %v5801_v34 = vpop.f32.mrf.mxu0  ;;  %v4511_v60 = vadd.f32 %v5848_v30, %v4180_v6 }
 0x1f2   : > { %v5851_v18 = vpop.f32.mrf.mxu1  ;;  %4339 = vst [vmem:[%s7425_s27] sm:$0xff] %v3985_v29  ;;  %v4403_v44 = vadd.f32 %v3986_v15, %v3985_v29  ;;  %v4440_v9 = vmul.f32 %v3985_v29, %v3985_v29  ;;  %v3988_v59 = vadd.f32 %v5801_v34, %v3601_v23 }
 0x1f3   : > { %4374 = vst [vmem:[%s7425_s27 + $0x38] sm:$0xff] %v5851_v18  ;;  %v3836_v48 = vpop.f32.mrf.mxu0  ;;  %v4580_v51 = vadd.f32 %v4549_v25, %v4548_v58  ;;  %v4551_v23 = vmul.f32 %v5851_v18, %v5851_v18 }
 0x1f4   : > { %v4190_v37 = vpop.f32.mrf.mxu1  ;;  %v4472_v19 = vadd.f32 %v4441_v54, %v4440_v9  ;;  %4342 = vst [vmem:[%s7425_s27 + $0x30] sm:$0xff] %v3988_v59  ;;  %v3987_v39 = vadd.f32 %v3836_v48, %v3600_v33  ;;  %v4443_v15 = vmul.f32 %v3988_v59, %v3988_v59 }
 0x1f5   : > { %4373 = vst [vmem:[%s7425_s27 + $0x28] sm:$0xff] %v4190_v37  ;;  %v4512_v2 = vadd.f32 %v4511_v60, %v4190_v37  ;;  %v4550_v21 = vmul.f32 %v4190_v37, %v4190_v37  ;;  %v5804_v22 = vpop.f32.mrf.mxu0 }
 0x1f6   : > { %v5854_v45 = vpop.f32.mrf.mxu1  ;;  %4341 = vst [vmem:[%s7425_s27 + $0x20] sm:$0xff] %v3987_v39  ;;  %v4404_v0 = vadd.f32 %v4403_v44, %v3987_v39  ;;  %v4442_v40 = vmul.f32 %v3987_v39, %v3987_v39  ;;  %v3990_v24 = vadd.f32 %v5804_v22, %v3603_v56  ;;  %v7504_v56 = vadd.f32 %v7765_v28, %v3229_v12 }
 0x1f7   : > { %4376 = vst [vmem:[%s7425_s27 + $0x58] sm:$0xff] %v5854_v45  ;;  %v4581_v3 = vadd.f32 %v4580_v51, %v4550_v21  ;;  %v3846_v33 = vpop.f32.mrf.mxu0  ;;  %v4513_v30 = vadd.f32 %v5851_v18, %v4512_v2  ;;  %v7767_v18 = vld [vmem:[#allocation19_spill] sm:$0xff]  ;;  %v4553_v9 = vmul.f32 %v5854_v45, %v5854_v45  ;;  %v7768_v2 = vld [vmem:[#allocation22_spill] sm:$0xff] }
 0x1f8   : > { %v4200_v5 = vpop.f32.mrf.mxu1  ;;  %v4473_v57 = vadd.f32 %v4472_v19, %v4442_v40  ;;  %4344 = vst [vmem:[%s7425_s27 + $0x50] sm:$0xff] %v3990_v24  ;;  %v3989_v11 = vadd.f32 %v3846_v33, %v7434_v50  ;;  %v4405_v62 = vadd.f32 %v4404_v0, %v3988_v59  ;;  %v7766_v50 = vld [vmem:[#allocation3_spill] sm:$0xff]  ;;  %v4445_v37 = vmul.f32 %v3990_v24, %v3990_v24 }
 0x1f9   : > { %4375 = vst [vmem:[%s7425_s27 + $0x48] sm:$0xff] %v4200_v5  ;;  %v4514_v6 = vadd.f32 %v4513_v30, %v4200_v5  ;;  %v4552_v49 = vmul.f32 %v4200_v5, %v4200_v5  ;;  %v4582_v7 = vadd.f32 %v4581_v3, %v4551_v23  ;;  %v5807_v29 = vpop.f32.mrf.mxu0  ;;  %v3232_v44 = vadd.f32 %v7767_v18, %v7766_v50 }
 0x1fa   : > { %v5857_v14 = vpop.f32.mrf.mxu1  ;;  %4343 = vst [vmem:[%s7425_s27 + $0x40] sm:$0xff] %v3989_v11  ;;  %v4406_v54 = vadd.f32 %v4405_v62, %v3989_v11  ;;  %v4444_v25 = vmul.f32 %v3989_v11, %v3989_v11  ;;  %v4474_v58 = vadd.f32 %v4473_v57, %v4443_v15  ;;  %v3992_v34 = vadd.f32 %v5807_v29, %v7437_v42  ;;  %v7769_v42 = vld [vmem:[#allocation23_spill] sm:$0xff]  ;;  %v7771_v11 = vld [vmem:[#allocation25_spill] sm:$0xff] }
 0x1fb   : > { %4378 = vst [vmem:[%s7425_s27 + $0x78] sm:$0xff] %v5857_v14  ;;  %v4583_v60 = vadd.f32 %v4582_v7, %v4552_v49  ;;  %v3856_v59 = vpop.f32.mrf.mxu0  ;;  %v4515_v48 = vadd.f32 %v5854_v45, %v4514_v6  ;;  %v3231_v43 = vadd.f32 %v7769_v42, %v7768_v2 }
 0x1fc   : > { %v4210_v31 = vpop.f32.mrf.mxu1  ;;  %v4475_v41 = vadd.f32 %v4474_v58, %v4444_v25  ;;  %4346 = vst [vmem:[%s7425_s27 + $0x70] sm:$0xff] %v3992_v34  ;;  %v3991_v19 = vadd.f32 %v3856_v59, %v7440_v53  ;;  %v4407_v39 = vadd.f32 %v4406_v54, %v3990_v24  ;;  %v7770_v53 = vld [vmem:[#allocation21_spill] sm:$0xff]  ;;  %v4555_v24 = vmul.f32 %v5857_v14, %v5857_v14  ;;  %v7773_v58 = vld [vmem:[#allocation26_spill] sm:$0xff] }
 0x1fd   : > { %4377 = vst [vmem:[%s7425_s27 + $0x68] sm:$0xff] %v4210_v31  ;;  %v4516_v20 = vadd.f32 %v4515_v48, %v4210_v31  ;;  %v4554_v38 = vmul.f32 %v4210_v31, %v4210_v31  ;;  %v4584_v12 = vadd.f32 %v4583_v60, %v4553_v9  ;;  %v5810_v51 = vpop.f32.mrf.mxu0  ;;  %v7520_v40 = vadd.f32 %v7770_v53, %v3232_v44 }
 0x1fe   : > { %v5860_v21 = vpop.f32.mrf.mxu1  ;;  %4345 = vst [vmem:[%s7425_s27 + $0x60] sm:$0xff] %v3991_v19  ;;  %v4408_v22 = vadd.f32 %v4407_v39, %v3991_v19  ;;  %v4446_v45 = vmul.f32 %v3991_v19, %v3991_v19  ;;  %v4476_v13 = vadd.f32 %v4475_v41, %v4445_v37  ;;  %v3994_v0 = vadd.f32 %v5810_v51, %v7443_v27  ;;  %v7774_v41 = vld [vmem:[#allocation24_spill] sm:$0xff] }
 0x1ff   : > { %4380 = vst [vmem:[%s7425_s27 + $0x98] sm:$0xff] %v5860_v21  ;;  %v4585_v4 = vadd.f32 %v4584_v12, %v4554_v38  ;;  %v3866_v23 = vpop.f32.mrf.mxu0  ;;  %v4517_v33 = vadd.f32 %v5857_v14, %v4516_v20  ;;  %v4447_v5 = vmul.f32 %v3992_v34, %v3992_v34  ;;  %v7526_v27 = vadd.f32 %v7771_v11, %v3231_v43 }
 0x200   : > { %v4220_v3 = vpop.f32.mrf.mxu1  ;;  %v4477_v30 = vadd.f32 %v4476_v13, %v4446_v45  ;;  %4348 = vst [vmem:[%s7425_s27 + $0x90] sm:$0xff] %v3994_v0  ;;  %v3993_v15 = vadd.f32 %v3866_v23, %v7446_v55  ;;  %v4409_v57 = vadd.f32 %v4408_v22, %v3992_v34  ;;  %v7772_v55 = vld [vmem:[#allocation4_spill] sm:$0xff]  ;;  %v4557_v50 = vmul.f32 %v5860_v21, %v5860_v21 }
 0x201   : > { %4379 = vst [vmem:[%s7425_s27 + $0x88] sm:$0xff] %v4220_v3  ;;  %v4518_v62 = vadd.f32 %v4517_v33, %v4220_v3  ;;  %v4556_v28 = vmul.f32 %v4220_v3, %v4220_v3  ;;  %v4586_v6 = vadd.f32 %v4585_v4, %v4555_v24  ;;  %v5813_v49 = vpop.f32.mrf.mxu0  ;;  %v3234_v34 = vadd.f32 %v7773_v58, %v7772_v55 }
 0x202   : > { %v5863_v7 = vpop.f32.mrf.mxu1  ;;  %4347 = vst [vmem:[%s7425_s27 + $0x80] sm:$0xff] %v3993_v15  ;;  %v4410_v29 = vadd.f32 %v4409_v57, %v3993_v15  ;;  %v4448_v14 = vmul.f32 %v3993_v15, %v3993_v15  ;;  %v4478_v54 = vadd.f32 %v4477_v30, %v4447_v5  ;;  %v3996_v25 = vadd.f32 %v5813_v49, %v7450_v8  ;;  %v7775_v8 = vld [vmem:[#allocation28_spill] sm:$0xff]  ;;  %v7777_v5 = vld [vmem:[#allocation29_spill] sm:$0xff] }
 0x203   : > { %4382 = vst [vmem:[%s7425_s27 + $0xb8] sm:$0xff] %v5863_v7  ;;  %v4587_v18 = vadd.f32 %v4586_v6, %v4556_v28  ;;  %v3876_v44 = vpop.f32.mrf.mxu0  ;;  %v4519_v60 = vadd.f32 %v5860_v21, %v4518_v62  ;;  %v4449_v59 = vmul.f32 %v3994_v0, %v3994_v0  ;;  %v3233_v19 = vadd.f32 %v7775_v8, %v7774_v41 }
 0x204   : > { %v4230_v9 = vpop.f32.mrf.mxu1  ;;  %v4479_v31 = vadd.f32 %v4478_v54, %v4448_v14  ;;  %4350 = vst [vmem:[%s7425_s27 + $0xb0] sm:$0xff] %v3996_v25  ;;  %v3995_v48 = vadd.f32 %v3876_v44, %v7459_v26  ;;  %v4411_v37 = vadd.f32 %v4410_v29, %v3994_v0  ;;  %v7776_v26 = vld [vmem:[#allocation27_spill] sm:$0xff]  ;;  %v4559_v45 = vmul.f32 %v5863_v7, %v5863_v7  ;;  %v7779_v29 = vld [vmem:[#allocation30_spill] sm:$0xff] }
 0x205   : > { %4381 = vst [vmem:[%s7425_s27 + $0xa8] sm:$0xff] %v4230_v9  ;;  %v4520_v39 = vadd.f32 %v4519_v60, %v4230_v9  ;;  %v4558_v2 = vmul.f32 %v4230_v9, %v4230_v9  ;;  %v4588_v42 = vadd.f32 %v4587_v18, %v4557_v50  ;;  %v5816_v43 = vpop.f32.mrf.mxu0  ;;  %v7542_v22 = vadd.f32 %v7776_v26, %v3234_v34  ;;  %v7780_v60 = vld [vmem:[#allocation6_spill] sm:$0xff] }
 0x206   : > { %v5866_v20 = vpop.f32.mrf.mxu1  ;;  %4349 = vst [vmem:[%s7425_s27 + $0xa0] sm:$0xff] %v3995_v48  ;;  %v4412_v38 = vadd.f32 %v4411_v37, %v3995_v48  ;;  %v4450_v12 = vmul.f32 %v3995_v48, %v3995_v48  ;;  %v4480_v51 = vadd.f32 %v4479_v31, %v4449_v59  ;;  %v3998_v21 = vadd.f32 %v5816_v43, %v7472_v1 }
 0x207   : > { %4384 = vst [vmem:[%s7425_s27 + $0xd8] sm:$0xff] %v5866_v20  ;;  %v4589_v13 = vadd.f32 %v4588_v42, %v4558_v2  ;;  %v3886_v0 = vpop.f32.mrf.mxu0  ;;  %v4521_v24 = vadd.f32 %v5863_v7, %v4520_v39  ;;  %v4451_v4 = vmul.f32 %v3996_v25, %v3996_v25  ;;  %v7548_v1 = vadd.f32 %v7777_v5, %v3233_v19 }
 0x208   : > { %v4240_v53 = vpop.f32.mrf.mxu1  ;;  %v4481_v23 = vadd.f32 %v4480_v51, %v4450_v12  ;;  %4352 = vst [vmem:[%s7425_s27 + $0xd0] sm:$0xff] %v3998_v21  ;;  %v3997_v3 = vadd.f32 %v3886_v0, %v7475_v47  ;;  %v4413_v33 = vadd.f32 %v4412_v38, %v3996_v25  ;;  %v7778_v47 = vld [vmem:[#allocation5_spill] sm:$0xff]  ;;  %v4561_v54 = vmul.f32 %v5866_v20, %v5866_v20 }
 0x209   : > { %4383 = vst [vmem:[%s7425_s27 + $0xc8] sm:$0xff] %v4240_v53  ;;  %v4522_v30 = vadd.f32 %v4521_v24, %v4240_v53  ;;  %v4560_v15 = vmul.f32 %v4240_v53, %v4240_v53  ;;  %v4590_v57 = vadd.f32 %v4589_v13, %v4559_v45  ;;  %v5819_v11 = vpop.f32.mrf.mxu0  ;;  %v3236_v14 = vadd.f32 %v7779_v29, %v7778_v47  ;;  %v7782_v13 = vld [vmem:[#allocation32_spill] sm:$0xff] }
 0x20a   : > { %v5869_v62 = vpop.f32.mrf.mxu1  ;;  %4351 = vst [vmem:[%s7425_s27 + $0xc0] sm:$0xff] %v3997_v3  ;;  %v4414_v28 = vadd.f32 %v4413_v33, %v3997_v3  ;;  %v4452_v6 = vmul.f32 %v3997_v3, %v3997_v3  ;;  %v4482_v49 = vadd.f32 %v4481_v23, %v4451_v4  ;;  %v4000_v7 = vadd.f32 %v5819_v11, %v7478_v36 }
 0x20b   : > { %4386 = vst [vmem:[%s7425_s27 + $0xf8] sm:$0xff] %v5869_v62  ;;  %v4591_v25 = vadd.f32 %v4590_v57, %v4560_v15  ;;  %v3896_v55 = vpop.f32.mrf.mxu0  ;;  %v4523_v34 = vadd.f32 %v5866_v20, %v4522_v30  ;;  %v4453_v50 = vmul.f32 %v3998_v21, %v3998_v21  ;;  %v3235_v36 = vadd.f32 %v7381_v17, %v7780_v60  ;;  %v7784_v15 = vld [vmem:[#allocation33_spill] sm:$0xff] }
 0x20c   : > { %v4250_v58 = vpop.f32.mrf.mxu1  ;;  %v4483_v18 = vadd.f32 %v4482_v49, %v4452_v6  ;;  %4354 = vst [vmem:[%s7425_s27 + $0xf0] sm:$0xff] %v4000_v7  ;;  %v3999_v44 = vadd.f32 %v3896_v55, %v7483_v52  ;;  %v4415_v9 = vadd.f32 %v4414_v28, %v3998_v21  ;;  %v7781_v52 = vld [vmem:[#allocation31_spill] sm:$0xff]  ;;  %v4563_v43 = vmul.f32 %v5869_v62, %v5869_v62 }
 0x20d   : > { %4385 = vst [vmem:[%s7425_s27 + $0xe8] sm:$0xff] %v4250_v58  ;;  %v4524_v59 = vadd.f32 %v4523_v34, %v4250_v58  ;;  %v4562_v31 = vmul.f32 %v4250_v58, %v4250_v58  ;;  %v4592_v48 = vadd.f32 %v4591_v25, %v4561_v54  ;;  %v5822_v37 = vpop.f32.mrf.mxu0  ;;  %v7564_v42 = vadd.f32 %v7781_v52, %v3236_v14  ;;  %v7785_v54 = vld [vmem:[#allocation8_spill] sm:$0xff] }
 0x20e   : > { %v5872_v41 = vpop.f32.mrf.mxu1  ;;  %4353 = vst [vmem:[%s7425_s27 + $0xe0] sm:$0xff] %v3999_v44  ;;  %v4416_v8 = vadd.f32 %v4415_v9, %v3999_v44  ;;  %v4454_v19 = vmul.f32 %v3999_v44, %v3999_v44  ;;  %v4484_v39 = vadd.f32 %v4483_v18, %v4453_v50  ;;  %v4002_v2 = vadd.f32 %v5822_v37, %v7488_v35 }
 0x20f   : > { %4388 = vst [vmem:[%s7425_s27 + $0x118] sm:$0xff] %v5872_v41  ;;  %v4593_v20 = vadd.f32 %v4592_v48, %v4562_v31  ;;  %v3906_v17 = vpop.f32.mrf.mxu0  ;;  %v4525_v12 = vadd.f32 %v5869_v62, %v4524_v59  ;;  %v4455_v51 = vmul.f32 %v4000_v7, %v4000_v7  ;;  %v7570_v35 = vadd.f32 %v7782_v13, %v3235_v36 }
 0x210   : > { %v4260_v38 = vpop.f32.mrf.mxu1  ;;  %v4485_v21 = vadd.f32 %v4484_v39, %v4454_v19  ;;  %4356 = vst [vmem:[%s7425_s27 + $0x110] sm:$0xff] %v4002_v2  ;;  %v4001_v26 = vadd.f32 %v3906_v17, %v7493_v63  ;;  %v4417_v45 = vadd.f32 %v4416_v8, %v4000_v7  ;;  %v7783_v63 = vld [vmem:[#allocation7_spill] sm:$0xff]  ;;  %v4565_v11 = vmul.f32 %v5872_v41, %v5872_v41 }
 0x211   : > { %4387 = vst [vmem:[%s7425_s27 + $0x108] sm:$0xff] %v4260_v38  ;;  %v4526_v0 = vadd.f32 %v4525_v12, %v4260_v38  ;;  %v4564_v53 = vmul.f32 %v4260_v38, %v4260_v38  ;;  %v4594_v24 = vadd.f32 %v4593_v20, %v4563_v43  ;;  %v5825_v4 = vpop.f32.mrf.mxu0  ;;  %v3238_v57 = vadd.f32 %v7784_v15, %v7783_v63  ;;  %v7788_v43 = vld [vmem:[#allocation36_spill] sm:$0xff] }
 0x212   : > { %v5875_v23 = vpop.f32.mrf.mxu1  ;;  %4355 = vst [vmem:[%s7425_s27 + $0x100] sm:$0xff] %v4001_v26  ;;  %v4418_v3 = vadd.f32 %v4417_v45, %v4001_v26  ;;  %v4456_v33 = vmul.f32 %v4001_v26, %v4001_v26  ;;  %v4486_v5 = vadd.f32 %v4485_v21, %v4455_v51  ;;  %v4004_v30 = vadd.f32 %v5825_v4, %v7498_v32  ;;  %v7786_v32 = vld [vmem:[#allocation35_spill] sm:$0xff] }
 0x213   : > { %4390 = vst [vmem:[%s7425_s27 + $0x138] sm:$0xff] %v5875_v23  ;;  %v4595_v62 = vadd.f32 %v4594_v24, %v4564_v53  ;;  %v3916_v28 = vpop.f32.mrf.mxu0  ;;  %v4527_v49 = vadd.f32 %v5872_v41, %v4526_v0  ;;  %v4457_v7 = vmul.f32 %v4002_v2, %v4002_v2  ;;  %v3237_v25 = vadd.f32 %v7786_v32, %v7785_v54  ;;  %v7790_v0 = vld [vmem:[#allocation37_spill] sm:$0xff] }
 0x214   : > { %v4270_v6 = vpop.f32.mrf.mxu1  ;;  %v4487_v47 = vadd.f32 %v4486_v5, %v4456_v33  ;;  %4358 = vst [vmem:[%s7425_s27 + $0x130] sm:$0xff] %v4004_v30  ;;  %v4003_v29 = vadd.f32 %v3916_v28, %v7504_v56  ;;  %v4419_v14 = vadd.f32 %v4418_v3, %v4002_v2  ;;  %v7787_v56 = vld [vmem:[#allocation34_spill] sm:$0xff]  ;;  %v4567_v31 = vmul.f32 %v5875_v23, %v5875_v23 }
 0x215   : > { %4389 = vst [vmem:[%s7425_s27 + $0x128] sm:$0xff] %v4270_v6  ;;  %v4528_v55 = vadd.f32 %v4527_v49, %v4270_v6  ;;  %v4566_v58 = vmul.f32 %v4270_v6, %v4270_v6  ;;  %v4596_v34 = vadd.f32 %v4595_v62, %v4565_v11  ;;  %v5828_v50 = vpop.f32.mrf.mxu0  ;;  %v7586_v59 = vadd.f32 %v7787_v56, %v3238_v57  ;;  %v7791_v57 = vld [vmem:[#allocation10_spill] sm:$0xff] }
 0x216   : > { %v5878_v18 = vpop.f32.mrf.mxu1  ;;  %4357 = vst [vmem:[%s7425_s27 + $0x120] sm:$0xff] %v4003_v29  ;;  %v4420_v44 = vadd.f32 %v4419_v14, %v4003_v29  ;;  %v4458_v9 = vmul.f32 %v4003_v29, %v4003_v29  ;;  %v4488_v60 = vadd.f32 %v4487_v47, %v4457_v7  ;;  %v4006_v36 = vadd.f32 %v5828_v50, %v7520_v40 }
 0x217   : > { %4392 = vst [vmem:[%s7425_s27 + $0x158] sm:$0xff] %v5878_v18  ;;  %v4597_v48 = vadd.f32 %v4596_v34, %v4566_v58  ;;  %v3926_v37 = vpop.f32.mrf.mxu0  ;;  %v4529_v8 = vadd.f32 %v5875_v23, %v4528_v55  ;;  %v4459_v19 = vmul.f32 %v4004_v30, %v4004_v30  ;;  %v7592_v40 = vadd.f32 %v7788_v43, %v3237_v25 }
 0x218   : > { %v4280_v41 = vpop.f32.mrf.mxu1  ;;  %v4489_v39 = vadd.f32 %v4488_v60, %v4458_v9  ;;  %4360 = vst [vmem:[%s7425_s27 + $0x150] sm:$0xff] %v4006_v36  ;;  %v4005_v2 = vadd.f32 %v3926_v37, %v7526_v27  ;;  %v4421_v52 = vadd.f32 %v4420_v44, %v4004_v30  ;;  %v7789_v27 = vld [vmem:[#allocation9_spill] sm:$0xff]  ;;  %v4569_v24 = vmul.f32 %v5878_v18, %v5878_v18 }
 0x219   : > { %4391 = vst [vmem:[%s7425_s27 + $0x148] sm:$0xff] %v4280_v41  ;;  %v4530_v20 = vadd.f32 %v4529_v8, %v4280_v41  ;;  %v4568_v17 = vmul.f32 %v4280_v41, %v4280_v41  ;;  %v4598_v38 = vadd.f32 %v4597_v48, %v4567_v31  ;;  %v5831_v12 = vpop.f32.mrf.mxu0  ;;  %v3240_v53 = vadd.f32 %v7790_v0, %v7789_v27 }
 0x21a   : > { %v5881_v51 = vpop.f32.mrf.mxu1  ;;  %4359 = vst [vmem:[%s7425_s27 + $0x140] sm:$0xff] %v4005_v2  ;;  %v4422_v21 = vadd.f32 %v4421_v52, %v4005_v2  ;;  %v4460_v26 = vmul.f32 %v4005_v2, %v4005_v2  ;;  %v4490_v45 = vadd.f32 %v4489_v39, %v4459_v19  ;;  %v4008_v13 = vadd.f32 %v5831_v12, %v7542_v22  ;;  %v7792_v22 = vld [vmem:[#allocation39_spill] sm:$0xff] }
 0x21b   : > { %4394 = vst [vmem:[%s7425_s27 + $0x178] sm:$0xff] %v5881_v51  ;;  %v4599_v4 = vadd.f32 %v4598_v38, %v4568_v17  ;;  %v3936_v23 = vpop.f32.mrf.mxu0  ;;  %v4531_v33 = vadd.f32 %v5878_v18, %v4530_v20  ;;  %v4461_v5 = vmul.f32 %v4006_v36, %v4006_v36  ;;  %v3239_v11 = vadd.f32 %v7792_v22, %v7791_v57  ;;  %v7795_v52 = vld [vmem:[#allocation11_spill] sm:$0xff] }
 0x21c   : > { %v4290_v3 = vpop.f32.mrf.mxu1  ;;  %v4491_v30 = vadd.f32 %v4490_v45, %v4460_v26  ;;  %4362 = vst [vmem:[%s7425_s27 + $0x170] sm:$0xff] %v4008_v13  ;;  %v4007_v63 = vadd.f32 %v3936_v23, %v7548_v1  ;;  %v4423_v15 = vadd.f32 %v4422_v21, %v4006_v36  ;;  %v7793_v1 = vld [vmem:[#allocation38_spill] sm:$0xff]  ;;  %v4571_v25 = vmul.f32 %v5881_v51, %v5881_v51  ;;  %v7794_v36 = vld [vmem:[#allocation40_spill] sm:$0xff] }
 0x21d   : > { %4393 = vst [vmem:[%s7425_s27 + $0x168] sm:$0xff] %v4290_v3  ;;  %v4532_v62 = vadd.f32 %v4531_v33, %v4290_v3  ;;  %v4570_v28 = vmul.f32 %v4290_v3, %v4290_v3  ;;  %v4600_v6 = vadd.f32 %v4599_v4, %v4569_v24  ;;  %v5834_v49 = vpop.f32.mrf.mxu0  ;;  %v3627_v32 = vadd.f32 %v7793_v1, %v3240_v53 }
 0x21e   : > { %v5884_v7 = vpop.f32.mrf.mxu1  ;;  %4361 = vst [vmem:[%s7425_s27 + $0x160] sm:$0xff] %v4007_v63  ;;  %v4424_v47 = vadd.f32 %v4423_v15, %v4007_v63  ;;  %v4462_v29 = vmul.f32 %v4007_v63, %v4007_v63  ;;  %v4492_v14 = vadd.f32 %v4491_v30, %v4461_v5  ;;  %v4010_v54 = vadd.f32 %v5834_v49, %v7564_v42 }
 0x21f   : > { %4396 = vst [vmem:[%s7425_s27 + $0x198] sm:$0xff] %v5884_v7  ;;  %v4601_v55 = vadd.f32 %v4600_v6, %v4570_v28  ;;  %v3946_v58 = vpop.f32.mrf.mxu0  ;;  %v4533_v50 = vadd.f32 %v5881_v51, %v4532_v62  ;;  %v4463_v18 = vmul.f32 %v4008_v13, %v4008_v13  ;;  %v3626_v56 = vadd.f32 %v7794_v36, %v3239_v11 }
 0x220   : > { %v4300_v34 = vpop.f32.mrf.mxu1  ;;  %v4493_v44 = vadd.f32 %v4492_v14, %v4462_v29  ;;  %4364 = vst [vmem:[%s7425_s27 + $0x190] sm:$0xff] %v4010_v54  ;;  %v4009_v9 = vadd.f32 %v3946_v58, %v7570_v35  ;;  %v4425_v60 = vadd.f32 %v4424_v47, %v4008_v13  ;;  %v3242_v35 = vadd.f32 %v7408_v16, %v7795_v52  ;;  %v7796_v13 = vld [vmem:[#allocation12_spill] sm:$0xff] }
 0x221   : > { %4395 = vst [vmem:[%s7425_s27 + $0x188] sm:$0xff] %v4300_v34  ;;  %v4534_v42 = vadd.f32 %v4533_v50, %v4300_v34  ;;  %v4572_v31 = vmul.f32 %v4300_v34, %v4300_v34  ;;  %v4602_v48 = vadd.f32 %v4601_v55, %v4571_v25  ;;  %v5837_v37 = vpop.f32.mrf.mxu0  ;;  %v4573_v43 = vmul.f32 %v5884_v7, %v5884_v7 }
 0x222   : > { %v5887_v41 = vpop.f32.mrf.mxu1  ;;  %4363 = vst [vmem:[%s7425_s27 + $0x180] sm:$0xff] %v4009_v9  ;;  %v4426_v8 = vadd.f32 %v4425_v60, %v4009_v9  ;;  %v4464_v19 = vmul.f32 %v4009_v9, %v4009_v9  ;;  %v4494_v39 = vadd.f32 %v4493_v44, %v4463_v18  ;;  %v4012_v2 = vadd.f32 %v5837_v37, %v7586_v59 }
 0x223   : > { %4398 = vst [vmem:[%s7425_s27 + $0x1b8] sm:$0xff] %v5887_v41  ;;  %v4603_v20 = vadd.f32 %v4602_v48, %v4572_v31  ;;  %v3956_v17 = vpop.f32.mrf.mxu0  ;;  %v4535_v12 = vadd.f32 %v5884_v7, %v4534_v42  ;;  %v4465_v51 = vmul.f32 %v4010_v54, %v4010_v54  ;;  %v3241_v59 = vadd.f32 %v7416_v10, %v7796_v13 }
 0x224   : > { %v4310_v38 = vpop.f32.mrf.mxu1  ;;  %v4495_v21 = vadd.f32 %v4494_v39, %v4464_v19  ;;  %4366 = vst [vmem:[%s7425_s27 + $0x1b0] sm:$0xff] %v4012_v2  ;;  %v4011_v26 = vadd.f32 %v3956_v17, %v7592_v40  ;;  %v4427_v45 = vadd.f32 %v4426_v8, %v4010_v54  ;;  %v3629_v40 = vadd.f32 %v7410_v61, %v3242_v35 }
 0x225   : > { %4397 = vst [vmem:[%s7425_s27 + $0x1a8] sm:$0xff] %v4310_v38  ;;  %v4536_v27 = vadd.f32 %v4535_v12, %v4310_v38  ;;  %v4574_v0 = vmul.f32 %v4310_v38, %v4310_v38  ;;  %v4604_v16 = vadd.f32 %v4603_v20, %v4573_v43  ;;  %v5840_v53 = vpop.f32.mrf.mxu0  ;;  %v4575_v5 = vmul.f32 %v5887_v41, %v5887_v41 }
 0x226   : > { %v5890_v24 = vpop.f32.mrf.mxu1  ;;  %4365 = vst [vmem:[%s7425_s27 + $0x1a0] sm:$0xff] %v4011_v26  ;;  %v4428_v4 = vadd.f32 %v4427_v45, %v4011_v26  ;;  %v4466_v23 = vmul.f32 %v4011_v26, %v4011_v26  ;;  %v4496_v3 = vadd.f32 %v4495_v21, %v4465_v51  ;;  %v4014_v33 = vadd.f32 %v5840_v53, %v3627_v32 }
 0x227   : > { %4400 = vst [vmem:[%s7425_s27 + $0x1d8] sm:$0xff] %v5890_v24  ;;  %v4605_v30 = vadd.f32 %v4604_v16, %v4574_v0  ;;  %v3966_v63 = vpop.f32.mrf.mxu0  ;;  %v4537_v15 = vadd.f32 %v5887_v41, %v4536_v27  ;;  %v4467_v57 = vmul.f32 %v4012_v2, %v4012_v2  ;;  %v3628_v28 = vadd.f32 %v7418_v46, %v3241_v59 }
 0x228   : > { %v4320_v10 = vpop.f32.mrf.mxu1  ;;  %v4497_v22 = vadd.f32 %v4496_v3, %v4466_v23  ;;  %4368 = vst [vmem:[%s7425_s27 + $0x1d0] sm:$0xff] %v4014_v33  ;;  %v4013_v11 = vadd.f32 %v3966_v63, %v3626_v56  ;;  %v4429_v62 = vadd.f32 %v4428_v4, %v4012_v2  ;;  %v4577_v32 = vmul.f32 %v5890_v24, %v5890_v24 }
 0x229   : > { %4399 = vst [vmem:[%s7425_s27 + $0x1c8] sm:$0xff] %v4320_v10  ;;  %v4538_v6 = vadd.f32 %v4537_v15, %v4320_v10  ;;  %v4576_v49 = vmul.f32 %v4320_v10, %v4320_v10  ;;  %v4606_v7 = vadd.f32 %v4605_v30, %v4575_v5  ;;  %v5843_v61 = vpop.f32.mrf.mxu0  ;;  %v4469_v46 = vmul.f32 %v4014_v33, %v4014_v33 }
 0x22a   : > { %v5893_v47 = vpop.f32.mrf.mxu1  ;;  %4367 = vst [vmem:[%s7425_s27 + $0x1c0] sm:$0xff] %v4013_v11  ;;  %v4430_v29 = vadd.f32 %v4429_v62, %v4013_v11  ;;  %v4468_v14 = vmul.f32 %v4013_v11, %v4013_v11  ;;  %v4498_v54 = vadd.f32 %v4497_v22, %v4467_v57  ;;  %v4016_v1 = vadd.f32 %v5843_v61, %v3629_v40 }
 0x22b   : > { %4402 = vst [vmem:[%s7425_s27 + $0x1f8] sm:$0xff] %v5893_v47  ;;  %v4607_v25 = vadd.f32 %v4606_v7, %v4576_v49  ;;  %v3976_v55 = vpop.f32.mrf.mxu0  ;;  %v4539_v34 = vadd.f32 %v5890_v24, %v4538_v6  ;;  %v4579_v48 = vmul.f32 %v5893_v47, %v5893_v47 }
 0x22c   : > { %v4330_v58 = vpop.f32.mrf.mxu1  ;;  %v4499_v50 = vadd.f32 %v4498_v54, %v4468_v14  ;;  %4370 = vst [vmem:[%s7425_s27 + $0x1f0] sm:$0xff] %v4016_v1  ;;  %v4015_v18 = vadd.f32 %v3976_v55, %v3628_v28  ;;  %v4431_v44 = vadd.f32 %v4430_v29, %v4014_v33  ;;  %v4471_v8 = vmul.f32 %v4016_v1, %v4016_v1 }
 0x22d   : > { %4401 = vst [vmem:[%s7425_s27 + $0x1e8] sm:$0xff] %v4330_v58  ;;  %v4540_v9 = vadd.f32 %v4539_v34, %v4330_v58  ;;  %v4578_v60 = vmul.f32 %v4330_v58, %v4330_v58  ;;  %v4608_v36 = vadd.f32 %v4607_v25, %v4577_v32 }
 0x22e   : > { %4369 = vst [vmem:[%s7425_s27 + $0x1e0] sm:$0xff] %v4015_v18  ;;  %v4432_v56 = vadd.f32 %v4431_v44, %v4015_v18  ;;  %v4470_v42 = vmul.f32 %v4015_v18, %v4015_v18  ;;  %v4500_v31 = vadd.f32 %v4499_v50, %v4469_v46 }
 0x22f   : > { %v4541_v37 = vadd.f32 %v5893_v47, %v4540_v9  ;;  %v4609_v41 = vadd.f32 %v4608_v36, %v4578_v60 }
 0x230   : > { %v4433_v19 = vadd.f32 %v4432_v56, %v4016_v1  ;;  %v4501_v39 = vadd.f32 %v4500_v31, %v4470_v42 }
 0x231   : > { %v4542_v2 = vrot.slane %v4541_v37, 4  ;;  %v4610_v52 = vadd.f32 %v4609_v41, %v4579_v48 }
 0x232   : > { %v4434_v35 = vrot.slane %v4433_v19, 4  ;;  %v4502_v43 = vadd.f32 %v4501_v39, %v4471_v8 }
 0x233   : > { %v4543_v20 = vadd.f32 %v4542_v2, %v4541_v37  ;;  %v4611_v17 = vrot.slane %v4610_v52, 4 }
 0x234   : > { %v4435_v38 = vadd.f32 %v4434_v35, %v4433_v19  ;;  %v4503_v12 = vrot.slane %v4502_v43, 4 }
 0x235   : > { %v4544_v51 = vrot.slane %v4543_v20, 2  ;;  %v4612_v21 = vadd.f32 %v4611_v17, %v4610_v52 }
 0x236   : > { %v4436_v26 = vrot.slane %v4435_v38, 2  ;;  %v4504_v45 = vadd.f32 %v4503_v12, %v4502_v43 }
 0x237   : > { %v4545_v13 = vadd.f32 %v4544_v51, %v4543_v20  ;;  %v4613_v59 = vrot.slane %v4612_v21, 2 }
 0x238   : > { %v4437_v27 = vadd.f32 %v4436_v26, %v4435_v38  ;;  %v4505_v0 = vrot.slane %v4504_v45, 2 }
 0x239   : > { %v4614_v16 = vadd.f32 %v4613_v59, %v4612_v21  ;;  %v4546_v4 = vrot.slane %v4545_v13, 1 }
 0x23a   : > { %v4438_v53 = vrot.slane %v4437_v27, 1  ;;  %v4506_v24 = vadd.f32 %v4505_v0, %v4504_v45 }
 0x23b   : > { %v4615_v23 = vrot.slane %v4614_v16, 1  ;;  %v4547_v30 = vadd.f32 %v4546_v4, %v4545_v13 }
 0x23c   : > { %v4507_v3 = vrot.slane %v4506_v24, 1  ;;  %v4439_v40 = vadd.f32 %v4438_v53, %v4437_v27 }
 0x23d   : > { %v4616_v33 = vadd.f32 %v4615_v23, %v4614_v16 }
 0x23e   : > { %v4508_v5 = vadd.f32 %v4507_v3, %v4506_v24 }
 0x23f   : > { %v4617_v10 = vsel %vm4509_vm3, %v4547_v30, %v4616_v33 }
 0x240   : > { %v4510_v63 = vsel %vm4509_vm3, %v4439_v40, %v4508_v5 }
 0x241   : > { %v4620_v15 = vcombine.low %v4510_v63, %v4617_v10 }
 0x243   : > { %5058 = vst.sshfl [vmem:[%s237_s6] sm:$0x33 pattern:$0x76325410] %v4620_v15 }
 0x244 PF: > { %s16_s18 = sadd.s32 1, %s5909_s18  }
 0x245   : > { %p13_p4 = scmp.ge.s32.totalorder %s16_s18, 4  }
 0x247   :  { %15 = sbr.rel (!%p13_p4) target bundleno = 1 (0x1), region = 90 }

</bundles_post_ra>
